<compile_context>
chip_gen: v7x
topology: tpu7x:2x2x1
jax: 0.10.0
libtpu: 0.0.40
codegen_flags: <defaults>
</compile_context>

<pallas_src>
import functools

import jax
import jax.numpy as jnp
from jax.experimental import pallas as pl
from jax.experimental.pallas import tpu as pltpu


def _conv3d_block_kernel(x_ref, w1_ref, b1_ref, w2_ref, b2_ref, mask_ref, o_ref,
                         xp1_ref, xcol1_ref, xp2_ref, xcol2_ref, *,
                         D, H, W, KD, KH, KW, pd):
    """Fused [conv3d + bias + InstanceNorm3d + ReLU] x2 for one batch element.

    x_ref:    (1, Cin, D*H*W)        unpadded input, channels-first, flat spatial
    w1_ref:   (Cout, KD*KH*KW*Cin)   layer-1 weights (tap-major columns)
    b1_ref:   (Cout, 1)
    w2_ref:   (Cout, KD*KH*KW*Cout)  layer-2 weights
    b2_ref:   (Cout, 1)
    mask_ref: (1, Npad)              1.0 at flat positions that are valid outputs
    o_ref:    (1, Cout, Npad)        lane-dense output slab (valid region sliced in glue)
    xp*_ref:  (C, Npad + off_max)    zero-padded flat activation buffers (VMEM)
    xcol*_ref:(K, Npad)              im2col matrices (VMEM)
    """
    Dp, Hp, Wp = D + 2 * pd, H + 2, W + 2
    HpWp = Hp * Wp
    Npad = Dp * HpWp
    Cin = x_ref.shape[1]
    Cout = o_ref.shape[1]
    inv_n = 1.0 / (D * H * W)
    eps = 1e-5

    mask = mask_ref[...]                                     # (1, Npad)

    # ---------------- layer 1: place input into zero-padded flat buffer --------
    xp1_ref[...] = jnp.zeros_like(xp1_ref)
    for d in range(D):
        for h in range(H):
            src = (d * H + h) * W
            dst = (d + pd) * HpWp + (h + 1) * Wp + 1
            xp1_ref[:, dst:dst + W] = x_ref[0, :, src:src + W]

    # ---------------- layer 1: im2col (lane-offset slices) + one MXU matmul ----
    for kd in range(KD):
        for kh in range(KH):
            for kw in range(KW):
                k = (kd * KH + kh) * KW + kw
                off = kd * HpWp + kh * Wp + kw
                xcol1_ref[k * Cin:(k + 1) * Cin, :] = xp1_ref[:, off:off + Npad]

    acc1 = jnp.dot(w1_ref[...], xcol1_ref[...],
                   preferred_element_type=jnp.float32) + b1_ref[...]

    # InstanceNorm3d (biased variance, eps=1e-5, affine=False) over valid voxels.
    mean1 = jnp.sum(acc1 * mask, axis=1, keepdims=True) * inv_n
    var1 = jnp.sum(((acc1 - mean1) ** 2) * mask, axis=1, keepdims=True) * inv_n
    y1 = jnp.maximum((acc1 - mean1) * jax.lax.rsqrt(var1 + eps), 0.0) * mask

    # ---------------- layer 2: re-pad intermediate with ONE shifted store ------
    # Valid flat output index p maps to padded flat index p + shift; masked
    # (invalid) positions are exactly the ones that must be zero padding.
    shift = pd * HpWp + Wp + 1
    xp2_ref[...] = jnp.zeros_like(xp2_ref)
    xp2_ref[:, shift:shift + Npad] = y1

    for kd in range(KD):
        for kh in range(KH):
            for kw in range(KW):
                k = (kd * KH + kh) * KW + kw
                off = kd * HpWp + kh * Wp + kw
                xcol2_ref[k * Cout:(k + 1) * Cout, :] = xp2_ref[:, off:off + Npad]

    acc2 = jnp.dot(w2_ref[...], xcol2_ref[...],
                   preferred_element_type=jnp.float32) + b2_ref[...]

    mean2 = jnp.sum(acc2 * mask, axis=1, keepdims=True) * inv_n
    var2 = jnp.sum(((acc2 - mean2) ** 2) * mask, axis=1, keepdims=True) * inv_n
    y2 = jnp.maximum((acc2 - mean2) * jax.lax.rsqrt(var2 + eps), 0.0)

    # Lane-dense output slab; garbage (non-valid) lanes are discarded in glue.
    o_ref[0] = y2.astype(o_ref.dtype)


def conv3d_block_forward(x, params, kv):
    """Conv3dBlock forward.

    x:      (N, Cin, D, H, W)  float32 (NCDHW, PyTorch layout)
    params: (w1, b1, w2, b2); w* in OIDHW layout, b* shape (Cout,)
    returns (N, Cout, D, H, W) float32
    """
    w1, b1, w2, b2 = params
    N, Cin, D, H, W = x.shape
    Cout = w1.shape[0]
    assert kv % 2 == 1, "only odd depth kernel sizes supported"
    KD, KH, KW = kv, 3, 3
    pd = (kv - 1) // 2
    Dp, Hp, Wp = D + 2 * pd, H + 2, W + 2
    HpWp = Hp * Wp
    Npad = Dp * HpWp
    off_max = (KD - 1) * HpWp + (KH - 1) * Wp + (KW - 1)
    L = Npad + off_max
    K1 = KD * KH * KW * Cin
    K2 = KD * KH * KW * Cout

    # Tiny / metadata-only host-side re-layouts (weights, bias, flat view of x).
    x_flat = x.reshape(N, Cin, D * H * W)
    w1_t = jnp.transpose(w1, (0, 2, 3, 4, 1)).reshape(Cout, K1)
    w2_t = jnp.transpose(w2, (0, 2, 3, 4, 1)).reshape(Cout, K2)
    b1_c = b1.reshape(Cout, 1)
    b2_c = b2.reshape(Cout, 1)

    # Validity mask over the padded flat index space (1.0 at real output voxels).
    d_i = jnp.arange(Dp)[:, None, None]
    h_i = jnp.arange(Hp)[None, :, None]
    w_i = jnp.arange(Wp)[None, None, :]
    mask = ((d_i < D) & (h_i < H) & (w_i < W)).astype(jnp.float32).reshape(1, Npad)

    kernel = functools.partial(_conv3d_block_kernel,
                               D=D, H=H, W=W, KD=KD, KH=KH, KW=KW, pd=pd)

    flops = 2 * N * Npad * Cout * (K1 + K2)
    bytes_accessed = 4 * (x.size + w1.size + w2.size + b1.size + b2.size
                          + N * Cout * Npad + Npad)

    out_slab = pl.pallas_call(
        kernel,
        out_shape=jax.ShapeDtypeStruct((N, Cout, Npad), jnp.float32),
        grid=(N,),
        in_specs=[
            pl.BlockSpec((1, Cin, D * H * W), lambda n: (n, 0, 0)),
            pl.BlockSpec((Cout, K1), lambda n: (0, 0)),
            pl.BlockSpec((Cout, 1), lambda n: (0, 0)),
            pl.BlockSpec((Cout, K2), lambda n: (0, 0)),
            pl.BlockSpec((Cout, 1), lambda n: (0, 0)),
            pl.BlockSpec((1, Npad), lambda n: (0, 0)),
        ],
        out_specs=pl.BlockSpec((1, Cout, Npad), lambda n: (n, 0, 0)),
        scratch_shapes=[
            pltpu.VMEM((Cin, L), jnp.float32),    # padded flat input, layer 1
            pltpu.VMEM((K1, Npad), jnp.float32),  # im2col matrix, layer 1
            pltpu.VMEM((Cout, L), jnp.float32),   # padded flat intermediate (layer 2 input)
            pltpu.VMEM((K2, Npad), jnp.float32),  # im2col matrix, layer 2
        ],
        compiler_params=pltpu.CompilerParams(
            dimension_semantics=("parallel",)),
        cost_estimate=pl.CostEstimate(
            flops=flops, transcendentals=2 * N * Cout,
            bytes_accessed=bytes_accessed),
    )(x_flat, w1_t, b1_c, w2_t, b2_c, mask)

    # Extract the valid interior; result is directly NCDHW.
    return out_slab.reshape(N, Cout, Dp, Hp, Wp)[:, :, :D, :H, :W]


# ----------------------------- pure-JAX reference -----------------------------
def _ref_layer(x, w, b, kv):
    pd = (kv - 1) // 2
    y = jax.lax.conv_general_dilated(
        x, w,
        window_strides=(1, 1, 1),
        padding=[(pd, pd), (1, 1), (1, 1)],
        dimension_numbers=("NCDHW", "OIDHW", "NCDHW"),
    )
    y = y + b[None, :, None, None, None]
    mean = jnp.mean(y, axis=(2, 3, 4), keepdims=True)
    var = jnp.mean((y - mean) ** 2, axis=(2, 3, 4), keepdims=True)
    return jnp.maximum((y - mean) * jax.lax.rsqrt(var + 1e-5), 0.0)


def ref_forward(x, params, kv):
    w1, b1, w2, b2 = params
    return _ref_layer(_ref_layer(x, w1, b1, kv), w2, b2, kv)


if __name__ == "__main__":
    # Small shapes consistent with the module's forward (NCDHW / OIDHW layouts).
    N, in_chans, out_chans = 2, 4, 8
    D, H, W = 4, 8, 8
    kv = 3
    drop_prob = 0.1  # Dropout3d is identity in eval mode.

    key = jax.random.PRNGKey(0)
    k_x, k_w1, k_b1, k_w2, k_b2 = jax.random.split(key, 5)

    x = jax.random.normal(k_x, (N, in_chans, D, H, W), dtype=jnp.float32)
    w1 = 0.1 * jax.random.normal(k_w1, (out_chans, in_chans, kv, 3, 3), jnp.float32)
    b1 = 0.1 * jax.random.normal(k_b1, (out_chans,), jnp.float32)
    w2 = 0.1 * jax.random.normal(k_w2, (out_chans, out_chans, kv, 3, 3), jnp.float32)
    b2 = 0.1 * jax.random.normal(k_b2, (out_chans,), jnp.float32)
    params = (w1, b1, w2, b2)

    out = jax.block_until_ready(conv3d_block_forward(x, params, kv))
    ref = jax.block_until_ready(ref_forward(x, params, kv))

    assert out.shape == (N, out_chans, D, H, W), out.shape
    max_err = float(jnp.max(jnp.abs(out - ref)))
    assert jnp.allclose(out, ref, rtol=1e-4, atol=1e-4), max_err

    print("KERNEL_OK")
</pallas_src>

<mosaic_0001>
module attributes {stable_mosaic.version = 11 : i64} {
  func.func @_conv3d_block_kernel(%arg0: i32, %arg1: memref<1x4x256xf32, #tpu.memory_space<vmem>>, %arg2: memref<8x108xf32, #tpu.memory_space<vmem>>, %arg3: memref<8x1xf32, #tpu.memory_space<vmem>>, %arg4: memref<8x216xf32, #tpu.memory_space<vmem>>, %arg5: memref<8x1xf32, #tpu.memory_space<vmem>>, %arg6: memref<1x600xf32, #tpu.memory_space<vmem>>, %arg7: memref<1x8x600xf32, #tpu.memory_space<vmem>>, %arg8: memref<4x822xf32, #tpu.memory_space<vmem>>, %arg9: memref<108x600xf32, #tpu.memory_space<vmem>>, %arg10: memref<8x822xf32, #tpu.memory_space<vmem>>, %arg11: memref<216x600xf32, #tpu.memory_space<vmem>>) attributes {dimension_semantics = [#tpu.dimension_semantics<parallel>], iteration_bounds = array<i64: 2>, scalar_prefetch = 0 : i64, scratch_operands = 4 : i64, tpu.core_type = #tpu.core_type<tc>, window_params = [{transform_indices = @transform_0, window_bounds = array<i64: 1, 4, 256>}, {pipeline_mode = #tpu.pipeline_mode<synchronous>, transform_indices = @transform_1, window_bounds = array<i64: 8, 108>}, {pipeline_mode = #tpu.pipeline_mode<synchronous>, transform_indices = @transform_2, window_bounds = array<i64: 8, 1>}, {pipeline_mode = #tpu.pipeline_mode<synchronous>, transform_indices = @transform_3, window_bounds = array<i64: 8, 216>}, {pipeline_mode = #tpu.pipeline_mode<synchronous>, transform_indices = @transform_4, window_bounds = array<i64: 8, 1>}, {pipeline_mode = #tpu.pipeline_mode<synchronous>, transform_indices = @transform_5, window_bounds = array<i64: 1, 600>}, {transform_indices = @transform_6, window_bounds = array<i64: 1, 8, 600>}]} {
    %c0 = arith.constant 0 : index
    %c0_0 = arith.constant 0 : index
    %0 = vector.load %arg6[%c0, %c0_0] : memref<1x600xf32, #tpu.memory_space<vmem>>, vector<1x600xf32>
    %cst = arith.constant 0.000000e+00 : f32
    %1 = vector.broadcast %cst : f32 to vector<4x822xf32>
    %c0_1 = arith.constant 0 : index
    %c0_2 = arith.constant 0 : index
    %2 = vector.load %arg8[%c0_1, %c0_2] : memref<4x822xf32, #tpu.memory_space<vmem>>, vector<4x822xf32>
    tpu.vector_store %arg8[%c0_1, %c0_2], %1 {strides = array<i32>} : memref<4x822xf32, #tpu.memory_space<vmem>>, vector<4x822xf32>,
    %c0_3 = arith.constant 0 : index
    %c0_4 = arith.constant 0 : index
    %c0_5 = arith.constant 0 : index
    %3 = vector.load %arg1[%c0_3, %c0_4, %c0_5] : memref<1x4x256xf32, #tpu.memory_space<vmem>>, vector<1x4x8xf32>
    %4 = vector.shape_cast %3 : vector<1x4x8xf32> to vector<4x8xf32>
    %c0_6 = arith.constant 0 : index
    %c111 = arith.constant 111 : index
    %5 = vector.load %arg8[%c0_6, %c111] : memref<4x822xf32, #tpu.memory_space<vmem>>, vector<4x8xf32>
    tpu.vector_store %arg8[%c0_6, %c111], %4 {strides = array<i32>} : memref<4x822xf32, #tpu.memory_space<vmem>>, vector<4x8xf32>,
    %c0_7 = arith.constant 0 : index
    %c0_8 = arith.constant 0 : index
    %c8 = arith.constant 8 : index
    %6 = vector.load %arg1[%c0_7, %c0_8, %c8] : memref<1x4x256xf32, #tpu.memory_space<vmem>>, vector<1x4x8xf32>
    %7 = vector.shape_cast %6 : vector<1x4x8xf32> to vector<4x8xf32>
    %c0_9 = arith.constant 0 : index
    %c121 = arith.constant 121 : index
    %8 = vector.load %arg8[%c0_9, %c121] : memref<4x822xf32, #tpu.memory_space<vmem>>, vector<4x8xf32>
    tpu.vector_store %arg8[%c0_9, %c121], %7 {strides = array<i32>} : memref<4x822xf32, #tpu.memory_space<vmem>>, vector<4x8xf32>,
    %c0_10 = arith.constant 0 : index
    %c0_11 = arith.constant 0 : index
    %c16 = arith.constant 16 : index
    %9 = vector.load %arg1[%c0_10, %c0_11, %c16] : memref<1x4x256xf32, #tpu.memory_space<vmem>>, vector<1x4x8xf32>
    %10 = vector.shape_cast %9 : vector<1x4x8xf32> to vector<4x8xf32>
    %c0_12 = arith.constant 0 : index
    %c131 = arith.constant 131 : index
    %11 = vector.load %arg8[%c0_12, %c131] : memref<4x822xf32, #tpu.memory_space<vmem>>, vector<4x8xf32>
    tpu.vector_store %arg8[%c0_12, %c131], %10 {strides = array<i32>} : memref<4x822xf32, #tpu.memory_space<vmem>>, vector<4x8xf32>,
    %c0_13 = arith.constant 0 : index
    %c0_14 = arith.constant 0 : index
    %c24 = arith.constant 24 : index
    %12 = vector.load %arg1[%c0_13, %c0_14, %c24] : memref<1x4x256xf32, #tpu.memory_space<vmem>>, vector<1x4x8xf32>
    %13 = vector.shape_cast %12 : vector<1x4x8xf32> to vector<4x8xf32>
    %c0_15 = arith.constant 0 : index
    %c141 = arith.constant 141 : index
    %14 = vector.load %arg8[%c0_15, %c141] : memref<4x822xf32, #tpu.memory_space<vmem>>, vector<4x8xf32>
    tpu.vector_store %arg8[%c0_15, %c141], %13 {strides = array<i32>} : memref<4x822xf32, #tpu.memory_space<vmem>>, vector<4x8xf32>,
    %c0_16 = arith.constant 0 : index
    %c0_17 = arith.constant 0 : index
    %c32 = arith.constant 32 : index
    %15 = vector.load %arg1[%c0_16, %c0_17, %c32] : memref<1x4x256xf32, #tpu.memory_space<vmem>>, vector<1x4x8xf32>
    %16 = vector.shape_cast %15 : vector<1x4x8xf32> to vector<4x8xf32>
    %c0_18 = arith.constant 0 : index
    %c151 = arith.constant 151 : index
    %17 = vector.load %arg8[%c0_18, %c151] : memref<4x822xf32, #tpu.memory_space<vmem>>, vector<4x8xf32>
    tpu.vector_store %arg8[%c0_18, %c151], %16 {strides = array<i32>} : memref<4x822xf32, #tpu.memory_space<vmem>>, vector<4x8xf32>,
    %c0_19 = arith.constant 0 : index
    %c0_20 = arith.constant 0 : index
    %c40 = arith.constant 40 : index
    %18 = vector.load %arg1[%c0_19, %c0_20, %c40] : memref<1x4x256xf32, #tpu.memory_space<vmem>>, vector<1x4x8xf32>
    %19 = vector.shape_cast %18 : vector<1x4x8xf32> to vector<4x8xf32>
    %c0_21 = arith.constant 0 : index
    %c161 = arith.constant 161 : index
    %20 = vector.load %arg8[%c0_21, %c161] : memref<4x822xf32, #tpu.memory_space<vmem>>, vector<4x8xf32>
    tpu.vector_store %arg8[%c0_21, %c161], %19 {strides = array<i32>} : memref<4x822xf32, #tpu.memory_space<vmem>>, vector<4x8xf32>,
    %c0_22 = arith.constant 0 : index
    %c0_23 = arith.constant 0 : index
    %c48 = arith.constant 48 : index
    %21 = vector.load %arg1[%c0_22, %c0_23, %c48] : memref<1x4x256xf32, #tpu.memory_space<vmem>>, vector<1x4x8xf32>
    %22 = vector.shape_cast %21 : vector<1x4x8xf32> to vector<4x8xf32>
    %c0_24 = arith.constant 0 : index
    %c171 = arith.constant 171 : index
    %23 = vector.load %arg8[%c0_24, %c171] : memref<4x822xf32, #tpu.memory_space<vmem>>, vector<4x8xf32>
    tpu.vector_store %arg8[%c0_24, %c171], %22 {strides = array<i32>} : memref<4x822xf32, #tpu.memory_space<vmem>>, vector<4x8xf32>,
    %c0_25 = arith.constant 0 : index
    %c0_26 = arith.constant 0 : index
    %c56 = arith.constant 56 : index
    %24 = vector.load %arg1[%c0_25, %c0_26, %c56] : memref<1x4x256xf32, #tpu.memory_space<vmem>>, vector<1x4x8xf32>
    %25 = vector.shape_cast %24 : vector<1x4x8xf32> to vector<4x8xf32>
    %c0_27 = arith.constant 0 : index
    %c181 = arith.constant 181 : index
    %26 = vector.load %arg8[%c0_27, %c181] : memref<4x822xf32, #tpu.memory_space<vmem>>, vector<4x8xf32>
    tpu.vector_store %arg8[%c0_27, %c181], %25 {strides = array<i32>} : memref<4x822xf32, #tpu.memory_space<vmem>>, vector<4x8xf32>,
    %c0_28 = arith.constant 0 : index
    %c0_29 = arith.constant 0 : index
    %c64 = arith.constant 64 : index
    %27 = vector.load %arg1[%c0_28, %c0_29, %c64] : memref<1x4x256xf32, #tpu.memory_space<vmem>>, vector<1x4x8xf32>
    %28 = vector.shape_cast %27 : vector<1x4x8xf32> to vector<4x8xf32>
    %c0_30 = arith.constant 0 : index
    %c211 = arith.constant 211 : index
    %29 = vector.load %arg8[%c0_30, %c211] : memref<4x822xf32, #tpu.memory_space<vmem>>, vector<4x8xf32>
    tpu.vector_store %arg8[%c0_30, %c211], %28 {strides = array<i32>} : memref<4x822xf32, #tpu.memory_space<vmem>>, vector<4x8xf32>,
    %c0_31 = arith.constant 0 : index
    %c0_32 = arith.constant 0 : index
    %c72 = arith.constant 72 : index
    %30 = vector.load %arg1[%c0_31, %c0_32, %c72] : memref<1x4x256xf32, #tpu.memory_space<vmem>>, vector<1x4x8xf32>
    %31 = vector.shape_cast %30 : vector<1x4x8xf32> to vector<4x8xf32>
    %c0_33 = arith.constant 0 : index
    %c221 = arith.constant 221 : index
    %32 = vector.load %arg8[%c0_33, %c221] : memref<4x822xf32, #tpu.memory_space<vmem>>, vector<4x8xf32>
    tpu.vector_store %arg8[%c0_33, %c221], %31 {strides = array<i32>} : memref<4x822xf32, #tpu.memory_space<vmem>>, vector<4x8xf32>,
    %c0_34 = arith.constant 0 : index
    %c0_35 = arith.constant 0 : index
    %c80 = arith.constant 80 : index
    %33 = vector.load %arg1[%c0_34, %c0_35, %c80] : memref<1x4x256xf32, #tpu.memory_space<vmem>>, vector<1x4x8xf32>
    %34 = vector.shape_cast %33 : vector<1x4x8xf32> to vector<4x8xf32>
    %c0_36 = arith.constant 0 : index
    %c231 = arith.constant 231 : index
    %35 = vector.load %arg8[%c0_36, %c231] : memref<4x822xf32, #tpu.memory_space<vmem>>, vector<4x8xf32>
    tpu.vector_store %arg8[%c0_36, %c231], %34 {strides = array<i32>} : memref<4x822xf32, #tpu.memory_space<vmem>>, vector<4x8xf32>,
    %c0_37 = arith.constant 0 : index
    %c0_38 = arith.constant 0 : index
    %c88 = arith.constant 88 : index
    %36 = vector.load %arg1[%c0_37, %c0_38, %c88] : memref<1x4x256xf32, #tpu.memory_space<vmem>>, vector<1x4x8xf32>
    %37 = vector.shape_cast %36 : vector<1x4x8xf32> to vector<4x8xf32>
    %c0_39 = arith.constant 0 : index
    %c241 = arith.constant 241 : index
    %38 = vector.load %arg8[%c0_39, %c241] : memref<4x822xf32, #tpu.memory_space<vmem>>, vector<4x8xf32>
    tpu.vector_store %arg8[%c0_39, %c241], %37 {strides = array<i32>} : memref<4x822xf32, #tpu.memory_space<vmem>>, vector<4x8xf32>,
    %c0_40 = arith.constant 0 : index
    %c0_41 = arith.constant 0 : index
    %c96 = arith.constant 96 : index
    %39 = vector.load %arg1[%c0_40, %c0_41, %c96] : memref<1x4x256xf32, #tpu.memory_space<vmem>>, vector<1x4x8xf32>
    %40 = vector.shape_cast %39 : vector<1x4x8xf32> to vector<4x8xf32>
    %c0_42 = arith.constant 0 : index
    %c251 = arith.constant 251 : index
    %41 = vector.load %arg8[%c0_42, %c251] : memref<4x822xf32, #tpu.memory_space<vmem>>, vector<4x8xf32>
    tpu.vector_store %arg8[%c0_42, %c251], %40 {strides = array<i32>} : memref<4x822xf32, #tpu.memory_space<vmem>>, vector<4x8xf32>,
    %c0_43 = arith.constant 0 : index
    %c0_44 = arith.constant 0 : index
    %c104 = arith.constant 104 : index
    %42 = vector.load %arg1[%c0_43, %c0_44, %c104] : memref<1x4x256xf32, #tpu.memory_space<vmem>>, vector<1x4x8xf32>
    %43 = vector.shape_cast %42 : vector<1x4x8xf32> to vector<4x8xf32>
    %c0_45 = arith.constant 0 : index
    %c261 = arith.constant 261 : index
    %44 = vector.load %arg8[%c0_45, %c261] : memref<4x822xf32, #tpu.memory_space<vmem>>, vector<4x8xf32>
    tpu.vector_store %arg8[%c0_45, %c261], %43 {strides = array<i32>} : memref<4x822xf32, #tpu.memory_space<vmem>>, vector<4x8xf32>,
    %c0_46 = arith.constant 0 : index
    %c0_47 = arith.constant 0 : index
    %c112 = arith.constant 112 : index
    %45 = vector.load %arg1[%c0_46, %c0_47, %c112] : memref<1x4x256xf32, #tpu.memory_space<vmem>>, vector<1x4x8xf32>
    %46 = vector.shape_cast %45 : vector<1x4x8xf32> to vector<4x8xf32>
    %c0_48 = arith.constant 0 : index
    %c271 = arith.constant 271 : index
    %47 = vector.load %arg8[%c0_48, %c271] : memref<4x822xf32, #tpu.memory_space<vmem>>, vector<4x8xf32>
    tpu.vector_store %arg8[%c0_48, %c271], %46 {strides = array<i32>} : memref<4x822xf32, #tpu.memory_space<vmem>>, vector<4x8xf32>,
    %c0_49 = arith.constant 0 : index
    %c0_50 = arith.constant 0 : index
    %c120 = arith.constant 120 : index
    %48 = vector.load %arg1[%c0_49, %c0_50, %c120] : memref<1x4x256xf32, #tpu.memory_space<vmem>>, vector<1x4x8xf32>
    %49 = vector.shape_cast %48 : vector<1x4x8xf32> to vector<4x8xf32>
    %c0_51 = arith.constant 0 : index
    %c281 = arith.constant 281 : index
    %50 = vector.load %arg8[%c0_51, %c281] : memref<4x822xf32, #tpu.memory_space<vmem>>, vector<4x8xf32>
    tpu.vector_store %arg8[%c0_51, %c281], %49 {strides = array<i32>} : memref<4x822xf32, #tpu.memory_space<vmem>>, vector<4x8xf32>,
    %c0_52 = arith.constant 0 : index
    %c0_53 = arith.constant 0 : index
    %c128 = arith.constant 128 : index
    %51 = vector.load %arg1[%c0_52, %c0_53, %c128] : memref<1x4x256xf32, #tpu.memory_space<vmem>>, vector<1x4x8xf32>
    %52 = vector.shape_cast %51 : vector<1x4x8xf32> to vector<4x8xf32>
    %c0_54 = arith.constant 0 : index
    %c311 = arith.constant 311 : index
    %53 = vector.load %arg8[%c0_54, %c311] : memref<4x822xf32, #tpu.memory_space<vmem>>, vector<4x8xf32>
    tpu.vector_store %arg8[%c0_54, %c311], %52 {strides = array<i32>} : memref<4x822xf32, #tpu.memory_space<vmem>>, vector<4x8xf32>,
    %c0_55 = arith.constant 0 : index
    %c0_56 = arith.constant 0 : index
    %c136 = arith.constant 136 : index
    %54 = vector.load %arg1[%c0_55, %c0_56, %c136] : memref<1x4x256xf32, #tpu.memory_space<vmem>>, vector<1x4x8xf32>
    %55 = vector.shape_cast %54 : vector<1x4x8xf32> to vector<4x8xf32>
    %c0_57 = arith.constant 0 : index
    %c321 = arith.constant 321 : index
    %56 = vector.load %arg8[%c0_57, %c321] : memref<4x822xf32, #tpu.memory_space<vmem>>, vector<4x8xf32>
    tpu.vector_store %arg8[%c0_57, %c321], %55 {strides = array<i32>} : memref<4x822xf32, #tpu.memory_space<vmem>>, vector<4x8xf32>,
    %c0_58 = arith.constant 0 : index
    %c0_59 = arith.constant 0 : index
    %c144 = arith.constant 144 : index
    %57 = vector.load %arg1[%c0_58, %c0_59, %c144] : memref<1x4x256xf32, #tpu.memory_space<vmem>>, vector<1x4x8xf32>
    %58 = vector.shape_cast %57 : vector<1x4x8xf32> to vector<4x8xf32>
    %c0_60 = arith.constant 0 : index
    %c331 = arith.constant 331 : index
    %59 = vector.load %arg8[%c0_60, %c331] : memref<4x822xf32, #tpu.memory_space<vmem>>, vector<4x8xf32>
    tpu.vector_store %arg8[%c0_60, %c331], %58 {strides = array<i32>} : memref<4x822xf32, #tpu.memory_space<vmem>>, vector<4x8xf32>,
    %c0_61 = arith.constant 0 : index
    %c0_62 = arith.constant 0 : index
    %c152 = arith.constant 152 : index
    %60 = vector.load %arg1[%c0_61, %c0_62, %c152] : memref<1x4x256xf32, #tpu.memory_space<vmem>>, vector<1x4x8xf32>
    %61 = vector.shape_cast %60 : vector<1x4x8xf32> to vector<4x8xf32>
    %c0_63 = arith.constant 0 : index
    %c341 = arith.constant 341 : index
    %62 = vector.load %arg8[%c0_63, %c341] : memref<4x822xf32, #tpu.memory_space<vmem>>, vector<4x8xf32>
    tpu.vector_store %arg8[%c0_63, %c341], %61 {strides = array<i32>} : memref<4x822xf32, #tpu.memory_space<vmem>>, vector<4x8xf32>,
    %c0_64 = arith.constant 0 : index
    %c0_65 = arith.constant 0 : index
    %c160 = arith.constant 160 : index
    %63 = vector.load %arg1[%c0_64, %c0_65, %c160] : memref<1x4x256xf32, #tpu.memory_space<vmem>>, vector<1x4x8xf32>
    %64 = vector.shape_cast %63 : vector<1x4x8xf32> to vector<4x8xf32>
    %c0_66 = arith.constant 0 : index
    %c351 = arith.constant 351 : index
    %65 = vector.load %arg8[%c0_66, %c351] : memref<4x822xf32, #tpu.memory_space<vmem>>, vector<4x8xf32>
    tpu.vector_store %arg8[%c0_66, %c351], %64 {strides = array<i32>} : memref<4x822xf32, #tpu.memory_space<vmem>>, vector<4x8xf32>,
    %c0_67 = arith.constant 0 : index
    %c0_68 = arith.constant 0 : index
    %c168 = arith.constant 168 : index
    %66 = vector.load %arg1[%c0_67, %c0_68, %c168] : memref<1x4x256xf32, #tpu.memory_space<vmem>>, vector<1x4x8xf32>
    %67 = vector.shape_cast %66 : vector<1x4x8xf32> to vector<4x8xf32>
    %c0_69 = arith.constant 0 : index
    %c361 = arith.constant 361 : index
    %68 = vector.load %arg8[%c0_69, %c361] : memref<4x822xf32, #tpu.memory_space<vmem>>, vector<4x8xf32>
    tpu.vector_store %arg8[%c0_69, %c361], %67 {strides = array<i32>} : memref<4x822xf32, #tpu.memory_space<vmem>>, vector<4x8xf32>,
    %c0_70 = arith.constant 0 : index
    %c0_71 = arith.constant 0 : index
    %c176 = arith.constant 176 : index
    %69 = vector.load %arg1[%c0_70, %c0_71, %c176] : memref<1x4x256xf32, #tpu.memory_space<vmem>>, vector<1x4x8xf32>
    %70 = vector.shape_cast %69 : vector<1x4x8xf32> to vector<4x8xf32>
    %c0_72 = arith.constant 0 : index
    %c371 = arith.constant 371 : index
    %71 = vector.load %arg8[%c0_72, %c371] : memref<4x822xf32, #tpu.memory_space<vmem>>, vector<4x8xf32>
    tpu.vector_store %arg8[%c0_72, %c371], %70 {strides = array<i32>} : memref<4x822xf32, #tpu.memory_space<vmem>>, vector<4x8xf32>,
    %c0_73 = arith.constant 0 : index
    %c0_74 = arith.constant 0 : index
    %c184 = arith.constant 184 : index
    %72 = vector.load %arg1[%c0_73, %c0_74, %c184] : memref<1x4x256xf32, #tpu.memory_space<vmem>>, vector<1x4x8xf32>
    %73 = vector.shape_cast %72 : vector<1x4x8xf32> to vector<4x8xf32>
    %c0_75 = arith.constant 0 : index
    %c381 = arith.constant 381 : index
    %74 = vector.load %arg8[%c0_75, %c381] : memref<4x822xf32, #tpu.memory_space<vmem>>, vector<4x8xf32>
    tpu.vector_store %arg8[%c0_75, %c381], %73 {strides = array<i32>} : memref<4x822xf32, #tpu.memory_space<vmem>>, vector<4x8xf32>,
    %c0_76 = arith.constant 0 : index
    %c0_77 = arith.constant 0 : index
    %c192 = arith.constant 192 : index
    %75 = vector.load %arg1[%c0_76, %c0_77, %c192] : memref<1x4x256xf32, #tpu.memory_space<vmem>>, vector<1x4x8xf32>
    %76 = vector.shape_cast %75 : vector<1x4x8xf32> to vector<4x8xf32>
    %c0_78 = arith.constant 0 : index
    %c411 = arith.constant 411 : index
    %77 = vector.load %arg8[%c0_78, %c411] : memref<4x822xf32, #tpu.memory_space<vmem>>, vector<4x8xf32>
    tpu.vector_store %arg8[%c0_78, %c411], %76 {strides = array<i32>} : memref<4x822xf32, #tpu.memory_space<vmem>>, vector<4x8xf32>,
    %c0_79 = arith.constant 0 : index
    %c0_80 = arith.constant 0 : index
    %c200 = arith.constant 200 : index
    %78 = vector.load %arg1[%c0_79, %c0_80, %c200] : memref<1x4x256xf32, #tpu.memory_space<vmem>>, vector<1x4x8xf32>
    %79 = vector.shape_cast %78 : vector<1x4x8xf32> to vector<4x8xf32>
    %c0_81 = arith.constant 0 : index
    %c421 = arith.constant 421 : index
    %80 = vector.load %arg8[%c0_81, %c421] : memref<4x822xf32, #tpu.memory_space<vmem>>, vector<4x8xf32>
    tpu.vector_store %arg8[%c0_81, %c421], %79 {strides = array<i32>} : memref<4x822xf32, #tpu.memory_space<vmem>>, vector<4x8xf32>,
    %c0_82 = arith.constant 0 : index
    %c0_83 = arith.constant 0 : index
    %c208 = arith.constant 208 : index
    %81 = vector.load %arg1[%c0_82, %c0_83, %c208] : memref<1x4x256xf32, #tpu.memory_space<vmem>>, vector<1x4x8xf32>
    %82 = vector.shape_cast %81 : vector<1x4x8xf32> to vector<4x8xf32>
    %c0_84 = arith.constant 0 : index
    %c431 = arith.constant 431 : index
    %83 = vector.load %arg8[%c0_84, %c431] : memref<4x822xf32, #tpu.memory_space<vmem>>, vector<4x8xf32>
    tpu.vector_store %arg8[%c0_84, %c431], %82 {strides = array<i32>} : memref<4x822xf32, #tpu.memory_space<vmem>>, vector<4x8xf32>,
    %c0_85 = arith.constant 0 : index
    %c0_86 = arith.constant 0 : index
    %c216 = arith.constant 216 : index
    %84 = vector.load %arg1[%c0_85, %c0_86, %c216] : memref<1x4x256xf32, #tpu.memory_space<vmem>>, vector<1x4x8xf32>
    %85 = vector.shape_cast %84 : vector<1x4x8xf32> to vector<4x8xf32>
    %c0_87 = arith.constant 0 : index
    %c441 = arith.constant 441 : index
    %86 = vector.load %arg8[%c0_87, %c441] : memref<4x822xf32, #tpu.memory_space<vmem>>, vector<4x8xf32>
    tpu.vector_store %arg8[%c0_87, %c441], %85 {strides = array<i32>} : memref<4x822xf32, #tpu.memory_space<vmem>>, vector<4x8xf32>,
    %c0_88 = arith.constant 0 : index
    %c0_89 = arith.constant 0 : index
    %c224 = arith.constant 224 : index
    %87 = vector.load %arg1[%c0_88, %c0_89, %c224] : memref<1x4x256xf32, #tpu.memory_space<vmem>>, vector<1x4x8xf32>
    %88 = vector.shape_cast %87 : vector<1x4x8xf32> to vector<4x8xf32>
    %c0_90 = arith.constant 0 : index
    %c451 = arith.constant 451 : index
    %89 = vector.load %arg8[%c0_90, %c451] : memref<4x822xf32, #tpu.memory_space<vmem>>, vector<4x8xf32>
    tpu.vector_store %arg8[%c0_90, %c451], %88 {strides = array<i32>} : memref<4x822xf32, #tpu.memory_space<vmem>>, vector<4x8xf32>,
    %c0_91 = arith.constant 0 : index
    %c0_92 = arith.constant 0 : index
    %c232 = arith.constant 232 : index
    %90 = vector.load %arg1[%c0_91, %c0_92, %c232] : memref<1x4x256xf32, #tpu.memory_space<vmem>>, vector<1x4x8xf32>
    %91 = vector.shape_cast %90 : vector<1x4x8xf32> to vector<4x8xf32>
    %c0_93 = arith.constant 0 : index
    %c461 = arith.constant 461 : index
    %92 = vector.load %arg8[%c0_93, %c461] : memref<4x822xf32, #tpu.memory_space<vmem>>, vector<4x8xf32>
    tpu.vector_store %arg8[%c0_93, %c461], %91 {strides = array<i32>} : memref<4x822xf32, #tpu.memory_space<vmem>>, vector<4x8xf32>,
    %c0_94 = arith.constant 0 : index
    %c0_95 = arith.constant 0 : index
    %c240 = arith.constant 240 : index
    %93 = vector.load %arg1[%c0_94, %c0_95, %c240] : memref<1x4x256xf32, #tpu.memory_space<vmem>>, vector<1x4x8xf32>
    %94 = vector.shape_cast %93 : vector<1x4x8xf32> to vector<4x8xf32>
    %c0_96 = arith.constant 0 : index
    %c471 = arith.constant 471 : index
    %95 = vector.load %arg8[%c0_96, %c471] : memref<4x822xf32, #tpu.memory_space<vmem>>, vector<4x8xf32>
    tpu.vector_store %arg8[%c0_96, %c471], %94 {strides = array<i32>} : memref<4x822xf32, #tpu.memory_space<vmem>>, vector<4x8xf32>,
    %c0_97 = arith.constant 0 : index
    %c0_98 = arith.constant 0 : index
    %c248 = arith.constant 248 : index
    %96 = vector.load %arg1[%c0_97, %c0_98, %c248] : memref<1x4x256xf32, #tpu.memory_space<vmem>>, vector<1x4x8xf32>
    %97 = vector.shape_cast %96 : vector<1x4x8xf32> to vector<4x8xf32>
    %c0_99 = arith.constant 0 : index
    %c481 = arith.constant 481 : index
    %98 = vector.load %arg8[%c0_99, %c481] : memref<4x822xf32, #tpu.memory_space<vmem>>, vector<4x8xf32>
    tpu.vector_store %arg8[%c0_99, %c481], %97 {strides = array<i32>} : memref<4x822xf32, #tpu.memory_space<vmem>>, vector<4x8xf32>,
    %c0_100 = arith.constant 0 : index
    %c0_101 = arith.constant 0 : index
    %99 = vector.load %arg8[%c0_100, %c0_101] : memref<4x822xf32, #tpu.memory_space<vmem>>, vector<4x600xf32>
    %c0_102 = arith.constant 0 : index
    %c0_103 = arith.constant 0 : index
    %100 = vector.load %arg9[%c0_102, %c0_103] : memref<108x600xf32, #tpu.memory_space<vmem>>, vector<4x600xf32>
    tpu.vector_store %arg9[%c0_102, %c0_103], %99 {strides = array<i32>} : memref<108x600xf32, #tpu.memory_space<vmem>>, vector<4x600xf32>,
    %c0_104 = arith.constant 0 : index
    %c1 = arith.constant 1 : index
    %101 = vector.load %arg8[%c0_104, %c1] : memref<4x822xf32, #tpu.memory_space<vmem>>, vector<4x600xf32>
    %c4 = arith.constant 4 : index
    %c0_105 = arith.constant 0 : index
    %102 = vector.load %arg9[%c4, %c0_105] : memref<108x600xf32, #tpu.memory_space<vmem>>, vector<4x600xf32>
    tpu.vector_store %arg9[%c4, %c0_105], %101 {strides = array<i32>} : memref<108x600xf32, #tpu.memory_space<vmem>>, vector<4x600xf32>,
    %c0_106 = arith.constant 0 : index
    %c2 = arith.constant 2 : index
    %103 = vector.load %arg8[%c0_106, %c2] : memref<4x822xf32, #tpu.memory_space<vmem>>, vector<4x600xf32>
    %c8_107 = arith.constant 8 : index
    %c0_108 = arith.constant 0 : index
    %104 = vector.load %arg9[%c8_107, %c0_108] : memref<108x600xf32, #tpu.memory_space<vmem>>, vector<4x600xf32>
    tpu.vector_store %arg9[%c8_107, %c0_108], %103 {strides = array<i32>} : memref<108x600xf32, #tpu.memory_space<vmem>>, vector<4x600xf32>,
    %c0_109 = arith.constant 0 : index
    %c10 = arith.constant 10 : index
    %105 = vector.load %arg8[%c0_109, %c10] : memref<4x822xf32, #tpu.memory_space<vmem>>, vector<4x600xf32>
    %c12 = arith.constant 12 : index
    %c0_110 = arith.constant 0 : index
    %106 = vector.load %arg9[%c12, %c0_110] : memref<108x600xf32, #tpu.memory_space<vmem>>, vector<4x600xf32>
    tpu.vector_store %arg9[%c12, %c0_110], %105 {strides = array<i32>} : memref<108x600xf32, #tpu.memory_space<vmem>>, vector<4x600xf32>,
    %c0_111 = arith.constant 0 : index
    %c11 = arith.constant 11 : index
    %107 = vector.load %arg8[%c0_111, %c11] : memref<4x822xf32, #tpu.memory_space<vmem>>, vector<4x600xf32>
    %c16_112 = arith.constant 16 : index
    %c0_113 = arith.constant 0 : index
    %108 = vector.load %arg9[%c16_112, %c0_113] : memref<108x600xf32, #tpu.memory_space<vmem>>, vector<4x600xf32>
    tpu.vector_store %arg9[%c16_112, %c0_113], %107 {strides = array<i32>} : memref<108x600xf32, #tpu.memory_space<vmem>>, vector<4x600xf32>,
    %c0_114 = arith.constant 0 : index
    %c12_115 = arith.constant 12 : index
    %109 = vector.load %arg8[%c0_114, %c12_115] : memref<4x822xf32, #tpu.memory_space<vmem>>, vector<4x600xf32>
    %c20 = arith.constant 20 : index
    %c0_116 = arith.constant 0 : index
    %110 = vector.load %arg9[%c20, %c0_116] : memref<108x600xf32, #tpu.memory_space<vmem>>, vector<4x600xf32>
    tpu.vector_store %arg9[%c20, %c0_116], %109 {strides = array<i32>} : memref<108x600xf32, #tpu.memory_space<vmem>>, vector<4x600xf32>,
    %c0_117 = arith.constant 0 : index
    %c20_118 = arith.constant 20 : index
    %111 = vector.load %arg8[%c0_117, %c20_118] : memref<4x822xf32, #tpu.memory_space<vmem>>, vector<4x600xf32>
    %c24_119 = arith.constant 24 : index
    %c0_120 = arith.constant 0 : index
    %112 = vector.load %arg9[%c24_119, %c0_120] : memref<108x600xf32, #tpu.memory_space<vmem>>, vector<4x600xf32>
    tpu.vector_store %arg9[%c24_119, %c0_120], %111 {strides = array<i32>} : memref<108x600xf32, #tpu.memory_space<vmem>>, vector<4x600xf32>,
    %c0_121 = arith.constant 0 : index
    %c21 = arith.constant 21 : index
    %113 = vector.load %arg8[%c0_121, %c21] : memref<4x822xf32, #tpu.memory_space<vmem>>, vector<4x600xf32>
    %c28 = arith.constant 28 : index
    %c0_122 = arith.constant 0 : index
    %114 = vector.load %arg9[%c28, %c0_122] : memref<108x600xf32, #tpu.memory_space<vmem>>, vector<4x600xf32>
    tpu.vector_store %arg9[%c28, %c0_122], %113 {strides = array<i32>} : memref<108x600xf32, #tpu.memory_space<vmem>>, vector<4x600xf32>,
    %c0_123 = arith.constant 0 : index
    %c22 = arith.constant 22 : index
    %115 = vector.load %arg8[%c0_123, %c22] : memref<4x822xf32, #tpu.memory_space<vmem>>, vector<4x600xf32>
    %c32_124 = arith.constant 32 : index
    %c0_125 = arith.constant 0 : index
    %116 = vector.load %arg9[%c32_124, %c0_125] : memref<108x600xf32, #tpu.memory_space<vmem>>, vector<4x600xf32>
    tpu.vector_store %arg9[%c32_124, %c0_125], %115 {strides = array<i32>} : memref<108x600xf32, #tpu.memory_space<vmem>>, vector<4x600xf32>,
    %c0_126 = arith.constant 0 : index
    %c100 = arith.constant 100 : index
    %117 = vector.load %arg8[%c0_126, %c100] : memref<4x822xf32, #tpu.memory_space<vmem>>, vector<4x600xf32>
    %c36 = arith.constant 36 : index
    %c0_127 = arith.constant 0 : index
    %118 = vector.load %arg9[%c36, %c0_127] : memref<108x600xf32, #tpu.memory_space<vmem>>, vector<4x600xf32>
    tpu.vector_store %arg9[%c36, %c0_127], %117 {strides = array<i32>} : memref<108x600xf32, #tpu.memory_space<vmem>>, vector<4x600xf32>,
    %c0_128 = arith.constant 0 : index
    %c101 = arith.constant 101 : index
    %119 = vector.load %arg8[%c0_128, %c101] : memref<4x822xf32, #tpu.memory_space<vmem>>, vector<4x600xf32>
    %c40_129 = arith.constant 40 : index
    %c0_130 = arith.constant 0 : index
    %120 = vector.load %arg9[%c40_129, %c0_130] : memref<108x600xf32, #tpu.memory_space<vmem>>, vector<4x600xf32>
    tpu.vector_store %arg9[%c40_129, %c0_130], %119 {strides = array<i32>} : memref<108x600xf32, #tpu.memory_space<vmem>>, vector<4x600xf32>,
    %c0_131 = arith.constant 0 : index
    %c102 = arith.constant 102 : index
    %121 = vector.load %arg8[%c0_131, %c102] : memref<4x822xf32, #tpu.memory_space<vmem>>, vector<4x600xf32>
    %c44 = arith.constant 44 : index
    %c0_132 = arith.constant 0 : index
    %122 = vector.load %arg9[%c44, %c0_132] : memref<108x600xf32, #tpu.memory_space<vmem>>, vector<4x600xf32>
    tpu.vector_store %arg9[%c44, %c0_132], %121 {strides = array<i32>} : memref<108x600xf32, #tpu.memory_space<vmem>>, vector<4x600xf32>,
    %c0_133 = arith.constant 0 : index
    %c110 = arith.constant 110 : index
    %123 = vector.load %arg8[%c0_133, %c110] : memref<4x822xf32, #tpu.memory_space<vmem>>, vector<4x600xf32>
    %c48_134 = arith.constant 48 : index
    %c0_135 = arith.constant 0 : index
    %124 = vector.load %arg9[%c48_134, %c0_135] : memref<108x600xf32, #tpu.memory_space<vmem>>, vector<4x600xf32>
    tpu.vector_store %arg9[%c48_134, %c0_135], %123 {strides = array<i32>} : memref<108x600xf32, #tpu.memory_space<vmem>>, vector<4x600xf32>,
    %c0_136 = arith.constant 0 : index
    %c111_137 = arith.constant 111 : index
    %125 = vector.load %arg8[%c0_136, %c111_137] : memref<4x822xf32, #tpu.memory_space<vmem>>, vector<4x600xf32>
    %c52 = arith.constant 52 : index
    %c0_138 = arith.constant 0 : index
    %126 = vector.load %arg9[%c52, %c0_138] : memref<108x600xf32, #tpu.memory_space<vmem>>, vector<4x600xf32>
    tpu.vector_store %arg9[%c52, %c0_138], %125 {strides = array<i32>} : memref<108x600xf32, #tpu.memory_space<vmem>>, vector<4x600xf32>,
    %c0_139 = arith.constant 0 : index
    %c112_140 = arith.constant 112 : index
    %127 = vector.load %arg8[%c0_139, %c112_140] : memref<4x822xf32, #tpu.memory_space<vmem>>, vector<4x600xf32>
    %c56_141 = arith.constant 56 : index
    %c0_142 = arith.constant 0 : index
    %128 = vector.load %arg9[%c56_141, %c0_142] : memref<108x600xf32, #tpu.memory_space<vmem>>, vector<4x600xf32>
    tpu.vector_store %arg9[%c56_141, %c0_142], %127 {strides = array<i32>} : memref<108x600xf32, #tpu.memory_space<vmem>>, vector<4x600xf32>,
    %c0_143 = arith.constant 0 : index
    %c120_144 = arith.constant 120 : index
    %129 = vector.load %arg8[%c0_143, %c120_144] : memref<4x822xf32, #tpu.memory_space<vmem>>, vector<4x600xf32>
    %c60 = arith.constant 60 : index
    %c0_145 = arith.constant 0 : index
    %130 = vector.load %arg9[%c60, %c0_145] : memref<108x600xf32, #tpu.memory_space<vmem>>, vector<4x600xf32>
    tpu.vector_store %arg9[%c60, %c0_145], %129 {strides = array<i32>} : memref<108x600xf32, #tpu.memory_space<vmem>>, vector<4x600xf32>,
    %c0_146 = arith.constant 0 : index
    %c121_147 = arith.constant 121 : index
    %131 = vector.load %arg8[%c0_146, %c121_147] : memref<4x822xf32, #tpu.memory_space<vmem>>, vector<4x600xf32>
    %c64_148 = arith.constant 64 : index
    %c0_149 = arith.constant 0 : index
    %132 = vector.load %arg9[%c64_148, %c0_149] : memref<108x600xf32, #tpu.memory_space<vmem>>, vector<4x600xf32>
    tpu.vector_store %arg9[%c64_148, %c0_149], %131 {strides = array<i32>} : memref<108x600xf32, #tpu.memory_space<vmem>>, vector<4x600xf32>,
    %c0_150 = arith.constant 0 : index
    %c122 = arith.constant 122 : index
    %133 = vector.load %arg8[%c0_150, %c122] : memref<4x822xf32, #tpu.memory_space<vmem>>, vector<4x600xf32>
    %c68 = arith.constant 68 : index
    %c0_151 = arith.constant 0 : index
    %134 = vector.load %arg9[%c68, %c0_151] : memref<108x600xf32, #tpu.memory_space<vmem>>, vector<4x600xf32>
    tpu.vector_store %arg9[%c68, %c0_151], %133 {strides = array<i32>} : memref<108x600xf32, #tpu.memory_space<vmem>>, vector<4x600xf32>,
    %c0_152 = arith.constant 0 : index
    %c200_153 = arith.constant 200 : index
    %135 = vector.load %arg8[%c0_152, %c200_153] : memref<4x822xf32, #tpu.memory_space<vmem>>, vector<4x600xf32>
    %c72_154 = arith.constant 72 : index
    %c0_155 = arith.constant 0 : index
    %136 = vector.load %arg9[%c72_154, %c0_155] : memref<108x600xf32, #tpu.memory_space<vmem>>, vector<4x600xf32>
    tpu.vector_store %arg9[%c72_154, %c0_155], %135 {strides = array<i32>} : memref<108x600xf32, #tpu.memory_space<vmem>>, vector<4x600xf32>,
    %c0_156 = arith.constant 0 : index
    %c201 = arith.constant 201 : index
    %137 = vector.load %arg8[%c0_156, %c201] : memref<4x822xf32, #tpu.memory_space<vmem>>, vector<4x600xf32>
    %c76 = arith.constant 76 : index
    %c0_157 = arith.constant 0 : index
    %138 = vector.load %arg9[%c76, %c0_157] : memref<108x600xf32, #tpu.memory_space<vmem>>, vector<4x600xf32>
    tpu.vector_store %arg9[%c76, %c0_157], %137 {strides = array<i32>} : memref<108x600xf32, #tpu.memory_space<vmem>>, vector<4x600xf32>,
    %c0_158 = arith.constant 0 : index
    %c202 = arith.constant 202 : index
    %139 = vector.load %arg8[%c0_158, %c202] : memref<4x822xf32, #tpu.memory_space<vmem>>, vector<4x600xf32>
    %c80_159 = arith.constant 80 : index
    %c0_160 = arith.constant 0 : index
    %140 = vector.load %arg9[%c80_159, %c0_160] : memref<108x600xf32, #tpu.memory_space<vmem>>, vector<4x600xf32>
    tpu.vector_store %arg9[%c80_159, %c0_160], %139 {strides = array<i32>} : memref<108x600xf32, #tpu.memory_space<vmem>>, vector<4x600xf32>,
    %c0_161 = arith.constant 0 : index
    %c210 = arith.constant 210 : index
    %141 = vector.load %arg8[%c0_161, %c210] : memref<4x822xf32, #tpu.memory_space<vmem>>, vector<4x600xf32>
    %c84 = arith.constant 84 : index
    %c0_162 = arith.constant 0 : index
    %142 = vector.load %arg9[%c84, %c0_162] : memref<108x600xf32, #tpu.memory_space<vmem>>, vector<4x600xf32>
    tpu.vector_store %arg9[%c84, %c0_162], %141 {strides = array<i32>} : memref<108x600xf32, #tpu.memory_space<vmem>>, vector<4x600xf32>,
    %c0_163 = arith.constant 0 : index
    %c211_164 = arith.constant 211 : index
    %143 = vector.load %arg8[%c0_163, %c211_164] : memref<4x822xf32, #tpu.memory_space<vmem>>, vector<4x600xf32>
    %c88_165 = arith.constant 88 : index
    %c0_166 = arith.constant 0 : index
    %144 = vector.load %arg9[%c88_165, %c0_166] : memref<108x600xf32, #tpu.memory_space<vmem>>, vector<4x600xf32>
    tpu.vector_store %arg9[%c88_165, %c0_166], %143 {strides = array<i32>} : memref<108x600xf32, #tpu.memory_space<vmem>>, vector<4x600xf32>,
    %c0_167 = arith.constant 0 : index
    %c212 = arith.constant 212 : index
    %145 = vector.load %arg8[%c0_167, %c212] : memref<4x822xf32, #tpu.memory_space<vmem>>, vector<4x600xf32>
    %c92 = arith.constant 92 : index
    %c0_168 = arith.constant 0 : index
    %146 = vector.load %arg9[%c92, %c0_168] : memref<108x600xf32, #tpu.memory_space<vmem>>, vector<4x600xf32>
    tpu.vector_store %arg9[%c92, %c0_168], %145 {strides = array<i32>} : memref<108x600xf32, #tpu.memory_space<vmem>>, vector<4x600xf32>,
    %c0_169 = arith.constant 0 : index
    %c220 = arith.constant 220 : index
    %147 = vector.load %arg8[%c0_169, %c220] : memref<4x822xf32, #tpu.memory_space<vmem>>, vector<4x600xf32>
    %c96_170 = arith.constant 96 : index
    %c0_171 = arith.constant 0 : index
    %148 = vector.load %arg9[%c96_170, %c0_171] : memref<108x600xf32, #tpu.memory_space<vmem>>, vector<4x600xf32>
    tpu.vector_store %arg9[%c96_170, %c0_171], %147 {strides = array<i32>} : memref<108x600xf32, #tpu.memory_space<vmem>>, vector<4x600xf32>,
    %c0_172 = arith.constant 0 : index
    %c221_173 = arith.constant 221 : index
    %149 = vector.load %arg8[%c0_172, %c221_173] : memref<4x822xf32, #tpu.memory_space<vmem>>, vector<4x600xf32>
    %c100_174 = arith.constant 100 : index
    %c0_175 = arith.constant 0 : index
    %150 = vector.load %arg9[%c100_174, %c0_175] : memref<108x600xf32, #tpu.memory_space<vmem>>, vector<4x600xf32>
    tpu.vector_store %arg9[%c100_174, %c0_175], %149 {strides = array<i32>} : memref<108x600xf32, #tpu.memory_space<vmem>>, vector<4x600xf32>,
    %c0_176 = arith.constant 0 : index
    %c222 = arith.constant 222 : index
    %151 = vector.load %arg8[%c0_176, %c222] : memref<4x822xf32, #tpu.memory_space<vmem>>, vector<4x600xf32>
    %c104_177 = arith.constant 104 : index
    %c0_178 = arith.constant 0 : index
    %152 = vector.load %arg9[%c104_177, %c0_178] : memref<108x600xf32, #tpu.memory_space<vmem>>, vector<4x600xf32>
    tpu.vector_store %arg9[%c104_177, %c0_178], %151 {strides = array<i32>} : memref<108x600xf32, #tpu.memory_space<vmem>>, vector<4x600xf32>,
    %c0_179 = arith.constant 0 : index
    %c0_180 = arith.constant 0 : index
    %153 = vector.load %arg2[%c0_179, %c0_180] : memref<8x108xf32, #tpu.memory_space<vmem>>, vector<8x108xf32>
    %c0_181 = arith.constant 0 : index
    %c0_182 = arith.constant 0 : index
    %154 = vector.load %arg9[%c0_181, %c0_182] : memref<108x600xf32, #tpu.memory_space<vmem>>, vector<108x600xf32>
    %cst_183 = arith.constant dense<0.000000e+00> : vector<8x600xf32>
    %155 = tpu.matmul %153, %154, %cst_183 {dimension_numbers = #tpu.dot_dimension_numbers<[1], [0], [0], [1], [0, 0, 1, 1], [], []>} : vector<8x108xf32>, vector<108x600xf32>, vector<8x600xf32> -> vector<8x600xf32>
    %c0_184 = arith.constant 0 : index
    %c0_185 = arith.constant 0 : index
    %156 = vector.load %arg3[%c0_184, %c0_185] : memref<8x1xf32, #tpu.memory_space<vmem>>, vector<8x1xf32>
    %157 = vector.broadcast %156 : vector<8x1xf32> to vector<8x600xf32>
    %158 = arith.addf %155, %157 : vector<8x600xf32>
    %159 = vector.broadcast %0 : vector<1x600xf32> to vector<8x600xf32>
    %160 = arith.mulf %158, %159 : vector<8x600xf32>
    %cst_186 = arith.constant dense<0.000000e+00> : vector<8xf32>
    %161 = vector.multi_reduction <add>, %160, %cst_186 [1] : vector<8x600xf32> to vector<8xf32>
    %162 = vector.shape_cast %161 : vector<8xf32> to vector<8x1xf32>
    %cst_187 = arith.constant 3.906250e-03 : f32
    %163 = vector.broadcast %cst_187 : f32 to vector<8x1xf32>
    %164 = arith.mulf %162, %163 : vector<8x1xf32>
    %165 = vector.broadcast %164 : vector<8x1xf32> to vector<8x600xf32>
    %166 = arith.subf %158, %165 : vector<8x600xf32>
    %167 = arith.mulf %166, %166 : vector<8x600xf32>
    %168 = vector.broadcast %0 : vector<1x600xf32> to vector<8x600xf32>
    %169 = arith.mulf %167, %168 : vector<8x600xf32>
    %cst_188 = arith.constant dense<0.000000e+00> : vector<8xf32>
    %170 = vector.multi_reduction <add>, %169, %cst_188 [1] : vector<8x600xf32> to vector<8xf32>
    %171 = vector.shape_cast %170 : vector<8xf32> to vector<8x1xf32>
    %cst_189 = arith.constant 3.906250e-03 : f32
    %172 = vector.broadcast %cst_189 : f32 to vector<8x1xf32>
    %173 = arith.mulf %171, %172 : vector<8x1xf32>
    %174 = vector.broadcast %164 : vector<8x1xf32> to vector<8x600xf32>
    %175 = arith.subf %158, %174 : vector<8x600xf32>
    %cst_190 = arith.constant 9.99999974E-6 : f32
    %176 = vector.broadcast %cst_190 : f32 to vector<8x1xf32>
    %177 = arith.addf %173, %176 : vector<8x1xf32>
    %178 = math.rsqrt %177 : vector<8x1xf32>
    %179 = vector.broadcast %178 : vector<8x1xf32> to vector<8x600xf32>
    %180 = arith.mulf %175, %179 : vector<8x600xf32>
    %cst_191 = arith.constant 0.000000e+00 : f32
    %181 = vector.broadcast %cst_191 : f32 to vector<8x600xf32>
    %182 = arith.maximumf %180, %181 : vector<8x600xf32>
    %183 = vector.broadcast %0 : vector<1x600xf32> to vector<8x600xf32>
    %184 = arith.mulf %182, %183 : vector<8x600xf32>
    %cst_192 = arith.constant 0.000000e+00 : f32
    %185 = vector.broadcast %cst_192 : f32 to vector<8x822xf32>
    %c0_193 = arith.constant 0 : index
    %c0_194 = arith.constant 0 : index
    %186 = vector.load %arg10[%c0_193, %c0_194] : memref<8x822xf32, #tpu.memory_space<vmem>>, vector<8x822xf32>
    tpu.vector_store %arg10[%c0_193, %c0_194], %185 {strides = array<i32>} : memref<8x822xf32, #tpu.memory_space<vmem>>, vector<8x822xf32>,
    %c0_195 = arith.constant 0 : index
    %c111_196 = arith.constant 111 : index
    %187 = vector.load %arg10[%c0_195, %c111_196] : memref<8x822xf32, #tpu.memory_space<vmem>>, vector<8x600xf32>
    tpu.vector_store %arg10[%c0_195, %c111_196], %184 {strides = array<i32>} : memref<8x822xf32, #tpu.memory_space<vmem>>, vector<8x600xf32>,
    %c0_197 = arith.constant 0 : index
    %c0_198 = arith.constant 0 : index
    %188 = vector.load %arg10[%c0_197, %c0_198] : memref<8x822xf32, #tpu.memory_space<vmem>>, vector<8x600xf32>
    %c0_199 = arith.constant 0 : index
    %c0_200 = arith.constant 0 : index
    %189 = vector.load %arg11[%c0_199, %c0_200] : memref<216x600xf32, #tpu.memory_space<vmem>>, vector<8x600xf32>
    tpu.vector_store %arg11[%c0_199, %c0_200], %188 {strides = array<i32>} : memref<216x600xf32, #tpu.memory_space<vmem>>, vector<8x600xf32>,
    %c0_201 = arith.constant 0 : index
    %c1_202 = arith.constant 1 : index
    %190 = vector.load %arg10[%c0_201, %c1_202] : memref<8x822xf32, #tpu.memory_space<vmem>>, vector<8x600xf32>
    %c8_203 = arith.constant 8 : index
    %c0_204 = arith.constant 0 : index
    %191 = vector.load %arg11[%c8_203, %c0_204] : memref<216x600xf32, #tpu.memory_space<vmem>>, vector<8x600xf32>
    tpu.vector_store %arg11[%c8_203, %c0_204], %190 {strides = array<i32>} : memref<216x600xf32, #tpu.memory_space<vmem>>, vector<8x600xf32>,
    %c0_205 = arith.constant 0 : index
    %c2_206 = arith.constant 2 : index
    %192 = vector.load %arg10[%c0_205, %c2_206] : memref<8x822xf32, #tpu.memory_space<vmem>>, vector<8x600xf32>
    %c16_207 = arith.constant 16 : index
    %c0_208 = arith.constant 0 : index
    %193 = vector.load %arg11[%c16_207, %c0_208] : memref<216x600xf32, #tpu.memory_space<vmem>>, vector<8x600xf32>
    tpu.vector_store %arg11[%c16_207, %c0_208], %192 {strides = array<i32>} : memref<216x600xf32, #tpu.memory_space<vmem>>, vector<8x600xf32>,
    %c0_209 = arith.constant 0 : index
    %c10_210 = arith.constant 10 : index
    %194 = vector.load %arg10[%c0_209, %c10_210] : memref<8x822xf32, #tpu.memory_space<vmem>>, vector<8x600xf32>
    %c24_211 = arith.constant 24 : index
    %c0_212 = arith.constant 0 : index
    %195 = vector.load %arg11[%c24_211, %c0_212] : memref<216x600xf32, #tpu.memory_space<vmem>>, vector<8x600xf32>
    tpu.vector_store %arg11[%c24_211, %c0_212], %194 {strides = array<i32>} : memref<216x600xf32, #tpu.memory_space<vmem>>, vector<8x600xf32>,
    %c0_213 = arith.constant 0 : index
    %c11_214 = arith.constant 11 : index
    %196 = vector.load %arg10[%c0_213, %c11_214] : memref<8x822xf32, #tpu.memory_space<vmem>>, vector<8x600xf32>
    %c32_215 = arith.constant 32 : index
    %c0_216 = arith.constant 0 : index
    %197 = vector.load %arg11[%c32_215, %c0_216] : memref<216x600xf32, #tpu.memory_space<vmem>>, vector<8x600xf32>
    tpu.vector_store %arg11[%c32_215, %c0_216], %196 {strides = array<i32>} : memref<216x600xf32, #tpu.memory_space<vmem>>, vector<8x600xf32>,
    %c0_217 = arith.constant 0 : index
    %c12_218 = arith.constant 12 : index
    %198 = vector.load %arg10[%c0_217, %c12_218] : memref<8x822xf32, #tpu.memory_space<vmem>>, vector<8x600xf32>
    %c40_219 = arith.constant 40 : index
    %c0_220 = arith.constant 0 : index
    %199 = vector.load %arg11[%c40_219, %c0_220] : memref<216x600xf32, #tpu.memory_space<vmem>>, vector<8x600xf32>
    tpu.vector_store %arg11[%c40_219, %c0_220], %198 {strides = array<i32>} : memref<216x600xf32, #tpu.memory_space<vmem>>, vector<8x600xf32>,
    %c0_221 = arith.constant 0 : index
    %c20_222 = arith.constant 20 : index
    %200 = vector.load %arg10[%c0_221, %c20_222] : memref<8x822xf32, #tpu.memory_space<vmem>>, vector<8x600xf32>
    %c48_223 = arith.constant 48 : index
    %c0_224 = arith.constant 0 : index
    %201 = vector.load %arg11[%c48_223, %c0_224] : memref<216x600xf32, #tpu.memory_space<vmem>>, vector<8x600xf32>
    tpu.vector_store %arg11[%c48_223, %c0_224], %200 {strides = array<i32>} : memref<216x600xf32, #tpu.memory_space<vmem>>, vector<8x600xf32>,
    %c0_225 = arith.constant 0 : index
    %c21_226 = arith.constant 21 : index
    %202 = vector.load %arg10[%c0_225, %c21_226] : memref<8x822xf32, #tpu.memory_space<vmem>>, vector<8x600xf32>
    %c56_227 = arith.constant 56 : index
    %c0_228 = arith.constant 0 : index
    %203 = vector.load %arg11[%c56_227, %c0_228] : memref<216x600xf32, #tpu.memory_space<vmem>>, vector<8x600xf32>
    tpu.vector_store %arg11[%c56_227, %c0_228], %202 {strides = array<i32>} : memref<216x600xf32, #tpu.memory_space<vmem>>, vector<8x600xf32>,
    %c0_229 = arith.constant 0 : index
    %c22_230 = arith.constant 22 : index
    %204 = vector.load %arg10[%c0_229, %c22_230] : memref<8x822xf32, #tpu.memory_space<vmem>>, vector<8x600xf32>
    %c64_231 = arith.constant 64 : index
    %c0_232 = arith.constant 0 : index
    %205 = vector.load %arg11[%c64_231, %c0_232] : memref<216x600xf32, #tpu.memory_space<vmem>>, vector<8x600xf32>
    tpu.vector_store %arg11[%c64_231, %c0_232], %204 {strides = array<i32>} : memref<216x600xf32, #tpu.memory_space<vmem>>, vector<8x600xf32>,
    %c0_233 = arith.constant 0 : index
    %c100_234 = arith.constant 100 : index
    %206 = vector.load %arg10[%c0_233, %c100_234] : memref<8x822xf32, #tpu.memory_space<vmem>>, vector<8x600xf32>
    %c72_235 = arith.constant 72 : index
    %c0_236 = arith.constant 0 : index
    %207 = vector.load %arg11[%c72_235, %c0_236] : memref<216x600xf32, #tpu.memory_space<vmem>>, vector<8x600xf32>
    tpu.vector_store %arg11[%c72_235, %c0_236], %206 {strides = array<i32>} : memref<216x600xf32, #tpu.memory_space<vmem>>, vector<8x600xf32>,
    %c0_237 = arith.constant 0 : index
    %c101_238 = arith.constant 101 : index
    %208 = vector.load %arg10[%c0_237, %c101_238] : memref<8x822xf32, #tpu.memory_space<vmem>>, vector<8x600xf32>
    %c80_239 = arith.constant 80 : index
    %c0_240 = arith.constant 0 : index
    %209 = vector.load %arg11[%c80_239, %c0_240] : memref<216x600xf32, #tpu.memory_space<vmem>>, vector<8x600xf32>
    tpu.vector_store %arg11[%c80_239, %c0_240], %208 {strides = array<i32>} : memref<216x600xf32, #tpu.memory_space<vmem>>, vector<8x600xf32>,
    %c0_241 = arith.constant 0 : index
    %c102_242 = arith.constant 102 : index
    %210 = vector.load %arg10[%c0_241, %c102_242] : memref<8x822xf32, #tpu.memory_space<vmem>>, vector<8x600xf32>
    %c88_243 = arith.constant 88 : index
    %c0_244 = arith.constant 0 : index
    %211 = vector.load %arg11[%c88_243, %c0_244] : memref<216x600xf32, #tpu.memory_space<vmem>>, vector<8x600xf32>
    tpu.vector_store %arg11[%c88_243, %c0_244], %210 {strides = array<i32>} : memref<216x600xf32, #tpu.memory_space<vmem>>, vector<8x600xf32>,
    %c0_245 = arith.constant 0 : index
    %c110_246 = arith.constant 110 : index
    %212 = vector.load %arg10[%c0_245, %c110_246] : memref<8x822xf32, #tpu.memory_space<vmem>>, vector<8x600xf32>
    %c96_247 = arith.constant 96 : index
    %c0_248 = arith.constant 0 : index
    %213 = vector.load %arg11[%c96_247, %c0_248] : memref<216x600xf32, #tpu.memory_space<vmem>>, vector<8x600xf32>
    tpu.vector_store %arg11[%c96_247, %c0_248], %212 {strides = array<i32>} : memref<216x600xf32, #tpu.memory_space<vmem>>, vector<8x600xf32>,
    %c0_249 = arith.constant 0 : index
    %c111_250 = arith.constant 111 : index
    %214 = vector.load %arg10[%c0_249, %c111_250] : memref<8x822xf32, #tpu.memory_space<vmem>>, vector<8x600xf32>
    %c104_251 = arith.constant 104 : index
    %c0_252 = arith.constant 0 : index
    %215 = vector.load %arg11[%c104_251, %c0_252] : memref<216x600xf32, #tpu.memory_space<vmem>>, vector<8x600xf32>
    tpu.vector_store %arg11[%c104_251, %c0_252], %214 {strides = array<i32>} : memref<216x600xf32, #tpu.memory_space<vmem>>, vector<8x600xf32>,
    %c0_253 = arith.constant 0 : index
    %c112_254 = arith.constant 112 : index
    %216 = vector.load %arg10[%c0_253, %c112_254] : memref<8x822xf32, #tpu.memory_space<vmem>>, vector<8x600xf32>
    %c112_255 = arith.constant 112 : index
    %c0_256 = arith.constant 0 : index
    %217 = vector.load %arg11[%c112_255, %c0_256] : memref<216x600xf32, #tpu.memory_space<vmem>>, vector<8x600xf32>
    tpu.vector_store %arg11[%c112_255, %c0_256], %216 {strides = array<i32>} : memref<216x600xf32, #tpu.memory_space<vmem>>, vector<8x600xf32>,
    %c0_257 = arith.constant 0 : index
    %c120_258 = arith.constant 120 : index
    %218 = vector.load %arg10[%c0_257, %c120_258] : memref<8x822xf32, #tpu.memory_space<vmem>>, vector<8x600xf32>
    %c120_259 = arith.constant 120 : index
    %c0_260 = arith.constant 0 : index
    %219 = vector.load %arg11[%c120_259, %c0_260] : memref<216x600xf32, #tpu.memory_space<vmem>>, vector<8x600xf32>
    tpu.vector_store %arg11[%c120_259, %c0_260], %218 {strides = array<i32>} : memref<216x600xf32, #tpu.memory_space<vmem>>, vector<8x600xf32>,
    %c0_261 = arith.constant 0 : index
    %c121_262 = arith.constant 121 : index
    %220 = vector.load %arg10[%c0_261, %c121_262] : memref<8x822xf32, #tpu.memory_space<vmem>>, vector<8x600xf32>
    %c128_263 = arith.constant 128 : index
    %c0_264 = arith.constant 0 : index
    %221 = vector.load %arg11[%c128_263, %c0_264] : memref<216x600xf32, #tpu.memory_space<vmem>>, vector<8x600xf32>
    tpu.vector_store %arg11[%c128_263, %c0_264], %220 {strides = array<i32>} : memref<216x600xf32, #tpu.memory_space<vmem>>, vector<8x600xf32>,
    %c0_265 = arith.constant 0 : index
    %c122_266 = arith.constant 122 : index
    %222 = vector.load %arg10[%c0_265, %c122_266] : memref<8x822xf32, #tpu.memory_space<vmem>>, vector<8x600xf32>
    %c136_267 = arith.constant 136 : index
    %c0_268 = arith.constant 0 : index
    %223 = vector.load %arg11[%c136_267, %c0_268] : memref<216x600xf32, #tpu.memory_space<vmem>>, vector<8x600xf32>
    tpu.vector_store %arg11[%c136_267, %c0_268], %222 {strides = array<i32>} : memref<216x600xf32, #tpu.memory_space<vmem>>, vector<8x600xf32>,
    %c0_269 = arith.constant 0 : index
    %c200_270 = arith.constant 200 : index
    %224 = vector.load %arg10[%c0_269, %c200_270] : memref<8x822xf32, #tpu.memory_space<vmem>>, vector<8x600xf32>
    %c144_271 = arith.constant 144 : index
    %c0_272 = arith.constant 0 : index
    %225 = vector.load %arg11[%c144_271, %c0_272] : memref<216x600xf32, #tpu.memory_space<vmem>>, vector<8x600xf32>
    tpu.vector_store %arg11[%c144_271, %c0_272], %224 {strides = array<i32>} : memref<216x600xf32, #tpu.memory_space<vmem>>, vector<8x600xf32>,
    %c0_273 = arith.constant 0 : index
    %c201_274 = arith.constant 201 : index
    %226 = vector.load %arg10[%c0_273, %c201_274] : memref<8x822xf32, #tpu.memory_space<vmem>>, vector<8x600xf32>
    %c152_275 = arith.constant 152 : index
    %c0_276 = arith.constant 0 : index
    %227 = vector.load %arg11[%c152_275, %c0_276] : memref<216x600xf32, #tpu.memory_space<vmem>>, vector<8x600xf32>
    tpu.vector_store %arg11[%c152_275, %c0_276], %226 {strides = array<i32>} : memref<216x600xf32, #tpu.memory_space<vmem>>, vector<8x600xf32>,
    %c0_277 = arith.constant 0 : index
    %c202_278 = arith.constant 202 : index
    %228 = vector.load %arg10[%c0_277, %c202_278] : memref<8x822xf32, #tpu.memory_space<vmem>>, vector<8x600xf32>
    %c160_279 = arith.constant 160 : index
    %c0_280 = arith.constant 0 : index
    %229 = vector.load %arg11[%c160_279, %c0_280] : memref<216x600xf32, #tpu.memory_space<vmem>>, vector<8x600xf32>
    tpu.vector_store %arg11[%c160_279, %c0_280], %228 {strides = array<i32>} : memref<216x600xf32, #tpu.memory_space<vmem>>, vector<8x600xf32>,
    %c0_281 = arith.constant 0 : index
    %c210_282 = arith.constant 210 : index
    %230 = vector.load %arg10[%c0_281, %c210_282] : memref<8x822xf32, #tpu.memory_space<vmem>>, vector<8x600xf32>
    %c168_283 = arith.constant 168 : index
    %c0_284 = arith.constant 0 : index
    %231 = vector.load %arg11[%c168_283, %c0_284] : memref<216x600xf32, #tpu.memory_space<vmem>>, vector<8x600xf32>
    tpu.vector_store %arg11[%c168_283, %c0_284], %230 {strides = array<i32>} : memref<216x600xf32, #tpu.memory_space<vmem>>, vector<8x600xf32>,
    %c0_285 = arith.constant 0 : index
    %c211_286 = arith.constant 211 : index
    %232 = vector.load %arg10[%c0_285, %c211_286] : memref<8x822xf32, #tpu.memory_space<vmem>>, vector<8x600xf32>
    %c176_287 = arith.constant 176 : index
    %c0_288 = arith.constant 0 : index
    %233 = vector.load %arg11[%c176_287, %c0_288] : memref<216x600xf32, #tpu.memory_space<vmem>>, vector<8x600xf32>
    tpu.vector_store %arg11[%c176_287, %c0_288], %232 {strides = array<i32>} : memref<216x600xf32, #tpu.memory_space<vmem>>, vector<8x600xf32>,
    %c0_289 = arith.constant 0 : index
    %c212_290 = arith.constant 212 : index
    %234 = vector.load %arg10[%c0_289, %c212_290] : memref<8x822xf32, #tpu.memory_space<vmem>>, vector<8x600xf32>
    %c184_291 = arith.constant 184 : index
    %c0_292 = arith.constant 0 : index
    %235 = vector.load %arg11[%c184_291, %c0_292] : memref<216x600xf32, #tpu.memory_space<vmem>>, vector<8x600xf32>
    tpu.vector_store %arg11[%c184_291, %c0_292], %234 {strides = array<i32>} : memref<216x600xf32, #tpu.memory_space<vmem>>, vector<8x600xf32>,
    %c0_293 = arith.constant 0 : index
    %c220_294 = arith.constant 220 : index
    %236 = vector.load %arg10[%c0_293, %c220_294] : memref<8x822xf32, #tpu.memory_space<vmem>>, vector<8x600xf32>
    %c192_295 = arith.constant 192 : index
    %c0_296 = arith.constant 0 : index
    %237 = vector.load %arg11[%c192_295, %c0_296] : memref<216x600xf32, #tpu.memory_space<vmem>>, vector<8x600xf32>
    tpu.vector_store %arg11[%c192_295, %c0_296], %236 {strides = array<i32>} : memref<216x600xf32, #tpu.memory_space<vmem>>, vector<8x600xf32>,
    %c0_297 = arith.constant 0 : index
    %c221_298 = arith.constant 221 : index
    %238 = vector.load %arg10[%c0_297, %c221_298] : memref<8x822xf32, #tpu.memory_space<vmem>>, vector<8x600xf32>
    %c200_299 = arith.constant 200 : index
    %c0_300 = arith.constant 0 : index
    %239 = vector.load %arg11[%c200_299, %c0_300] : memref<216x600xf32, #tpu.memory_space<vmem>>, vector<8x600xf32>
    tpu.vector_store %arg11[%c200_299, %c0_300], %238 {strides = array<i32>} : memref<216x600xf32, #tpu.memory_space<vmem>>, vector<8x600xf32>,
    %c0_301 = arith.constant 0 : index
    %c222_302 = arith.constant 222 : index
    %240 = vector.load %arg10[%c0_301, %c222_302] : memref<8x822xf32, #tpu.memory_space<vmem>>, vector<8x600xf32>
    %c208_303 = arith.constant 208 : index
    %c0_304 = arith.constant 0 : index
    %241 = vector.load %arg11[%c208_303, %c0_304] : memref<216x600xf32, #tpu.memory_space<vmem>>, vector<8x600xf32>
    tpu.vector_store %arg11[%c208_303, %c0_304], %240 {strides = array<i32>} : memref<216x600xf32, #tpu.memory_space<vmem>>, vector<8x600xf32>,
    %c0_305 = arith.constant 0 : index
    %c0_306 = arith.constant 0 : index
    %242 = vector.load %arg4[%c0_305, %c0_306] : memref<8x216xf32, #tpu.memory_space<vmem>>, vector<8x216xf32>
    %c0_307 = arith.constant 0 : index
    %c0_308 = arith.constant 0 : index
    %243 = vector.load %arg11[%c0_307, %c0_308] : memref<216x600xf32, #tpu.memory_space<vmem>>, vector<216x600xf32>
    %cst_309 = arith.constant dense<0.000000e+00> : vector<8x600xf32>
    %244 = tpu.matmul %242, %243, %cst_309 {dimension_numbers = #tpu.dot_dimension_numbers<[1], [0], [0], [1], [0, 0, 1, 1], [], []>} : vector<8x216xf32>, vector<216x600xf32>, vector<8x600xf32> -> vector<8x600xf32>
    %c0_310 = arith.constant 0 : index
    %c0_311 = arith.constant 0 : index
    %245 = vector.load %arg5[%c0_310, %c0_311] : memref<8x1xf32, #tpu.memory_space<vmem>>, vector<8x1xf32>
    %246 = vector.broadcast %245 : vector<8x1xf32> to vector<8x600xf32>
    %247 = arith.addf %244, %246 : vector<8x600xf32>
    %248 = vector.broadcast %0 : vector<1x600xf32> to vector<8x600xf32>
    %249 = arith.mulf %247, %248 : vector<8x600xf32>
    %cst_312 = arith.constant dense<0.000000e+00> : vector<8xf32>
    %250 = vector.multi_reduction <add>, %249, %cst_312 [1] : vector<8x600xf32> to vector<8xf32>
    %251 = vector.shape_cast %250 : vector<8xf32> to vector<8x1xf32>
    %cst_313 = arith.constant 3.906250e-03 : f32
    %252 = vector.broadcast %cst_313 : f32 to vector<8x1xf32>
    %253 = arith.mulf %251, %252 : vector<8x1xf32>
    %254 = vector.broadcast %253 : vector<8x1xf32> to vector<8x600xf32>
    %255 = arith.subf %247, %254 : vector<8x600xf32>
    %256 = arith.mulf %255, %255 : vector<8x600xf32>
    %257 = vector.broadcast %0 : vector<1x600xf32> to vector<8x600xf32>
    %258 = arith.mulf %256, %257 : vector<8x600xf32>
    %cst_314 = arith.constant dense<0.000000e+00> : vector<8xf32>
    %259 = vector.multi_reduction <add>, %258, %cst_314 [1] : vector<8x600xf32> to vector<8xf32>
    %260 = vector.shape_cast %259 : vector<8xf32> to vector<8x1xf32>
    %cst_315 = arith.constant 3.906250e-03 : f32
    %261 = vector.broadcast %cst_315 : f32 to vector<8x1xf32>
    %262 = arith.mulf %260, %261 : vector<8x1xf32>
    %263 = vector.broadcast %253 : vector<8x1xf32> to vector<8x600xf32>
    %264 = arith.subf %247, %263 : vector<8x600xf32>
    %cst_316 = arith.constant 9.99999974E-6 : f32
    %265 = vector.broadcast %cst_316 : f32 to vector<8x1xf32>
    %266 = arith.addf %262, %265 : vector<8x1xf32>
    %267 = math.rsqrt %266 : vector<8x1xf32>
    %268 = vector.broadcast %267 : vector<8x1xf32> to vector<8x600xf32>
    %269 = arith.mulf %264, %268 : vector<8x600xf32>
    %cst_317 = arith.constant 0.000000e+00 : f32
    %270 = vector.broadcast %cst_317 : f32 to vector<8x600xf32>
    %271 = arith.maximumf %269, %270 : vector<8x600xf32>
    %c0_318 = arith.constant 0 : index
    %c0_319 = arith.constant 0 : index
    %c0_320 = arith.constant 0 : index
    %272 = vector.load %arg7[%c0_318, %c0_319, %c0_320] : memref<1x8x600xf32, #tpu.memory_space<vmem>>, vector<1x8x600xf32>
    %273 = vector.shape_cast %272 : vector<1x8x600xf32> to vector<8x600xf32>
    %274 = vector.shape_cast %271 : vector<8x600xf32> to vector<1x8x600xf32>
    tpu.vector_store %arg7[%c0_318, %c0_319, %c0_320], %274 {strides = array<i32>} : memref<1x8x600xf32, #tpu.memory_space<vmem>>, vector<1x8x600xf32>,
    return
  }
  func.func @transform_0(%arg0: i32) -> (i32, i32, i32) {
    %c0_i32 = arith.constant 0 : i32
    %c0_i32_0 = arith.constant 0 : i32
    %c0_i32_1 = arith.constant 0 : i32
    return %arg0, %c0_i32, %c0_i32_0 : i32, i32, i32
  }
  func.func @transform_1(%arg0: i32) -> (i32, i32) {
    %c0_i32 = arith.constant 0 : i32
    %c0_i32_0 = arith.constant 0 : i32
    %c0_i32_1 = arith.constant 0 : i32
    return %c0_i32, %c0_i32_0 : i32, i32
  }
  func.func @transform_2(%arg0: i32) -> (i32, i32) {
    %c0_i32 = arith.constant 0 : i32
    %c0_i32_0 = arith.constant 0 : i32
    %c0_i32_1 = arith.constant 0 : i32
    return %c0_i32, %c0_i32_0 : i32, i32
  }
  func.func @transform_3(%arg0: i32) -> (i32, i32) {
    %c0_i32 = arith.constant 0 : i32
    %c0_i32_0 = arith.constant 0 : i32
    %c0_i32_1 = arith.constant 0 : i32
    return %c0_i32, %c0_i32_0 : i32, i32
  }
  func.func @transform_4(%arg0: i32) -> (i32, i32) {
    %c0_i32 = arith.constant 0 : i32
    %c0_i32_0 = arith.constant 0 : i32
    %c0_i32_1 = arith.constant 0 : i32
    return %c0_i32, %c0_i32_0 : i32, i32
  }
  func.func @transform_5(%arg0: i32) -> (i32, i32) {
    %c0_i32 = arith.constant 0 : i32
    %c0_i32_0 = arith.constant 0 : i32
    %c0_i32_1 = arith.constant 0 : i32
    return %c0_i32, %c0_i32_0 : i32, i32
  }
  func.func @transform_6(%arg0: i32) -> (i32, i32, i32) {
    %c0_i32 = arith.constant 0 : i32
    %c0_i32_0 = arith.constant 0 : i32
    %c0_i32_1 = arith.constant 0 : i32
    return %arg0, %c0_i32, %c0_i32_0 : i32, i32, i32
  }
}

</mosaic_0001>

<bundles_post_ra>
// kernel: tpu_custom_call.1
= control target key start
LH: loop header
LB: loop body
LE: loop exit
PB: predicated region body
PF: predicated region fallthrough
CT: control target
= control target key end

     0   :  { %s5851_s0 = inlined_call_operand.vmem [shape: f32[2,4,256], index: 0, kind: input, shape index: {}]   ;;  %s5852_s1 = inlined_call_operand.hbm [shape: f32[8,108], index: 1, kind: input, shape index: {}]   ;;  %s5853_s2 = inlined_call_operand.vmem [shape: f32[8,1], index: 2, kind: input, shape index: {}]   ;;  %s5854_s3 = inlined_call_operand.hbm [shape: f32[8,216], index: 3, kind: input, shape index: {}]   ;;  %s5855_s4 = inlined_call_operand.vmem [shape: f32[8,1], index: 4, kind: input, shape index: {}]   ;;  %s5856_s5 = inlined_call_operand.vmem [shape: f32[1,600], index: 5, kind: input, shape index: {}]   ;;  %s5857_s6 = inlined_call_operand.hbm [shape: f32[2,8,600], index: 6, kind: output, shape index: {}]  }
   0x1   :  { %5945 = sst [smem:[#allocation23_spill]] %s5851_s0 }
   0x2   :  { %5946 = sst [smem:[#allocation24_spill]] %s5852_s1 }
   0x3   :  { %5947 = sst [smem:[#allocation25_spill]] %s5853_s2 }
   0x4   :  { %5948 = sst [smem:[#allocation26_spill]] %s5854_s3 }
   0x5   :  { %5949 = sst [smem:[#allocation27_spill]] %s5856_s5 }
   0x6   :  { %11 = vsyncpa [#allocation7], 0 }
   0x7   :  { %12 = vsyncpa [#allocation10], 0 }
   0x8   :  { %13 = vsyncpa [#allocation8], 0 }
   0x9   :  { %15 = vsyncpa [#allocation8 + $0x1], 0  ;;  %s4056_s21 = smov 0   ;;  %s4058_s22 = smov 0  }
   0xa   :  { %s4060_s23 = smov 0   ;;  %s4062_s24 = smov 0  }
   0xb LB: > { %5950 = sst [smem:[#allocation15_spill]] %s3944_s21  ;;  %s4077_s25 = sadd.s32 4294967295, %s3956_s24   ;;  %s3956_s24 = sphi %s4062_s24, %s6130_s24   ;;  %s3952_s23 = sphi %s4060_s23, %s6132_s23   ;;  %s3948_s22 = sphi %s4058_s22, %s6134_s22   ;;  %s3944_s21 = sphi %s4056_s21, %s6133_s21  }
   0xc   : > { %5951 = sst [smem:[#allocation16_spill]] %s3952_s23  ;;  %s3390_s26 = sadd.s32 4294967294, %s3956_s24  }
   0xd   : > { %5952 = sst [smem:[#allocation17_spill]] %s3956_s24  ;;  %s4081_s27 = sadd.s32 1, %s3956_s24  }
   0xe   : > { %5953 = sst [smem:[#allocation18_spill]] %s4081_s27  ;;  %s159_s28 = sadd.s32 1, %s3952_s23 }
   0xf   : > { %s156_s29 = ssub.s32 %s3956_s24, %s4081_s27  ;;  %p169_p0 = scmp.ne.s32.totalorder %s3952_s23, %s3948_s22 }
  0x10   : > { %p157_p1 = scmp.eq.s32.totalorder %s156_s29, 0  ;;  %p170_p2 = scmp.eq.s32.totalorder %s4077_s25, 1 }
  0x11   : > { %p175_p3 = scmp.ne.s32.totalorder %s3948_s22, %s3944_s21  ;;  %p176_p4 = scmp.eq.s32.totalorder %s3390_s26, 1 }
  0x12   : > { %s4092_s30 = scalar_select %p157_p1, %s3952_s23, %s159_s28  }
  0x13   : > { %p4094_p5 = por %p170_p2, %p169_p0  ;;  %p4098_p6 = por %p176_p4, %p175_p3 }
  0x14   : > { %5954 = sst [smem:[#allocation19_spill]] %s4092_s30  ;;  %p3391_p7 = scmp.ge.s32.totalorder %s3956_s24, 1 }
  0x15   : > { %s5955_s7 = scalar_select %p4094_p5, 1, 0 }
  0x16   : > { %s5956_s8 = scalar_select %p4098_p6, 1, 0 }
  0x17   : > { %p183_p8 = scmp.lt.s32.totalorder %s3956_s24, 3  ;;  %p5858_p9 = scmp.eq.s32.totalorder %s4077_s25, 0 }
  0x18   : > { %5957 = sst [smem:[#allocation20_spill]] %s5956_s8  ;;  %s3958_s10 = smov [#allocation6]  }
  0x19   : > { %p4105_p10 = pnand %p3391_p7, %p183_p8  ;;  %s196_s11 = sshll.u32 %s3958_s10, 4  ;;  %s197_s11 = int_to_ptr.vmem [resolvable:$true] %s196_s11 }
  0x1a   : > { %s3959_s12 = smov [#allocation9]   ;;  %s5960_s1 = sld [smem:[#allocation24_spill]] }
  0x1b   : > { %s5958_s9 = scalar_select %p4105_p10, 1, 0 }
  0x1c   : > { %p3698_p11 = pneg %p4105_p10  ;;  %s210_s13 = sshll.u32 %s3959_s12, 4  ;;  %s4117_s13 = int_to_ptr.vmem [resolvable:$true] %s210_s13 }
  0x1e   : > { %p4113_p12 = pnand %p5858_p9, %p3698_p11 }
  0x20   : > { %s3830_s17 = scalar_lea.hbm %s5960_s1, 128  ;;  %p3832_p0 = pneg %p4113_p12 }
  0x21   : > { %p3831_p13 = scmp.ne.s32.totalorder %s5960_s1, %s3830_s17  ;;  %p3837_p3 = scmp.lt.u32.totalorder %s3830_s17, %s5960_s1 }
  0x23   : > { %p3833_p1 = pnand %p3832_p0, %p3831_p13 }
  0x25   : > { %p3834_p2 = pneg %p3833_p1 }
  0x27   : > { %p3839_p4 = pnand %p3837_p3, %p3834_p2 }
  0x29   : > { %3842 = shalt.err (!%p3839_p4)
}
  0x2a   : > { %s3843_s28 = scalar_lea.vmem %s197_s11, 128  ;;  %p3851_p9 = scmp.lt.s32.totalorder %s197_s11, %s197_s11 }
  0x2b   : > { %p3844_p7 = scmp.ne.s32.totalorder %s197_s11, %s3843_s28  ;;  %p3852_p6 = scmp.lt.s32.totalorder %s3843_s28, %s3843_s28 }
  0x2d   : > { %p3846_p8 = pnand %p3844_p7, %p3832_p0  ;;  %p3853_p5 = por %p3852_p6, %p3851_p9 }
  0x2f   : > { %p3847_p11 = pneg %p3846_p8 }
  0x31   : > { %p3854_p10 = pnand %p3853_p5, %p3847_p11 }
  0x33   : > { %3857 = shalt.err (!%p3854_p10)
}
  0x34   : > { %3701 = dma.hbm_to_vmem [thread:$0]  (!%p4113_p12), %s5960_s1, 128, %s197_s11, [#allocation7]  }
  0x35   : > { %s5961_s3 = sld [smem:[#allocation26_spill]] }
  0x3b   : > { %s3858_s16 = scalar_lea.hbm %s5961_s3, 256 }
  0x3c   : > { %p3859_p13 = scmp.ne.s32.totalorder %s5961_s3, %s3858_s16  ;;  %p3865_p9 = scmp.lt.u32.totalorder %s3858_s16, %s5961_s3 }
  0x3e   : > { %p3861_p6 = pnand %p3859_p13, %p3832_p0 }
  0x40   : > { %p3862_p5 = pneg %p3861_p6 }
  0x42   : > { %p3867_p10 = pnand %p3865_p9, %p3862_p5 }
  0x44   : > { %3870 = shalt.err (!%p3867_p10)
}
  0x45   : > { %s3871_s11 = scalar_lea.vmem %s4117_s13, 256  ;;  %p3879_p4 = scmp.lt.s32.totalorder %s4117_s13, %s4117_s13 }
  0x46   : > { %p3872_p1 = scmp.ne.s32.totalorder %s4117_s13, %s3871_s11  ;;  %p3880_p7 = scmp.lt.s32.totalorder %s3871_s11, %s3871_s11 }
  0x48   : > { %p3874_p2 = pnand %p3872_p1, %p3832_p0  ;;  %p3881_p8 = por %p3880_p7, %p3879_p4 }
  0x4a   : > { %p3875_p3 = pneg %p3874_p2 }
  0x4c   : > { %p3882_p11 = pnand %p3881_p8, %p3875_p3 }
  0x4e   : > { %3885 = shalt.err (!%p3882_p11)
}
  0x4f   : > { %3704 = dma.hbm_to_vmem [thread:$0]  (!%p4113_p12), %s5961_s3, 256, %s4117_s13, [#allocation10]  }
  0x50   : > { %p5962_p13 = scmp.ne.s32.totalorder %s5958_s9, 0 }
  0x52   : > { %237 = sbr.rel (%p5962_p13) target bundleno = 2302 (0x8fe), region = 44 }
  0x59   : > { %p5963_p6 = scmp.eq.s32.totalorder %s4077_s25, 0 }
  0x5b   : > { %3931 = dma.done.wait (%p5963_p6), [#allocation7], 128   ;;  %p5964_p0 = pmov %p5963_p6 }
  0x5d   : > { %3933 = vsyncadd (%p5964_p0), [#allocation7], 4294967168  ;;  %p5965_p5 = pmov %p5964_p0 }
  0x5e   : > { %p5966_p9 = pmov %p5964_p0 }
  0x5f   : > { %3935 = dma.done.wait (%p5965_p5), [#allocation10], 256  }
  0x60   : > { %3937 = vsyncadd (%p5966_p9), [#allocation10], 4294967040  ;;  %p271_p10 = scmp.lt.s32.totalorder %s4077_s25, 1  ;;  %v3960_v0 = vmov 0.0   ;;  %s5967_s0 = sld [smem:[#allocation23_spill]]  ;;  %vm297_vm0 = vcmask 1044424  }
  0x61   : > { %277 = vst [vmem:[#allocation2] sm:$0xff] %v3960_v0  ;;  %278 = vst [vmem:[#allocation2 + $0x8] sm:$0xff] %v3960_v0  ;;  %1630 = vmatprep.mubr.f32.mxu0 %v3960_v0  ;;  %1701 = vmatprep.mubr.f32.mxu1 %v3960_v0  ;;  %s3961_s12 = smov 113   ;;  %s3962_s15 = smov 115   ;;  %vm298_vm1 = vcmask 7172   ;;  %vm294_vm2 = vcmask 924672  }
  0x62   : > { %279 = vst [vmem:[#allocation2 + $0x10] sm:$0xff] %v3960_v0  ;;  %1858 = vst [vmem:[#allocation4] sm:$0xff] %v3960_v0  ;;  %s272_s9 = scalar_select %p271_p10, %s4077_s25, 1  ;;  %vm287_vm3 = vcmask 970616   ;;  %vm306_vm5 = vcmask 85016   ;;  %vm313_vm6 = vcmask 167016  }
  0x63   : > { %1863 = vst [vmem:[#allocation4 + $0x28] sm:$0xff] %v3960_v0  ;;  %s5861_s16 = smov 111   ;;  %s5891_s17 = smov 117   ;;  %vm299_vm4 = vmor %vm298_vm1, %vm297_vm0  ;;  %vm320_vm7 = vcmask 249016   ;;  %vm327_vm8 = vcmask 331016   ;;  %vm334_vm9 = vcmask 413016  }
  0x64   : > { %s3414_s13 = sshll.u32 %s272_s9, 3  ;;  %s3965_s18 = smov 119   ;;  %vm341_vm10 = vcmask 495016   ;;  %vm348_vm11 = vcmask 741016   ;;  %vm355_vm12 = vcmask 823016   ;;  %vm362_vm13 = vcmask 905016  }
  0x65   : > { %s3966_s19 = smov 121   ;;  %s3967_s20 = smov 123   ;;  %vm379_vm14 = vcmask 1044440   ;;  %vm380_vm15 = vcmask 23556   ;;  %vm5893_vm0 = vcmask 220160   ;;  %vm369_vm1 = vcmask 987016  }
  0x66   : > { %s4188_s10 = scalar_lea.vmem %s5967_s0, %s3414_s13  ;;  %s3968_s11 = smov 125  }
  0x67   : > { %v289_v1 = vld [vmem:[%s4188_s10] sm:$0xf]  ;;  %s3969_s26 = smov 19   ;;  %s3970_s28 = smov 21   ;;  %v404_v17 = vld [vmem:[%s4188_s10 + $0x4] sm:$0xf] }
  0x68   : > { %v301_v2 = vld [vmem:[%s4188_s10] sm:$0xf]  ;;  %291 = vrot.lane.b32.xlu0 %v289_v1, %s3961_s12  ;;  %s5875_s9 = smov 27   ;;  %s3972_s13 = smov 23   ;;  %v411_v18 = vld [vmem:[%s4188_s10 + $0x4] sm:$0xf] }
  0x69   : > { %303 = vrot.lane.b32.xlu1 %v301_v2, %s3962_s15  ;;  %v282_v3 = vld [vmem:[%s4188_s10] sm:$0xf]  ;;  %s3973_s14 = smov 25   ;;  %s3974_s29 = smov 29   ;;  %v418_v19 = vld [vmem:[%s4188_s10 + $0x4] sm:$0xf] }
  0x6a   : > { %v308_v4 = vld [vmem:[%s4188_s10] sm:$0xf]  ;;  %s3975_s12 = smov 31   ;;  %s3976_s15 = smov 33   ;;  %v425_v20 = vld [vmem:[%s4188_s10 + $0x4] sm:$0xf] }
  0x6b   : > { %v315_v5 = vld [vmem:[%s4188_s10] sm:$0xf]  ;;  %v432_v21 = vld [vmem:[%s4188_s10 + $0x4] sm:$0xf]  ;;  %s5985_s0 = smov 35   ;;  %s5986_s1 = smov 34  }
  0x6c   : > { %284 = vrot.lane.b32.xlu0 %v282_v3, %s5861_s16  ;;  %v322_v6 = vld [vmem:[%s4188_s10] sm:$0xf]  ;;  %v453_v22 = vld [vmem:[%s4188_s10 + $0x4] sm:$0xf]  ;;  %s5873_s16 = smov 18   ;;  %s5987_s2 = sld [smem:[#allocation25_spill]] }
  0x6d   : > { %310 = vrot.lane.b32.xlu1 %v308_v4, %s5891_s17  ;;  %v329_v7 = vld [vmem:[%s4188_s10] sm:$0xf]  ;;  %v439_v23 = vld [vmem:[%s4188_s10 + $0x4] sm:$0xf]  ;;  %s6026_s5 = sld [smem:[#allocation27_spill]]  ;;  %s6029_s3 = smov 46  }
  0x6e   : > { %v336_v8 = vld [vmem:[%s4188_s10] sm:$0xf]  ;;  %v446_v24 = vld [vmem:[%s4188_s10 + $0x4] sm:$0xf]  ;;  %s6030_s30 = smov 111   ;;  %s6034_s23 = smov 106  }
  0x6f   : > { %v343_v9 = vld [vmem:[%s4188_s10] sm:$0xf]  ;;  %v465_v25 = vld [vmem:[%s4188_s10 + $0x4] sm:$0xf]  ;;  %s6035_s27 = smov 107   ;;  %s6036_s8 = smov 28  }
  0x70   : > { %317 = vrot.lane.b32.xlu0 %v315_v5, %s3965_s18  ;;  %v350_v10 = vld [vmem:[%s4188_s10] sm:$0xf]  ;;  %s5881_s18 = smov 55   ;;  %v472_v26 = vld [vmem:[%s4188_s10 + $0x4] sm:$0xf]  ;;  %s6037_s21 = smov 26  }
  0x71   : > { %324 = vrot.lane.b32.xlu1 %v322_v6, %s3966_s19  ;;  %v371_v11 = vld [vmem:[%s4188_s10] sm:$0xf]  ;;  %s3978_s19 = smov 57   ;;  %v479_v27 = vld [vmem:[%s4188_s10 + $0x4] sm:$0xf]  ;;  %s6038_s24 = smov 17  }
  0x72   : > { %v357_v12 = vld [vmem:[%s4188_s10] sm:$0xf]  ;;  %v486_v28 = vld [vmem:[%s4188_s10 + $0x4] sm:$0xf]  ;;  %p6125_p1 = scmp.ne.s32.totalorder %s5955_s7, 0 }
  0x73   : > { %v364_v13 = vld [vmem:[%s4188_s10] sm:$0xf]  ;;  %v493_v29 = vld [vmem:[%s4188_s10 + $0x4] sm:$0xf] }
  0x74   : > { %331 = vrot.lane.b32.xlu0 %v329_v7, %s3967_s20  ;;  %v383_v14 = vld [vmem:[%s4188_s10] sm:$0xf]  ;;  %s3979_s20 = smov 59   ;;  %v500_v30 = vld [vmem:[%s4188_s10 + $0x4] sm:$0xf] }
  0x75   : > { %338 = vrot.lane.b32.xlu1 %v336_v8, %s3968_s11  ;;  %v390_v15 = vld [vmem:[%s4188_s10] sm:$0xf]  ;;  %s3980_s11 = smov 61   ;;  %v507_v31 = vld [vmem:[%s4188_s10 + $0x4] sm:$0xf] }
  0x76   : > { %v397_v16 = vld [vmem:[%s4188_s10] sm:$0xf]  ;;  %v514_v32 = vld [vmem:[%s4188_s10 + $0x4] sm:$0xf]  ;;  %s5912_s10 = smov 126  }
  0x78   : > { %345 = vrot.lane.b32.xlu0 %v343_v9, %s3969_s26  ;;  %s3981_s26 = smov 63  }
  0x79   : > { %352 = vrot.lane.b32.xlu1 %v350_v10, %s3970_s28  ;;  %s3982_s28 = smov 69  }
  0x7c   : > { %373 = vrot.lane.b32.xlu0 %v371_v11, %s5875_s9 }
  0x7d   : > { %359 = vrot.lane.b32.xlu1 %v357_v12, %s3972_s13  ;;  %s3983_s13 = smov 65  }
  0x80   : > { %366 = vrot.lane.b32.xlu0 %v364_v13, %s3973_s14  ;;  %s3984_s14 = smov 67  }
  0x81   : > { %385 = vrot.lane.b32.xlu1 %v383_v14, %s3974_s29  ;;  %s3985_s29 = smov 91  }
  0x84   : > { %392 = vrot.lane.b32.xlu0 %v390_v15, %s3975_s12  ;;  %s3986_s12 = smov 93  }
  0x85   : > { %399 = vrot.lane.b32.xlu1 %v397_v16, %s3976_s15  ;;  %s3987_s15 = smov 95  }
  0x88   : > { %406 = vrot.lane.b32.xlu0 %v404_v17, %s5881_s18 }
  0x89   : > { %413 = vrot.lane.b32.xlu1 %v411_v18, %s3978_s19  ;;  %s3988_s19 = smov 97  }
  0x8c   : > { %420 = vrot.lane.b32.xlu0 %v418_v19, %s3979_s20  ;;  %s3989_s20 = smov 99  }
  0x8d   : > { %427 = vrot.lane.b32.xlu1 %v425_v20, %s3980_s11  ;;  %s3990_s11 = smov 101  }
  0x90   : > { %434 = vrot.lane.b32.xlu0 %v432_v21, %s3981_s26  ;;  %s3991_s26 = smov 103  }
  0x91   : > { %455 = vrot.lane.b32.xlu1 %v453_v22, %s3982_s28  ;;  %s3992_s28 = smov 105  }
  0x94   : > { %441 = vrot.lane.b32.xlu0 %v439_v23, %s3983_s13  ;;  %s5865_s13 = smov 127  }
  0x95   : > { %448 = vrot.lane.b32.xlu1 %v446_v24, %s3984_s14  ;;  %s5909_s14 = smov 116  }
  0x98   : > { %467 = vrot.lane.b32.xlu0 %v465_v25, %s3985_s29  ;;  %s5863_s29 = smov 118  }
  0x99   : > { %474 = vrot.lane.b32.xlu1 %v472_v26, %s3986_s12  ;;  %s5894_s12 = smov 107  }
  0x9c   : > { %481 = vrot.lane.b32.xlu0 %v479_v27, %s3987_s15  ;;  %s5869_s15 = smov 108  }
  0x9d   : > { %488 = vrot.lane.b32.xlu1 %v486_v28, %s3988_s19  ;;  %s5898_s19 = smov 28  }
  0xa0   : > { %495 = vrot.lane.b32.xlu0 %v493_v29, %s3989_s20  ;;  %s5900_s20 = smov 26  }
  0xa1   : > { %502 = vrot.lane.b32.xlu1 %v500_v30, %s3990_s11  ;;  %s5903_s11 = smov 106  }
  0xa4   : > { %509 = vrot.lane.b32.xlu0 %v507_v31, %s3991_s26  ;;  %s5906_s26 = smov 17  }
  0xa5   : > { %516 = vrot.lane.b32.xlu1 %v514_v32, %s3992_s28  ;;  %s5877_s28 = smov 8  }
  0xda   : > { %v292_v33 = vpop.permute.xlu0 %291 }
  0xdb   : > { %v304_v34 = vpop.permute.xlu1 %303  ;;  %v293_v35 = vrot.slane %v292_v33, 4 }
  0xdd   : > { %v295_v38 = vsel %vm294_vm2, %v293_v35, %v292_v33  ;;  %vm381_vm2 = vmor %vm380_vm15, %vm379_vm14  ;;  %vm444_vm14 = vcmask 921416   ;;  %vm451_vm15 = vcmask 1003416  }
  0xde   : > { %v285_v36 = vpop.permute.xlu0 %284 }
  0xdf   : > { %v311_v37 = vpop.permute.xlu1 %310  ;;  %288 = vst.msk [vmem:[#allocation2] sm:$0xf] %vm287_vm3, %v285_v36  ;;  %vm388_vm3 = vcmask 101416  }
  0xe0   : > { %300 = vst.msk [vmem:[#allocation2] sm:$0xff] %vm299_vm4, %v295_v38  ;;  %vm395_vm4 = vcmask 183416   ;;  %v523_v38 = vld [vmem:[#allocation2 + $0x10] sm:$0xf] }
  0xe1   : > { %307 = vst.msk [vmem:[#allocation2 + $0x4] sm:$0xf] %vm306_vm5, %v304_v34  ;;  %vm402_vm5 = vcmask 265416  }
  0xe2   : > { %314 = vst.msk [vmem:[#allocation2 + $0x4] sm:$0xf] %vm313_vm6, %v311_v37  ;;  %v318_v39 = vpop.permute.xlu0 %317  ;;  %vm409_vm6 = vcmask 511416  }
  0xe3   : > { %v325_v40 = vpop.permute.xlu1 %324  ;;  %321 = vst.msk [vmem:[#allocation2 + $0x4] sm:$0xf] %vm320_vm7, %v318_v39  ;;  %vm416_vm7 = vcmask 593416  }
  0xe4   : > { %328 = vst.msk [vmem:[#allocation2 + $0x4] sm:$0xf] %vm327_vm8, %v325_v40  ;;  %vm423_vm8 = vcmask 675416  }
  0xe6   : > { %v332_v41 = vpop.permute.xlu0 %331 }
  0xe7   : > { %v339_v42 = vpop.permute.xlu1 %338  ;;  %335 = vst.msk [vmem:[#allocation2 + $0x4] sm:$0xf] %vm334_vm9, %v332_v41  ;;  %vm430_vm9 = vcmask 757416  }
  0xe8   : > { %342 = vst.msk [vmem:[#allocation2 + $0x4] sm:$0xf] %vm341_vm10, %v339_v42  ;;  %vm437_vm10 = vcmask 839416  }
  0xea   : > { %v346_v43 = vpop.permute.xlu0 %345 }
  0xeb   : > { %v353_v44 = vpop.permute.xlu1 %352  ;;  %349 = vst.msk [vmem:[#allocation2 + $0x4] sm:$0xf] %vm348_vm11, %v346_v43  ;;  %vm458_vm11 = vcmask 564224  }
  0xec   : > { %356 = vst.msk [vmem:[#allocation2 + $0x4] sm:$0xf] %vm355_vm12, %v353_v44  ;;  %vm461_vm12 = vcmask 1044456  }
  0xee   : > { %v374_v45 = vpop.permute.xlu0 %373 }
  0xef   : > { %v360_v46 = vpop.permute.xlu1 %359  ;;  %v375_v47 = vrot.slane %v374_v45, 4 }
  0xf0   : > { %363 = vst.msk [vmem:[#allocation2 + $0x4] sm:$0xf] %vm362_vm13, %v360_v46  ;;  %vm462_vm13 = vcmask 39940  }
  0xf1   : > { %v377_v50 = vsel %vm5893_vm0, %v375_v47, %v374_v45  ;;  %v3818_v45 = vld [vmem:[#allocation2 + $0x10] ss:$0 sps:$4 sm:$0xff]  }
  0xf2   : > { %v367_v48 = vpop.permute.xlu0 %366 }
  0xf3   : > { %v386_v49 = vpop.permute.xlu1 %385  ;;  %370 = vst.msk [vmem:[#allocation2 + $0x4] sm:$0xf] %vm369_vm1, %v367_v48  ;;  %vm463_vm1 = vmor %vm462_vm13, %vm461_vm12  ;;  %vm589_vm12 = vcmask 1031168   ;;  %vm5926_vm13 = vcmask 1039360  }
  0xf4   : > { %382 = vst.msk [vmem:[#allocation2 + $0x4] sm:$0xff] %vm381_vm2, %v377_v50  ;;  %vm470_vm2 = vcmask 281816  }
  0xf5   : > { %389 = vst.msk [vmem:[#allocation2 + $0x8] sm:$0xf] %vm388_vm3, %v386_v49  ;;  %vm477_vm3 = vcmask 363816   ;;  %v573_v49 = vld [vmem:[#allocation2 + $0x10] sm:$0xf] }
  0xf6   : > { %v393_v51 = vpop.permute.xlu0 %392 }
  0xf7   : > { %v400_v52 = vpop.permute.xlu1 %399  ;;  %396 = vst.msk [vmem:[#allocation2 + $0x8] sm:$0xf] %vm395_vm4, %v393_v51  ;;  %vm484_vm4 = vcmask 445816  }
  0xf8   : > { %403 = vst.msk [vmem:[#allocation2 + $0x8] sm:$0xf] %vm402_vm5, %v400_v52  ;;  %vm491_vm5 = vcmask 527816  }
  0xfa   : > { %v407_v53 = vpop.permute.xlu0 %406 }
  0xfb   : > { %v414_v54 = vpop.permute.xlu1 %413  ;;  %410 = vst.msk [vmem:[#allocation2 + $0x8] sm:$0xf] %vm409_vm6, %v407_v53  ;;  %v4227_v55 = vld [vmem:[#allocation2] sm:$0xff]  ;;  %vm498_vm6 = vcmask 609816   ;;  %v3819_v53 = vld [vmem:[#allocation2 + $0x10] ss:$0 sps:$4 sm:$0xff]  }
  0xfc   : > { %417 = vst.msk [vmem:[#allocation2 + $0x8] sm:$0xf] %vm416_vm7, %v414_v54  ;;  %579 = vrot.lane.b32.xlu1 %v4227_v55, %s5912_s10  ;;  %v4233_v56 = vcombine.high %v4227_v55, %v4227_v55  ;;  %547 = vrot.lane.b32.xlu0 %v4227_v55, %s5865_s13  ;;  %530 = vst [vmem:[#allocation3] sm:$0xf] %v4227_v55  ;;  %v4249_v62 = vcombine.low %v4227_v55, %v4227_v55  ;;  %vm505_vm7 = vcmask 691816  }
  0xfe   : > { %v421_v57 = vpop.permute.xlu0 %420  ;;  %531 = vst [vmem:[#allocation3 + $0x8] sm:$0xf] %v4233_v56 }
  0xff   : > { %v428_v58 = vpop.permute.xlu1 %427  ;;  %424 = vst.msk [vmem:[#allocation2 + $0x8] sm:$0xf] %vm423_vm8, %v421_v57  ;;  %vm512_vm8 = vcmask 773816  }
 0x100   : > { %431 = vst.msk [vmem:[#allocation2 + $0x8] sm:$0xf] %vm430_vm9, %v428_v58  ;;  %682 = vrot.lane.b32.xlu1 %v4227_v55, %s5909_s14  ;;  %615 = vrot.lane.b32.xlu0 %v4227_v55, %s5863_s29  ;;  %vm519_vm9 = vcmask 855816   ;;  %v640_v58 = vld [vmem:[#allocation2 + $0x10] sm:$0xf] }
 0x102   : > { %v435_v59 = vpop.permute.xlu0 %434 }
 0x103   : > { %v456_v60 = vpop.permute.xlu1 %455  ;;  %438 = vst.msk [vmem:[#allocation2 + $0x8] sm:$0xf] %vm437_vm10, %v435_v59  ;;  %vm5924_vm10 = vcmask 441344  }
 0x104   : > { %v457_v61 = vrot.slane %v456_v60, 4  ;;  %749 = vrot.lane.b32.xlu1 %v4227_v55, %s5894_s12  ;;  %581 = vrot.lane.b32.xlu0 %v4233_v56, %s5912_s10  ;;  %1864 = vst.msk [vmem:[#allocation4 + $0x30] sm:$0xff] %vm5924_vm10, %v3960_v0 }
 0x106   : > { %v459_v63 = vsel %vm458_vm11, %v457_v61, %v456_v60  ;;  %v442_v1 = vpop.permute.xlu0 %441  ;;  %vm280_vm11 = vcmask 437248   ;;  %v3820_v61 = vld [vmem:[#allocation2 + $0x10] ss:$0 sps:$4 sm:$0xff]  }
 0x107   : > { %v449_v2 = vpop.permute.xlu1 %448  ;;  %445 = vst.msk [vmem:[#allocation2 + $0x8] sm:$0xf] %vm444_vm14, %v442_v1  ;;  %vm623_vm14 = vcmask 965632  }
 0x108   : > { %452 = vst.msk [vmem:[#allocation2 + $0x8] sm:$0xf] %vm451_vm15, %v449_v2  ;;  %646 = vrot.lane.b32.xlu1 %v4227_v55, %s5891_s17  ;;  %545 = vrot.lane.b32.xlu0 %v4249_v62, %s5865_s13  ;;  %s5867_s13 = smov 6   ;;  %vm5932_vm15 = vcmask 949248  }
 0x109   : > { %464 = vst.msk [vmem:[#allocation2 + $0x8] sm:$0xff] %vm463_vm1, %v459_v63  ;;  %vm5931_vm1 = vcmask 875520  }
 0x10a   : > { %v468_v3 = vpop.permute.xlu0 %467  ;;  %281 = vst.msk [vmem:[#allocation2 + $0x18] sm:$0xf] %vm280_vm11, %v3960_v0  ;;  %vm5896_vm11 = vcmask 146432  }
 0x10b   : > { %v475_v4 = vpop.permute.xlu1 %474  ;;  %471 = vst.msk [vmem:[#allocation2 + $0xc] sm:$0xf] %vm470_vm2, %v468_v3  ;;  %vm534_vm2 = vcmask 715776   ;;  %v707_v3 = vld [vmem:[#allocation2 + $0x10] sm:$0xf] }
 0x10c   : > { %478 = vst.msk [vmem:[#allocation2 + $0xc] sm:$0xf] %vm477_vm3, %v475_v4  ;;  %713 = vrot.lane.b32.xlu1 %v4227_v55, %s5869_s15  ;;  %613 = vrot.lane.b32.xlu0 %v4249_v62, %s5863_s29  ;;  %s5871_s29 = smov 16   ;;  %vm826_vm3 = vcmask 228352  }
 0x10d   : > { %535 = vst.msk [vmem:[#allocation3 + $0x20] sm:$0xf] %vm534_vm2, %v523_v38 }
 0x10e   : > { %v482_v5 = vpop.permute.xlu0 %481 }
 0x10f   : > { %v489_v6 = vpop.permute.xlu1 %488  ;;  %485 = vst.msk [vmem:[#allocation2 + $0xc] sm:$0xf] %vm484_vm4, %v482_v5  ;;  %vm5927_vm4 = vcmask 211968  }
 0x110   : > { %492 = vst.msk [vmem:[#allocation2 + $0xc] sm:$0xf] %vm491_vm5, %v489_v6  ;;  %816 = vrot.lane.b32.xlu1 %v4227_v55, %s5898_s19  ;;  %680 = vrot.lane.b32.xlu0 %v4249_v62, %s5909_s14  ;;  %v4333_v15 = vld [vmem:[#allocation2 + $0x4] sm:$0xff]  ;;  %vm5902_vm5 = vcmask 138240  }
 0x111   : > { %v4340_v16 = vcombine.high %v4333_v15, %v4333_v15  ;;  %v4369_v18 = vcombine.low %v4333_v15, %v4333_v15 }
 0x112   : > { %v496_v7 = vpop.permute.xlu0 %495 }
 0x113   : > { %v503_v8 = vpop.permute.xlu1 %502  ;;  %499 = vst.msk [vmem:[#allocation2 + $0xc] sm:$0xf] %vm498_vm6, %v496_v7  ;;  %vm5905_vm6 = vcmask 64512  }
 0x114   : > { %506 = vst.msk [vmem:[#allocation2 + $0xc] sm:$0xf] %vm505_vm7, %v503_v8  ;;  %889 = vrot.lane.b32.xlu1 %v4227_v55, %s5900_s20  ;;  %747 = vrot.lane.b32.xlu0 %v4249_v62, %s5894_s12  ;;  %vm656_vm7 = vcmask 957440   ;;  %v3821_v8 = vld [vmem:[#allocation2 + $0x10] ss:$0 sps:$4 sm:$0xff]  }
 0x116   : > { %v510_v9 = vpop.permute.xlu0 %509 }
 0x117   : > { %v517_v10 = vpop.permute.xlu1 %516  ;;  %513 = vst.msk [vmem:[#allocation2 + $0xc] sm:$0xf] %vm512_vm8, %v510_v9  ;;  %vm723_vm8 = vcmask 883712  }
 0x118   : > { %520 = vst.msk [vmem:[#allocation2 + $0xc] sm:$0xf] %vm519_vm9, %v517_v10  ;;  %780 = vrot.lane.b32.xlu1 %v4227_v55, %s5903_s11  ;;  %814 = vrot.lane.b32.xlu0 %v4249_v62, %s5898_s19  ;;  %vm5930_vm9 = vcmask 867328  }
 0x11c   : > { %851 = vrot.lane.b32.xlu1 %v4227_v55, %s5875_s9  ;;  %887 = vrot.lane.b32.xlu0 %v4249_v62, %s5900_s20 }
 0x11f   : > { %v4275_v11 = vld [vmem:[#allocation2 + $0x8] sm:$0xff] }
 0x120   : > { %532 = vst [vmem:[#allocation3 + $0x10] sm:$0xf] %v4275_v11  ;;  %963 = vrot.lane.b32.xlu1 %v4227_v55, %s5906_s26  ;;  %961 = vrot.lane.b32.xlu0 %v4249_v62, %s5906_s26  ;;  %v4284_v12 = vcombine.high %v4275_v11, %v4275_v11  ;;  %v4319_v13 = vld [vmem:[#allocation2 + $0xc] sm:$0xff]  ;;  %v678_v14 = vcombine.low %v4275_v11, %v4275_v11 }
 0x121   : > { %v4354_v17 = vcombine.low %v4319_v13, %v4319_v13 }
 0x122   : > { %533 = vst [vmem:[#allocation3 + $0x18] sm:$0xf] %v4284_v12 }
 0x124   : > { %1037 = vrot.lane.b32.xlu1 %v4227_v55, %s5877_s28  ;;  %1035 = vrot.lane.b32.xlu0 %v4249_v62, %s5877_s28 }
 0x128   : > { %924 = vrot.lane.b32.xlu1 %v4227_v55, %s5873_s16  ;;  %650 = vrot.lane.b32.xlu0 %v4275_v11, %s5891_s17 }
 0x12c   : > { %998 = vrot.lane.b32.xlu1 %v4227_v55, %s5871_s29  ;;  %717 = vrot.lane.b32.xlu0 %v4275_v11, %s5869_s15 }
 0x130   : > { %1111 = vrot.lane.b32.xlu1 %v4227_v55, %s5867_s13  ;;  %784 = vrot.lane.b32.xlu0 %v4275_v11, %s5903_s11  ;;  %s5879_s13 = smov 7  }
 0x134   : > { %648 = vrot.lane.b32.xlu1 %v4233_v56, %s5891_s17  ;;  %855 = vrot.lane.b32.xlu0 %v4275_v11, %s5875_s9 }
 0x138   : > { %715 = vrot.lane.b32.xlu1 %v4233_v56, %s5869_s15  ;;  %928 = vrot.lane.b32.xlu0 %v4275_v11, %s5873_s16  ;;  %s5883_s15 = smov 56  }
 0x13c   : > { %782 = vrot.lane.b32.xlu1 %v4233_v56, %s5903_s11  ;;  %1002 = vrot.lane.b32.xlu0 %v4275_v11, %s5871_s29 }
 0x140   : > { %853 = vrot.lane.b32.xlu1 %v4233_v56, %s5875_s9  ;;  %1076 = vrot.lane.b32.xlu0 %v4275_v11, %s5879_s13  ;;  %s5970_s9 = smov 118  }
 0x144   : > { %926 = vrot.lane.b32.xlu1 %v4233_v56, %s5873_s16  ;;  %1150 = vrot.lane.b32.xlu0 %v4319_v13, %s5883_s15  ;;  %s5969_s16 = smov 6  }
 0x148   : > { %1000 = vrot.lane.b32.xlu1 %v4233_v56, %s5871_s29  ;;  %684 = vrot.lane.b32.xlu0 %v678_v14, %s5909_s14  ;;  %s5968_s29 = smov 127  }
 0x14c   : > { %1074 = vrot.lane.b32.xlu1 %v4233_v56, %s5879_s13  ;;  %751 = vrot.lane.b32.xlu0 %v678_v14, %s5894_s12 }
 0x150   : > { %1185 = vrot.lane.b32.xlu1 %v4333_v15, %s5881_s18  ;;  %818 = vrot.lane.b32.xlu0 %v678_v14, %s5898_s19 }
 0x154   : > { %1148 = vrot.lane.b32.xlu1 %v4340_v16, %s5883_s15  ;;  %891 = vrot.lane.b32.xlu0 %v678_v14, %s5900_s20 }
 0x158   : > { %965 = vrot.lane.b32.xlu0 %v678_v14, %s5906_s26  ;;  %583 = vrot.lane.b32.xlu1 %v4275_v11, %s5912_s10 }
 0x15c   : > { %1039 = vrot.lane.b32.xlu0 %v678_v14, %s5877_s28  ;;  %549 = vrot.lane.b32.xlu1 %v678_v14, %s5968_s29  ;;  %s5885_s28 = smov 54  }
 0x160   : > { %1113 = vrot.lane.b32.xlu0 %v678_v14, %s5969_s16  ;;  %617 = vrot.lane.b32.xlu1 %v678_v14, %s5970_s9 }
 0x164   : > { %1187 = vrot.lane.b32.xlu0 %v4354_v17, %s5881_s18  ;;  %1072 = vrot.lane.b32.xlu1 %v4227_v55, %s5879_s13  ;;  %s5928_s13 = smov 46  }
 0x168   : > { %1109 = vrot.lane.b32.xlu0 %v4249_v62, %s5969_s16  ;;  %1146 = vrot.lane.b32.xlu1 %v4333_v15, %s5883_s15  ;;  %s5889_s15 = smov 44  }
 0x16c   : > { %1183 = vrot.lane.b32.xlu0 %v4369_v18, %s5881_s18  ;;  %1222 = vrot.lane.b32.xlu1 %v4340_v16, %s5885_s28  ;;  %s5887_s18 = smov 45  }
 0x16e   : > { %v580_v19 = vpop.permute.xlu1 %579  ;;  %v4375_v20 = vpop.permute.xlu0 %547 }
 0x170   : > { %1224 = vrot.lane.b32.xlu0 %v4319_v13, %s5885_s28  ;;  %1259 = vrot.lane.b32.xlu1 %v4333_v15, %s5928_s13 }
 0x172   : > { %v4381_v21 = vpop.permute.xlu1 %682  ;;  %v4383_v22 = vpop.permute.xlu0 %615 }
 0x174   : > { %1261 = vrot.lane.b32.xlu0 %v4354_v17, %s5928_s13  ;;  %1296 = vrot.lane.b32.xlu1 %v4340_v16, %s5887_s18 }
 0x176   : > { %v4389_v23 = vpop.permute.xlu1 %749  ;;  %v4391_v24 = vpop.permute.xlu0 %581 }
 0x177   : > { %v590_v25 = vsel %vm589_vm12, %v580_v19, %v4391_v24 }
 0x178   : > { %599 = vst [vmem:[#allocation3 + $0x28] sm:$0xf] %v590_v25  ;;  %1298 = vrot.lane.b32.xlu0 %v4319_v13, %s5887_s18  ;;  %1333 = vrot.lane.b32.xlu1 %v4333_v15, %s5889_s15 }
 0x17a   : > { %v4399_v26 = vpop.permute.xlu1 %646  ;;  %v546_v27 = vpop.permute.xlu0 %545 }
 0x17b   : > { %v556_v28 = vsel %vm5926_vm13, %v546_v27, %v4375_v20 }
 0x17c   : > { %565 = vst [vmem:[#allocation3] sm:$0xf0] %v556_v28  ;;  %1335 = vrot.lane.b32.xlu0 %v4354_v17, %s5889_s15  ;;  %1220 = vrot.lane.b32.xlu1 %v4333_v15, %s5885_s28  ;;  %s5922_s28 = smov 36  }
 0x17e   : > { %v4407_v29 = vpop.permute.xlu1 %713  ;;  %v614_v30 = vpop.permute.xlu0 %613 }
 0x17f   : > { %v624_v31 = vsel %vm623_vm14, %v614_v30, %v4383_v22 }
 0x180   : > { %633 = vst [vmem:[#allocation3 + $0x28] sm:$0xf0] %v624_v31  ;;  %1257 = vrot.lane.b32.xlu0 %v4369_v18, %s5928_s13  ;;  %1294 = vrot.lane.b32.xlu1 %v4333_v15, %s5887_s18  ;;  %s5919_s18 = smov 35  }
 0x182   : > { %v4415_v32 = vpop.permute.xlu1 %816  ;;  %v681_v33 = vpop.permute.xlu0 %680 }
 0x183   : > { %v691_v34 = vsel %vm5932_vm15, %v681_v33, %v4381_v21 }
 0x184   : > { %700 = vst [vmem:[#allocation3 + $0x50] sm:$0xf0] %v691_v34  ;;  %1331 = vrot.lane.b32.xlu0 %v4369_v18, %s5889_s15  ;;  %1370 = vrot.lane.b32.xlu1 %v4340_v16, %s5922_s28  ;;  %s5915_s15 = smov 34  }
 0x186   : > { %v4423_v35 = vpop.permute.xlu1 %889  ;;  %v748_v36 = vpop.permute.xlu0 %747 }
 0x187   : > { %v758_v37 = vsel %vm5931_vm1, %v748_v36, %v4389_v23 }
 0x188   : > { %767 = vst [vmem:[#allocation3 + $0x78] sm:$0xf0] %v758_v37  ;;  %1372 = vrot.lane.b32.xlu0 %v4319_v13, %s5922_s28  ;;  %1407 = vrot.lane.b32.xlu1 %v4333_v15, %s5919_s18 }
 0x18a   : > { %v4432_v39 = vpop.permute.xlu1 %780  ;;  %v815_v40 = vpop.permute.xlu0 %814 }
 0x18b   : > { %v827_v41 = vsel %vm826_vm3, %v815_v40, %v4415_v32 }
 0x18c   : > { %837 = vst [vmem:[#allocation3 + $0xa0] sm:$0xf0] %v827_v41  ;;  %1409 = vrot.lane.b32.xlu0 %v4354_v17, %s5919_s18  ;;  %1444 = vrot.lane.b32.xlu1 %v4340_v16, %s5915_s15  ;;  %v774_v16 = vld [vmem:[#allocation2 + $0x10] sm:$0xf]  ;;  %v4550_v41 = vcombine.high %v3960_v0, %v3960_v0 }
 0x18e   : > { %v4440_v42 = vpop.permute.xlu1 %851  ;;  %v888_v43 = vpop.permute.xlu0 %887 }
 0x18f   : > { %v900_v44 = vsel %vm5927_vm4, %v888_v43, %v4423_v35 }
 0x190   : > { %910 = vst [vmem:[#allocation3 + $0xc8] sm:$0xf0] %v900_v44  ;;  %1446 = vrot.lane.b32.xlu0 %v4319_v13, %s5915_s15  ;;  %551 = vrot.lane.b32.xlu1 %v4275_v11, %s5968_s29 }
 0x192   : > { %v4448_v46 = vpop.permute.xlu1 %963  ;;  %v962_v47 = vpop.permute.xlu0 %961 }
 0x193   : > { %v974_v48 = vsel %vm5902_vm5, %v962_v47, %v4448_v46 }
 0x194   : > { %984 = vst [vmem:[#allocation3 + $0xf0] sm:$0xf0] %v974_v48  ;;  %553 = vrot.lane.b32.xlu0 %v3818_v45, %s5968_s29  ;;  %585 = vrot.lane.b32.xlu1 %v4284_v12, %s5912_s10 }
 0x196   : > { %v4455_v50 = vpop.permute.xlu1 %1037  ;;  %v1036_v51 = vpop.permute.xlu0 %1035 }
 0x197   : > { %v1048_v52 = vsel %vm5905_vm6, %v1036_v51, %v4455_v50 }
 0x198   : > { %1058 = vst [vmem:[#allocation3 + $0x118] sm:$0xf0] %v1048_v52  ;;  %587 = vrot.lane.b32.xlu0 %v573_v49, %s5912_s10  ;;  %619 = vrot.lane.b32.xlu1 %v4275_v11, %s5970_s9  ;;  %s5978_s10 = smov 55  }
 0x19a   : > { %v925_v54 = vpop.permute.xlu1 %924  ;;  %v4462_v55 = vpop.permute.xlu0 %650 }
 0x19c   : > { %621 = vrot.lane.b32.xlu0 %v3819_v53, %s5970_s9  ;;  %1368 = vrot.lane.b32.xlu1 %v4333_v15, %s5922_s28  ;;  %s5981_s28 = smov 44  }
 0x19e   : > { %v999_v56 = vpop.permute.xlu1 %998  ;;  %v4467_v57 = vpop.permute.xlu0 %717 }
 0x1a0   : > { %1405 = vrot.lane.b32.xlu0 %v4369_v18, %s5919_s18  ;;  %1442 = vrot.lane.b32.xlu1 %v4333_v15, %s5915_s15  ;;  %s5979_s15 = smov 54   ;;  %s5980_s18 = smov 45  }
 0x1a2   : > { %v4473_v59 = vpop.permute.xlu1 %1111  ;;  %v4475_v60 = vpop.permute.xlu0 %784 }
 0x1a4   : > { %652 = vrot.lane.b32.xlu0 %v4284_v12, %s5891_s17  ;;  %654 = vrot.lane.b32.xlu1 %v640_v58, %s5891_s17  ;;  %s5971_s17 = smov 108  }
 0x1a6   : > { %v649_v62 = vpop.permute.xlu1 %648  ;;  %v4480_v63 = vpop.permute.xlu0 %855 }
 0x1a7   : > { %v657_v1 = vsel %vm656_vm7, %v4399_v26, %v649_v62  ;;  %v658_v2 = vsel %vm656_vm7, %v649_v62, %v4462_v55  ;;  %v4518_v26 = vcombine.low %v3960_v0, %v3960_v0 }
 0x1a8   : > { %666 = vst [vmem:[#allocation3 + $0x50] sm:$0xf] %v657_v1  ;;  %667 = vst [vmem:[#allocation3 + $0x58] sm:$0xf] %v658_v2  ;;  %686 = vrot.lane.b32.xlu0 %v4275_v11, %s5909_s14  ;;  %688 = vrot.lane.b32.xlu1 %v3820_v61, %s5909_s14  ;;  %s5977_s14 = smov 56  }
 0x1aa   : > { %v716_v4 = vpop.permute.xlu1 %715  ;;  %v4489_v5 = vpop.permute.xlu0 %928 }
 0x1ab   : > { %v724_v6 = vsel %vm723_vm8, %v4407_v29, %v716_v4  ;;  %v725_v7 = vsel %vm723_vm8, %v716_v4, %v4467_v57 }
 0x1ac   : > { %733 = vst [vmem:[#allocation3 + $0x78] sm:$0xf] %v724_v6  ;;  %734 = vst [vmem:[#allocation3 + $0x80] sm:$0xf] %v725_v7  ;;  %719 = vrot.lane.b32.xlu0 %v4284_v12, %s5971_s17  ;;  %721 = vrot.lane.b32.xlu1 %v707_v3, %s5971_s17  ;;  %v1476_v3 = vld [vmem:[#allocation3 + $0x28] sm:$0xff] }
 0x1ae   : > { %v783_v9 = vpop.permute.xlu1 %782  ;;  %v4498_v10 = vpop.permute.xlu0 %1002 }
 0x1af   : > { %v791_v14 = vsel %vm5930_vm9, %v4432_v39, %v783_v9  ;;  %v792_v15 = vsel %vm5930_vm9, %v783_v9, %v4475_v60 }
 0x1b0   : > { %800 = vst [vmem:[#allocation3 + $0xa0] sm:$0xf] %v791_v14  ;;  %801 = vst [vmem:[#allocation3 + $0xa8] sm:$0xf] %v792_v15  ;;  %753 = vrot.lane.b32.xlu0 %v4275_v11, %s5894_s12  ;;  %755 = vrot.lane.b32.xlu1 %v3821_v8, %s5894_s12  ;;  %s5972_s12 = smov 27   ;;  %v1471_v14 = vld [vmem:[#allocation3] sm:$0xff] }
 0x1b2   : > { %v854_v17 = vpop.permute.xlu1 %853  ;;  %v4507_v18 = vpop.permute.xlu0 %1076 }
 0x1b3   : > { %v863_v19 = vsel %vm5893_vm0, %v4440_v42, %v854_v17  ;;  %v864_v25 = vsel %vm5893_vm0, %v854_v17, %v4480_v63  ;;  %vm5897_vm0 = vcmask 130048  }
 0x1b4   : > { %873 = vst [vmem:[#allocation3 + $0xc8] sm:$0xf] %v863_v19  ;;  %874 = vst [vmem:[#allocation3 + $0xd0] sm:$0xf] %v864_v25  ;;  %786 = vrot.lane.b32.xlu0 %v4284_v12, %s5903_s11  ;;  %788 = vrot.lane.b32.xlu1 %v774_v16, %s5903_s11  ;;  %s5975_s11 = smov 8   ;;  %v3463_v16 = vpack.c.bf16 %v1476_v3, %v1471_v14  ;;  %v1486_v25 = vld [vmem:[#allocation3 + $0x78] sm:$0xff] }
 0x1b6   : > { %v927_v27 = vpop.permute.xlu1 %926  ;;  %v4520_v28 = vpop.permute.xlu0 %1150 }
 0x1b7   : > { %v937_v29 = vsel %vm5896_vm11, %v925_v54, %v927_v27  ;;  %v938_v30 = vsel %vm5896_vm11, %v927_v27, %v4489_v5  ;;  %vm5925_vm11 = vcmask 56320  }
 0x1b8   : > { %947 = vst [vmem:[#allocation3 + $0xf0] sm:$0xf] %v937_v29  ;;  %948 = vst [vmem:[#allocation3 + $0xf8] sm:$0xf] %v938_v30  ;;  %820 = vrot.lane.b32.xlu0 %v4275_v11, %s5898_s19  ;;  %822 = vrot.lane.b32.xlu1 %v4518_v26, %s5898_s19  ;;  %v1481_v30 = vld [vmem:[#allocation3 + $0x50] sm:$0xff] }
 0x1ba   : > { %v1001_v31 = vpop.permute.xlu1 %1000  ;;  %v4529_v33 = vpop.permute.xlu0 %684 }
 0x1bb   : > { %v1011_v34 = vsel %vm5897_vm0, %v999_v56, %v1001_v31  ;;  %v1012_v36 = vsel %vm5897_vm0, %v1001_v31, %v4498_v10  ;;  %v692_v37 = vsel %vm5932_vm15, %v4381_v21, %v4529_v33  ;;  %vm5911_vm0 = vcmask 457728   ;;  %v4616_v56 = vld [vmem:[#allocation2 + $0x10] sm:$0xff] }
 0x1bc   : > { %1021 = vst [vmem:[#allocation3 + $0x118] sm:$0xf] %v1011_v34  ;;  %1022 = vst [vmem:[#allocation3 + $0x120] sm:$0xf] %v1012_v36  ;;  %857 = vrot.lane.b32.xlu0 %v4284_v12, %s5972_s12  ;;  %859 = vrot.lane.b32.xlu1 %v3960_v0, %s5972_s12  ;;  %v3467_v34 = vpack.c.bf16 %v1486_v25, %v1481_v30 }
 0x1bd   : > { %701 = vst [vmem:[#allocation3 + $0x58] sm:$0xf0] %v692_v37 }
 0x1be   : > { %v1075_v38 = vpop.permute.xlu1 %1074  ;;  %v4541_v39 = vpop.permute.xlu0 %751 }
 0x1bf   : > { %v1086_v40 = vsel %vm5925_vm11, %v1075_v38, %v4507_v18  ;;  %v759_v21 = vsel %vm5931_vm1, %v4389_v23, %v4541_v39 }
 0x1c0   : > { %1096 = vst [vmem:[#allocation3 + $0x148] sm:$0xf] %v1086_v40  ;;  %768 = vst [vmem:[#allocation3 + $0x80] sm:$0xf0] %v759_v21  ;;  %893 = vrot.lane.b32.xlu0 %v4275_v11, %s5900_s20  ;;  %895 = vrot.lane.b32.xlu1 %v4518_v26, %s5900_s20  ;;  %v1496_v40 = vld [vmem:[#allocation3 + $0xc8] sm:$0xff] }
 0x1c2   : > { %v4556_v42 = vpop.permute.xlu1 %1185  ;;  %v4558_v43 = vpop.permute.xlu0 %818 }
 0x1c3   : > { %v828_v23 = vsel %vm826_vm3, %v4415_v32, %v4558_v43 }
 0x1c4   : > { %838 = vst [vmem:[#allocation3 + $0xa8] sm:$0xf0] %v828_v23  ;;  %824 = vrot.lane.b32.xlu0 %v3960_v0, %s5898_s19  ;;  %861 = vrot.lane.b32.xlu1 %v4550_v41, %s5972_s12  ;;  %s5973_s19 = smov 18  }
 0x1c6   : > { %v1149_v44 = vpop.permute.xlu1 %1148  ;;  %v4567_v45 = vpop.permute.xlu0 %891 }
 0x1c7   : > { %v1160_v47 = vsel %vm5911_vm0, %v1149_v44, %v4520_v28  ;;  %v901_v48 = vsel %vm5927_vm4, %v4423_v35, %v4567_v45  ;;  %v1487_v15 = vld [vmem:[#allocation3 + $0x80] sm:$0xff] }
 0x1c8   : > { %1170 = vst [vmem:[#allocation3 + $0x170] sm:$0xf] %v1160_v47  ;;  %911 = vst [vmem:[#allocation3 + $0xd0] sm:$0xf0] %v901_v48  ;;  %897 = vrot.lane.b32.xlu0 %v3960_v0, %s5900_s20  ;;  %930 = vrot.lane.b32.xlu1 %v4284_v12, %s5973_s19  ;;  %s5974_s20 = smov 16   ;;  %v4658_v47 = vcombine.high %v4319_v13, %v4319_v13 }
 0x1ca   : > { %v4578_v32 = vpop.permute.xlu0 %965  ;;  %v4580_v49 = vpop.permute.xlu1 %583 }
 0x1cb   : > { %v975_v51 = vsel %vm5902_vm5, %v4448_v46, %v4578_v32  ;;  %v591_v35 = vsel %vm589_vm12, %v4391_v24, %v4580_v49  ;;  %vm5914_vm5 = vcmask 48128  }
 0x1cc   : > { %985 = vst [vmem:[#allocation3 + $0xf8] sm:$0xf0] %v975_v51  ;;  %600 = vst [vmem:[#allocation3 + $0x30] sm:$0xf] %v591_v35  ;;  %932 = vrot.lane.b32.xlu0 %v3960_v0, %s5973_s19  ;;  %967 = vrot.lane.b32.xlu1 %v4275_v11, %s5906_s26 }
 0x1ce   : > { %v4592_v52 = vpop.permute.xlu0 %1039  ;;  %v4594_v53 = vpop.permute.xlu1 %549 }
 0x1cf   : > { %v1049_v46 = vsel %vm5905_vm6, %v4455_v50, %v4592_v52  ;;  %v557_v24 = vsel %vm5926_vm13, %v4375_v20, %v4594_v53  ;;  %vm5908_vm6 = vcmask 449536   ;;  %v1497_v31 = vld [vmem:[#allocation3 + $0xd0] sm:$0xff] }
 0x1d0   : > { %1059 = vst [vmem:[#allocation3 + $0x120] sm:$0xf0] %v1049_v46  ;;  %566 = vst [vmem:[#allocation3 + $0x8] sm:$0xf0] %v557_v24  ;;  %969 = vrot.lane.b32.xlu0 %v4518_v26, %s5906_s26  ;;  %1004 = vrot.lane.b32.xlu1 %v4284_v12, %s5974_s20  ;;  %v1506_v46 = vld [vmem:[#allocation3 + $0x118] sm:$0xff] }
 0x1d2   : > { %v4606_v0 = vpop.permute.xlu0 %1113  ;;  %v4608_v54 = vpop.permute.xlu1 %617 }
 0x1d3   : > { %v1123_v50 = vsel %vm5914_vm5, %v4473_v59, %v4606_v0  ;;  %v625_v20 = vsel %vm623_vm14, %v4383_v22, %v4608_v54  ;;  %v1502_v35 = vld [vmem:[#allocation3 + $0xf8] sm:$0xff] }
 0x1d4   : > { %1133 = vst [vmem:[#allocation3 + $0x148] sm:$0xf0] %v1123_v50  ;;  %634 = vst [vmem:[#allocation3 + $0x30] sm:$0xf0] %v625_v20  ;;  %1006 = vrot.lane.b32.xlu0 %v4616_v56, %s5974_s20  ;;  %1041 = vrot.lane.b32.xlu1 %v4275_v11, %s5975_s11 }
 0x1d6   : > { %v4622_v58 = vpop.permute.xlu0 %1187  ;;  %v1073_v61 = vpop.permute.xlu1 %1072 }
 0x1d7   : > { %v1197_v62 = vsel %vm5908_vm6, %v4556_v42, %v4622_v58  ;;  %v1085_v22 = vsel %vm5925_vm11, %v1073_v61, %v1075_v38  ;;  %v1472_v7 = vld [vmem:[#allocation3 + $0x8] sm:$0xff]  ;;  %v1507_v23 = vld [vmem:[#allocation3 + $0x120] sm:$0xff]  ;;  %vm1550_vm11 = vcmask 1043456  }
 0x1d8   : > { %1207 = vst [vmem:[#allocation3 + $0x170] sm:$0xf0] %v1197_v62  ;;  %1095 = vst [vmem:[#allocation3 + $0x140] sm:$0xf] %v1085_v22  ;;  %1043 = vrot.lane.b32.xlu0 %v4518_v26, %s5975_s11  ;;  %934 = vrot.lane.b32.xlu1 %v4550_v41, %s5973_s19  ;;  %v1492_v38 = vld [vmem:[#allocation3 + $0xa8] sm:$0xff]  ;;  %v3473_v50 = vpack.c.bf16 %v1507_v23, %v1502_v35  ;;  %v4668_v62 = vld [vmem:[#allocation2 + $0x14] sm:$0xff] }
 0x1da   : > { %v1110_v1 = vpop.permute.xlu0 %1109  ;;  %v1147_v2 = vpop.permute.xlu1 %1146 }
 0x1db   : > { %v1122_v4 = vsel %vm5914_vm5, %v1110_v1, %v4473_v59  ;;  %v1159_v6 = vsel %vm5911_vm0, %v1147_v2, %v1149_v44  ;;  %v1477_v8 = vld [vmem:[#allocation3 + $0x30] sm:$0xff]  ;;  %v1482_v59 = vld [vmem:[#allocation3 + $0x58] sm:$0xff]  ;;  %vm5917_vm0 = vcmask 367616   ;;  %v1512_v2 = vld [vmem:[#allocation3 + $0x148] sm:$0xff]  ;;  %vm5918_vm5 = vcmask 359424  }
 0x1dc   : > { %1132 = vst [vmem:[#allocation3 + $0x140] sm:$0xf0] %v1122_v4  ;;  %1169 = vst [vmem:[#allocation3 + $0x168] sm:$0xf] %v1159_v6  ;;  %971 = vrot.lane.b32.xlu0 %v4616_v56, %s5906_s26  ;;  %1008 = vrot.lane.b32.xlu1 %v4550_v41, %s5974_s20  ;;  %v3461_v9 = vpack.c.bf16 %v1477_v8, %v1472_v7  ;;  %v3465_v29 = vpack.c.bf16 %v1487_v15, %v1482_v59  ;;  %s5976_s26 = smov 7  }
 0x1dd   : > { %v4680_v7 = vcombine.low %v4668_v62, %v4668_v62 }
 0x1de   : > { %v1184_v17 = vpop.permute.xlu0 %1183  ;;  %3462 = vmatprep.subr.bf16.mxu0 %v3461_v9  ;;  %v4639_v19 = vpop.permute.xlu1 %1222 }
 0x1df   : > { %v1196_v27 = vsel %vm5908_vm6, %v1184_v17, %v4556_v42  ;;  %3464 = vmatpush1.bf16.msra.mxu0 %v3463_v16  ;;  %v3469_v42 = vpack.c.bf16 %v1497_v31, %v1492_v38  ;;  %vm5921_vm6 = vcmask 375808   ;;  %v1517_v20 = vld [vmem:[#allocation3 + $0x170] sm:$0xff]  ;;  %v4690_v17 = vcombine.high %v4668_v62, %v4668_v62 }
 0x1e0   : > { %1206 = vst [vmem:[#allocation3 + $0x168] sm:$0xf0] %v1196_v27  ;;  %1045 = vrot.lane.b32.xlu0 %v4616_v56, %s5975_s11  ;;  %1078 = vrot.lane.b32.xlu1 %v4284_v12, %s5976_s26  ;;  %v1491_v12 = vld [vmem:[#allocation3 + $0xa0] sm:$0xff] }
 0x1e1   : > { %3466 = vmatprep.subr.bf16.mxu0 %v3465_v29  ;;  %v3471_v44 = vpack.c.bf16 %v1496_v40, %v1491_v12 }
 0x1e2   : > { %v4647_v36 = vpop.permute.xlu0 %1224  ;;  %v1260_v37 = vpop.permute.xlu1 %1259 }
 0x1e3   : > { %v1234_v21 = vsel %vm5924_vm10, %v4639_v19, %v4647_v36  ;;  %3468 = vmatpush1.bf16.msra.mxu0 %v3467_v34  ;;  %v1511_v6 = vld [vmem:[#allocation3 + $0x140] sm:$0xff] }
 0x1e4   : > { %1244 = vst [vmem:[#allocation3 + $0x198] sm:$0xf] %v1234_v21  ;;  %1080 = vrot.lane.b32.xlu0 %v4616_v56, %s5976_s26  ;;  %1115 = vrot.lane.b32.xlu1 %v4275_v11, %s5969_s16  ;;  %v1501_v11 = vld [vmem:[#allocation3 + $0xf0] sm:$0xff] }
 0x1e5   : > { %3470 = vmatprep.subr.bf16.mxu0 %v3469_v42  ;;  %v3475_v61 = vpack.c.bf16 %v1506_v46, %v1501_v11 }
 0x1e6   : > { %v4660_v48 = vpop.permute.xlu0 %1261  ;;  %v1297_v51 = vpop.permute.xlu1 %1296 }
 0x1e7   : > { %v1271_v24 = vsel %vm5921_vm6, %v1260_v37, %v4660_v48  ;;  %3472 = vmatpush1.bf16.msra.mxu0 %v3471_v44  ;;  %v1516_v3 = vld [vmem:[#allocation3 + $0x168] sm:$0xff] }
 0x1e8   : > { %1281 = vst [vmem:[#allocation3 + $0x198] sm:$0xf0] %v1271_v24  ;;  %1117 = vrot.lane.b32.xlu0 %v4518_v26, %s5969_s16  ;;  %1152 = vrot.lane.b32.xlu1 %v4658_v47, %s5977_s14  ;;  %v3477_v26 = vpack.c.bf16 %v1517_v20, %v1512_v2  ;;  %v3479_v8 = vpack.c.bf16 %v1516_v3, %v1511_v6 }
 0x1e9   : > { %3474 = vmatprep.subr.bf16.mxu0 %v3473_v50 }
 0x1ea   : > { %v4670_v22 = vpop.permute.xlu0 %1298  ;;  %v1334_v1 = vpop.permute.xlu1 %1333 }
 0x1eb   : > { %v1308_v4 = vsel %vm5917_vm0, %v1297_v51, %v4670_v22  ;;  %3476 = vmatpush1.bf16.msra.mxu0 %v3475_v61 }
 0x1ec   : > { %1318 = vst [vmem:[#allocation3 + $0x1c0] sm:$0xf] %v1308_v4  ;;  %1154 = vrot.lane.b32.xlu0 %v4668_v62, %s5977_s14  ;;  %1189 = vrot.lane.b32.xlu1 %v4319_v13, %s5978_s10 }
 0x1ed   : > { %3478 = vmatprep.subr.bf16.mxu0 %v3477_v26 }
 0x1ee   : > { %v4682_v9 = vpop.permute.xlu0 %1335  ;;  %v1221_v14 = vpop.permute.xlu1 %1220 }
 0x1ef   : > { %v1345_v15 = vsel %vm5918_vm5, %v1334_v1, %v4682_v9  ;;  %v1233_v16 = vsel %vm5924_vm10, %v1221_v14, %v4639_v19  ;;  %3480 = vmatpush1.bf16.msra.mxu0 %v3479_v8  ;;  %vm569_vm10 = vcmask 719876   ;;  %v276_v8 = vld [vmem:[%s6026_s5] sm:$0x1f]  ;;  %s6033_s5 = smov 116  }
 0x1f0   : > { %1355 = vst [vmem:[#allocation3 + $0x1c0] sm:$0xf0] %v1345_v15  ;;  %1243 = vst [vmem:[#allocation3 + $0x190] sm:$0xf] %v1233_v16  ;;  %1191 = vrot.lane.b32.xlu0 %v4680_v7, %s5978_s10  ;;  %1082 = vrot.lane.b32.xlu1 %v4550_v41, %s5976_s26  ;;  %v1522_v41 = vld [vmem:[#allocation3 + $0x198] sm:$0xff] }
 0x1f2   : > { %v1258_v59 = vpop.permute.xlu0 %1257  ;;  %v1295_v25 = vpop.permute.xlu1 %1294 }
 0x1f3   : > { %v1270_v27 = vsel %vm5921_vm6, %v1258_v59, %v1260_v37  ;;  %v1307_v29 = vsel %vm5917_vm0, %v1295_v25, %v1297_v51  ;;  %vm1380_vm0 = vcmask 293888   ;;  %vm1454_vm6 = vcmask 277504  }
 0x1f4   : > { %1280 = vst [vmem:[#allocation3 + $0x190] sm:$0xf0] %v1270_v27  ;;  %1317 = vst [vmem:[#allocation3 + $0x1b8] sm:$0xf] %v1307_v29  ;;  %1119 = vrot.lane.b32.xlu0 %v4616_v56, %s5969_s16  ;;  %1156 = vrot.lane.b32.xlu1 %v4690_v17, %s5977_s14 }
 0x1f6   : > { %v1332_v19 = vpop.permute.xlu0 %1331  ;;  %v4702_v30 = vpop.permute.xlu1 %1370 }
 0x1f7   : > { %v1344_v31 = vsel %vm5918_vm5, %v1332_v19, %v1334_v1  ;;  %v1527_v34 = vld [vmem:[#allocation3 + $0x1c0] sm:$0xff]  ;;  %vm1417_vm5 = vcmask 285696  }
 0x1f8   : > { %1354 = vst [vmem:[#allocation3 + $0x1b8] sm:$0xf0] %v1344_v31  ;;  %1193 = vrot.lane.b32.xlu0 %v4668_v62, %s5978_s10  ;;  %1226 = vrot.lane.b32.xlu1 %v4658_v47, %s5979_s15  ;;  %v3481_v37 = vpack.c.bf16 %v1527_v34, %v1522_v41 }
 0x1fa   : > { %v4709_v38 = vpop.permute.xlu0 %1372  ;;  %3482 = vmatprep.subr.bf16.mxu0 %v3481_v37  ;;  %v4711_v40 = vpop.permute.xlu1 %1407 }
 0x1fb   : > { %v1382_v21 = vsel %vm1380_vm0, %v4702_v30, %v4709_v38  ;;  %v1521_v44 = vld [vmem:[#allocation3 + $0x190] sm:$0xff] }
 0x1fc   : > { %1392 = vst [vmem:[#allocation3 + $0x1e8] sm:$0xf] %v1382_v21  ;;  %1228 = vrot.lane.b32.xlu0 %v4668_v62, %s5979_s15  ;;  %1263 = vrot.lane.b32.xlu1 %v4319_v13, %s5928_s13 }
 0x1fe   : > { %v4720_v42 = vpop.permute.xlu0 %1409  ;;  %v1445_v12 = vpop.permute.xlu1 %1444 }
 0x1ff   : > { %v1419_v23 = vsel %vm1417_vm5, %v4711_v40, %v4720_v42  ;;  %v1526_v51 = vld [vmem:[#allocation3 + $0x1b8] sm:$0xff] }
 0x200   : > { %1429 = vst [vmem:[#allocation3 + $0x1e8] sm:$0xf0] %v1419_v23  ;;  %1265 = vrot.lane.b32.xlu0 %v4680_v7, %s5928_s13  ;;  %1300 = vrot.lane.b32.xlu1 %v4658_v47, %s5980_s18  ;;  %v3483_v35 = vpack.c.bf16 %v1526_v51, %v1521_v44 }
 0x202   : > { %v4729_v46 = vpop.permute.xlu0 %1446  ;;  %3484 = vmatpush1.bf16.msra.mxu0 %v3483_v35  ;;  %v552_v24 = vpop.permute.xlu1 %551 }
 0x203   : > { %v1456_v50 = vsel %vm1454_vm6, %v1445_v12, %v4729_v46  ;;  %v558_v11 = vsel %vm5926_vm13, %v4594_v53, %v552_v24 }
 0x204   : > { %1466 = vst [vmem:[#allocation3 + $0x210] sm:$0xf] %v1456_v50  ;;  %567 = vst [vmem:[#allocation3 + $0x10] sm:$0xf0] %v558_v11  ;;  %1302 = vrot.lane.b32.xlu0 %v4668_v62, %s5980_s18  ;;  %1337 = vrot.lane.b32.xlu1 %v4319_v13, %s5981_s28 }
 0x206   : > { %v554_v20 = vpop.permute.xlu0 %553  ;;  %v586_v61 = vpop.permute.xlu1 %585 }
 0x207   : > { %v559_v1 = vsel %vm5926_vm13, %v552_v24, %v554_v20  ;;  %570 = vst.msk [vmem:[#allocation3 + $0x20] sm:$0xf0] %vm569_vm10, %v554_v20  ;;  %v592_v2 = vsel %vm589_vm12, %v4580_v49, %v586_v61  ;;  %v1532_v6 = vld [vmem:[#allocation3 + $0x1e8] sm:$0xff]  ;;  %vm4016_vm13 = vmmov 1   ;;  %v4794_v20 = vld [vmem:[#allocation6] sm:$0xff] }
 0x208   : > { %568 = vst [vmem:[#allocation3 + $0x18] sm:$0xf0] %v559_v1  ;;  %601 = vst [vmem:[#allocation3 + $0x38] sm:$0xf] %v592_v2  ;;  %1339 = vrot.lane.b32.xlu0 %v4680_v7, %s5981_s28  ;;  %1230 = vrot.lane.b32.xlu1 %v4690_v17, %s5979_s15  ;;  %v5939_v2 = vmov 0.0|0.0  }
 0x209   : > { %vm4751_vm4 = vmpackc.low %vm1550_vm11, %vm4016_vm13  ;;  %vm4018_vm13 = vmmov 0   ;;  %vm5988_vm11 = vcmask 220160  }
 0x20a   : > { %v588_v53 = vpop.permute.xlu0 %587  ;;  %v620_v3 = vpop.permute.xlu1 %619 }
 0x20b   : > { %v593_v4 = vsel %vm589_vm12, %v586_v61, %v588_v53  ;;  %603 = vst.msk [vmem:[#allocation3 + $0x48] sm:$0xf] %vm534_vm2, %v588_v53  ;;  %v626_v26 = vsel %vm623_vm14, %v4608_v54, %v620_v3  ;;  %v1537_v49 = vld [vmem:[#allocation3 + $0x210] sm:$0xf] }
 0x20c   : > { %602 = vst [vmem:[#allocation3 + $0x40] sm:$0xf] %v593_v4  ;;  %635 = vst [vmem:[#allocation3 + $0x38] sm:$0xf0] %v626_v26  ;;  %1267 = vrot.lane.b32.xlu0 %v4668_v62, %s5928_s13  ;;  %1304 = vrot.lane.b32.xlu1 %v4690_v17, %s5980_s18  ;;  %v3485_v14 = vpack.c.bf16 %v1537_v49, %v1532_v6  ;;  %s5984_s13 = smov 36  }
 0x20e   : > { %v622_v15 = vpop.permute.xlu0 %621  ;;  %3487 = vmatprep.subr.msk.bf16.mxu0 %vm4751_vm4, %v3485_v14  ;;  %v1369_v54 = vpop.permute.xlu1 %1368  ;;  %v1475_v53 = vld [vmem:[#allocation3 + $0x20] sm:$0xff] }
 0x20f   : > { %v627_v16 = vsel %vm623_vm14, %v620_v3, %v622_v15  ;;  %637 = vst.msk [vmem:[#allocation3 + $0x48] sm:$0xf0] %vm569_vm10, %v622_v15  ;;  %v1381_v59 = vsel %vm1380_vm0, %v1369_v54, %v4702_v30 }
 0x210   : > { %636 = vst [vmem:[#allocation3 + $0x40] sm:$0xf0] %v627_v16  ;;  %1391 = vst [vmem:[#allocation3 + $0x1e0] sm:$0xf] %v1381_v59  ;;  %1341 = vrot.lane.b32.xlu0 %v4668_v62, %s5981_s28  ;;  %1374 = vrot.lane.b32.xlu1 %v4658_v47, %s5984_s13 }
 0x212   : > { %v1406_v25 = vpop.permute.xlu0 %1405  ;;  %v1443_v27 = vpop.permute.xlu1 %1442 }
 0x213   : > { %v1418_v29 = vsel %vm1417_vm5, %v1406_v25, %v4711_v40  ;;  %v1455_v19 = vsel %vm1454_vm6, %v1443_v27, %v1445_v12  ;;  %v1478_v41 = vld [vmem:[#allocation3 + $0x38] sm:$0xff]  ;;  %v1473_v12 = vld [vmem:[#allocation3 + $0x10] sm:$0xff] }
 0x214   : > { %1428 = vst [vmem:[#allocation3 + $0x1e0] sm:$0xf0] %v1418_v29  ;;  %1465 = vst [vmem:[#allocation3 + $0x208] sm:$0xf] %v1455_v19  ;;  %1376 = vrot.lane.b32.xlu0 %v4668_v62, %s5984_s13  ;;  %1411 = vrot.lane.b32.xlu1 %v4319_v13, %s5985_s0  ;;  %v1474_v40 = vld [vmem:[#allocation3 + $0x18] sm:$0xff]  ;;  %v3493_v23 = vpack.c.bf16 %v1478_v41, %v1473_v12 }
 0x216   : > { %v653_v30 = vpop.permute.xlu0 %652  ;;  %v655_v31 = vpop.permute.xlu1 %654 }
 0x217   : > { %v659_v34 = vsel %vm656_vm7, %v4462_v55, %v653_v30  ;;  %v660_v37 = vsel %vm656_vm7, %v653_v30, %v655_v31  ;;  %670 = vst.msk [vmem:[#allocation3 + $0x70] sm:$0xf] %vm534_vm2, %v655_v31  ;;  %v1479_v21 = vld [vmem:[#allocation3 + $0x40] sm:$0xff] }
 0x218   : > { %668 = vst [vmem:[#allocation3 + $0x60] sm:$0xf] %v659_v34  ;;  %669 = vst [vmem:[#allocation3 + $0x68] sm:$0xf] %v660_v37  ;;  %1413 = vrot.lane.b32.xlu0 %v4680_v7, %s5985_s0  ;;  %1448 = vrot.lane.b32.xlu1 %v4658_v47, %s5986_s1  ;;  %v3491_v13 = vpack.c.bf16 %v1479_v21, %v1474_v40  ;;  %v1480_v7 = vld [vmem:[#allocation3 + $0x48] sm:$0xff] }
 0x219   : > { %v3522_v3 = vpack.c.bf16 %v1480_v7, %v1475_v53 }
 0x21a   : > { %v687_v44 = vpop.permute.xlu0 %686  ;;  %v689_v51 = vpop.permute.xlu1 %688  ;;  %3492 = vmatprep.subr.bf16.mxu1 %v3491_v13 }
 0x21b   : > { %v693_v55 = vsel %vm5932_vm15, %v4529_v33, %v687_v44  ;;  %v694_v35 = vsel %vm5932_vm15, %v687_v44, %v689_v51  ;;  %704 = vst.msk [vmem:[#allocation3 + $0x70] sm:$0xf0] %vm569_vm10, %v689_v51  ;;  %3494 = vmatpush1.bf16.msra.mxu1 %v3493_v23  ;;  %v1531_v24 = vld [vmem:[#allocation3 + $0x1e0] sm:$0xff]  ;;  %v1536_v50 = vld [vmem:[#allocation3 + $0x208] sm:$0xf]  ;;  %vm5992_vm15 = vmmov %vm5988_vm11 }
 0x21c   : > { %702 = vst [vmem:[#allocation3 + $0x60] sm:$0xf0] %v693_v55  ;;  %703 = vst [vmem:[#allocation3 + $0x68] sm:$0xf0] %v694_v35  ;;  %1450 = vrot.lane.b32.xlu0 %v4668_v62, %s5986_s1  ;;  %1378 = vrot.lane.b32.xlu1 %v4690_v17, %s5984_s13  ;;  %v3488_v47 = vpack.c.bf16 %v1536_v50, %v1531_v24 }
 0x21e   : > { %v720_v11 = vpop.permute.xlu0 %719  ;;  %3490 = vmatpush1.bf16.msk.msra.mxu0 %vm4751_vm4, %v3488_v47  ;;  %v722_v33 = vpop.permute.xlu1 %721 }
 0x21f   : > { %v726_v61 = vsel %vm723_vm8, %v4467_v57, %v720_v11  ;;  %v727_v1 = vsel %vm723_vm8, %v720_v11, %v722_v33  ;;  %737 = vst.msk [vmem:[#allocation3 + $0x98] sm:$0xf] %vm534_vm2, %v722_v33  ;;  %3521 = vmatprep.subr.bf16.mxu0 %v5939_v2  ;;  %v1541_v57 = vld [vmem:[%s5987_s2] sm:$0xff]  ;;  %s6032_s2 = smov 117  }
 0x220   : > { %735 = vst [vmem:[#allocation3 + $0x88] sm:$0xf] %v726_v61  ;;  %736 = vst [vmem:[#allocation3 + $0x90] sm:$0xf] %v727_v1  ;;  %1415 = vrot.lane.b32.xlu0 %v4668_v62, %s5985_s0  ;;  %1452 = vrot.lane.b32.xlu1 %v4690_v17, %s5986_s1  ;;  %v4019_v17 = vmov 0  }
 0x221   : > { %3402 = vmatmul.mubr.msk.f32.vlgmr.msra.gmra.mrb[0].mxu0 %vm723_vm8, %v4794_v20  ;;  %3808 = vset.pattern.permute.xlu0 %v4019_v17 }
 0x222   : > { %v754_v4 = vpop.permute.xlu0 %753  ;;  %3523 = vmatpush3.bf16.msra.mxu0 %v3522_v3  ;;  %v756_v26 = vpop.permute.xlu1 %755  ;;  %3458 = vmatprep.mubr.msk.f32.mxu0 %vm4018_vm13, %v4616_v56  ;;  %v1485_v16 = vld [vmem:[#allocation3 + $0x70] sm:$0xff]  ;;  %vm5989_vm13 = vmmov %vm5988_vm11 }
 0x223   : > { %v760_v62 = vsel %vm5931_vm1, %v4541_v39, %v754_v4  ;;  %v761_v6 = vsel %vm5931_vm1, %v754_v4, %v756_v26  ;;  %771 = vst.msk [vmem:[#allocation3 + $0x98] sm:$0xf0] %vm569_vm10, %v756_v26  ;;  %3524 = vmatprep.subr.bf16.mxu0 %v5939_v2  ;;  %3809 = vset.pattern.permute.xlu1 %v4019_v17  ;;  %v1484_v25 = vld [vmem:[#allocation3 + $0x68] sm:$0xff]  ;;  %v1483_v31 = vld [vmem:[#allocation3 + $0x60] sm:$0xff] }
 0x224   : > { %769 = vst [vmem:[#allocation3 + $0x88] sm:$0xf0] %v760_v62  ;;  %770 = vst [vmem:[#allocation3 + $0x90] sm:$0xf0] %v761_v6  ;;  %1544 = vperm.xlu0 %3808, %v1541_v57  }
 0x226   : > { %v787_v49 = vpop.permute.xlu0 %786  ;;  %v789_v14 = vpop.permute.xlu1 %788 }
 0x227   : > { %v793_v56 = vsel %vm5930_vm9, %v4475_v60, %v787_v49  ;;  %v794_v15 = vsel %vm5930_vm9, %v787_v49, %v789_v14  ;;  %804 = vst.msk [vmem:[#allocation3 + $0xc0] sm:$0xf] %vm534_vm2, %v789_v14  ;;  %vm5990_vm9 = vcmask 211968  }
 0x228   : > { %802 = vst [vmem:[#allocation3 + $0xb0] sm:$0xf] %v793_v56  ;;  %803 = vst [vmem:[#allocation3 + $0xb8] sm:$0xf] %v794_v15 }
 0x229   : > { %vm5991_vm1 = vmmov %vm5990_vm9 }
 0x22a   : > { %v821_v39 = vpop.permute.xlu0 %820  ;;  %v823_v54 = vpop.permute.xlu1 %822  ;;  %v1490_v59 = vld [vmem:[#allocation3 + $0x98] sm:$0xff] }
 0x22b   : > { %v829_v27 = vsel %vm826_vm3, %v4558_v43, %v821_v39  ;;  %v830_v29 = vsel %vm826_vm3, %v821_v39, %v823_v54  ;;  %v3525_v19 = vpack.c.bf16 %v1490_v59, %v1485_v16  ;;  %v1489_v30 = vld [vmem:[#allocation3 + $0x90] sm:$0xff]  ;;  %v1488_v60 = vld [vmem:[#allocation3 + $0x88] sm:$0xff] }
 0x22c   : > { %839 = vst [vmem:[#allocation3 + $0xb0] sm:$0xf0] %v829_v27  ;;  %840 = vst [vmem:[#allocation3 + $0xb8] sm:$0xf0] %v830_v29  ;;  %v3495_v41 = vpack.c.bf16 %v1489_v30, %v1484_v25  ;;  %v3497_v34 = vpack.c.bf16 %v1488_v60, %v1483_v31 }
 0x22d   : > { %3526 = vmatpush3.bf16.msra.mxu0 %v3525_v19 }
 0x22e   : > { %v858_v37 = vpop.permute.xlu0 %857  ;;  %v860_v40 = vpop.permute.xlu1 %859  ;;  %3496 = vmatprep.subr.bf16.mxu1 %v3495_v41  ;;  %3527 = vmatprep.subr.bf16.mxu0 %v5939_v2 }
 0x22f   : > { %v865_v21 = vsel %vm5988_vm11, %v4480_v63, %v858_v37  ;;  %v866_v43 = vsel %vm5989_vm13, %v858_v37, %v860_v40  ;;  %3498 = vmatpush1.bf16.msra.mxu1 %v3497_v34  ;;  %vm5993_vm11 = vmmov %vm5991_vm1 }
 0x230   : > { %875 = vst [vmem:[#allocation3 + $0xd8] sm:$0xf] %v865_v21  ;;  %876 = vst [vmem:[#allocation3 + $0xe0] sm:$0xf] %v866_v43 }
 0x232   : > { %v894_v13 = vpop.permute.xlu0 %893  ;;  %v896_v12 = vpop.permute.xlu1 %895 }
 0x233   : > { %v902_v23 = vsel %vm5990_vm9, %v4567_v45, %v894_v13  ;;  %v903_v44 = vsel %vm5991_vm1, %v894_v13, %v896_v12  ;;  %v1494_v47 = vld [vmem:[#allocation3 + $0xb8] sm:$0xff]  ;;  %vm5994_vm9 = vcmask 146432   ;;  %v1493_v33 = vld [vmem:[#allocation3 + $0xb0] sm:$0xff]  ;;  %vm5996_vm1 = vcmask 138240  }
 0x234   : > { %912 = vst [vmem:[#allocation3 + $0xd8] sm:$0xf0] %v902_v23  ;;  %913 = vst [vmem:[#allocation3 + $0xe0] sm:$0xf0] %v903_v44 }
 0x235   : > { %vm5997_vm13 = vmmov %vm5996_vm1 }
 0x236   : > { %v825_v51 = vpop.permute.xlu0 %824  ;;  %v862_v55 = vpop.permute.xlu1 %861 }
 0x237   : > { %v831_v35 = vsel %vm826_vm3, %v823_v54, %v825_v51  ;;  %v867_v63 = vsel %vm5992_vm15, %v860_v40, %v862_v55  ;;  %vm5995_vm15 = vmmov %vm5994_vm9 }
 0x238   : > { %841 = vst.msk [vmem:[#allocation3 + $0xc0] sm:$0xf0] %vm569_vm10, %v831_v35 }
 0x239   : > { %877 = vst.msk [vmem:[#allocation3 + $0xe8] sm:$0xf] %vm534_vm2, %v867_v63 }
 0x23a   : > { %v898_v24 = vpop.permute.xlu0 %897  ;;  %v931_v50 = vpop.permute.xlu1 %930 }
 0x23b   : > { %v904_v7 = vsel %vm5993_vm11, %v896_v12, %v898_v24  ;;  %v939_v45 = vsel %vm5994_vm9, %v4489_v5, %v931_v50  ;;  %v1499_v11 = vld [vmem:[#allocation3 + $0xe0] sm:$0xff]  ;;  %v1498_v61 = vld [vmem:[#allocation3 + $0xd8] sm:$0xff]  ;;  %vm5998_vm11 = vcmask 130048  }
 0x23c   : > { %914 = vst.msk [vmem:[#allocation3 + $0xe8] sm:$0xf0] %vm569_vm10, %v904_v7  ;;  %949 = vst [vmem:[#allocation3 + $0x100] sm:$0xf] %v939_v45  ;;  %v3499_v1 = vpack.c.bf16 %v1499_v11, %v1494_v47  ;;  %v3501_v53 = vpack.c.bf16 %v1498_v61, %v1493_v33 }
 0x23d   : > { %vm5999_vm9 = vmmov %vm5998_vm11 }
 0x23e   : > { %v933_v3 = vpop.permute.xlu0 %932  ;;  %v968_v57 = vpop.permute.xlu1 %967  ;;  %3500 = vmatprep.subr.bf16.mxu1 %v3499_v1 }
 0x23f   : > { %v940_v4 = vsel %vm5995_vm15, %v931_v50, %v933_v3  ;;  %v976_v26 = vsel %vm5996_vm1, %v4578_v32, %v968_v57  ;;  %3502 = vmatpush1.bf16.msra.mxu1 %v3501_v53  ;;  %v1495_v49 = vld [vmem:[#allocation3 + $0xc0] sm:$0xff]  ;;  %vm6000_vm15 = vcmask 64512  }
 0x240   : > { %950 = vst [vmem:[#allocation3 + $0x108] sm:$0xf] %v940_v4  ;;  %986 = vst [vmem:[#allocation3 + $0x100] sm:$0xf0] %v976_v26 }
 0x241   : > { %vm6001_vm1 = vmmov %vm6000_vm15 }
 0x242   : > { %v970_v5 = vpop.permute.xlu0 %969  ;;  %v1005_v62 = vpop.permute.xlu1 %1004 }
 0x243   : > { %v977_v6 = vsel %vm5997_vm13, %v968_v57, %v970_v5  ;;  %v1013_v17 = vsel %vm5998_vm11, %v4498_v10, %v1005_v62  ;;  %v1500_v14 = vld [vmem:[#allocation3 + $0xe8] sm:$0xff]  ;;  %vm6002_vm13 = vcmask 146432   ;;  %vm6003_vm11 = vcmask 138240  }
 0x244   : > { %987 = vst [vmem:[#allocation3 + $0x108] sm:$0xf0] %v977_v6  ;;  %1023 = vst [vmem:[#allocation3 + $0x128] sm:$0xf] %v1013_v17  ;;  %v3528_v56 = vpack.c.bf16 %v1500_v14, %v1495_v49 }
 0x246   : > { %v1007_v15 = vpop.permute.xlu0 %1006  ;;  %3529 = vmatpush3.bf16.msra.mxu0 %v3528_v56  ;;  %v1042_v39 = vpop.permute.xlu1 %1041 }
 0x247   : > { %v1014_v32 = vsel %vm5999_vm9, %v1005_v62, %v1007_v15  ;;  %v1050_v54 = vsel %vm6000_vm15, %v4592_v52, %v1042_v39  ;;  %3530 = vmatprep.subr.bf16.mxu0 %v5939_v2  ;;  %vm6004_vm15 = vmmov %vm6001_vm1  ;;  %v1503_v43 = vld [vmem:[#allocation3 + $0x100] sm:$0xff] }
 0x248   : > { %1024 = vst [vmem:[#allocation3 + $0x130] sm:$0xf] %v1014_v32  ;;  %1060 = vst [vmem:[#allocation3 + $0x128] sm:$0xf0] %v1050_v54 }
 0x24a   : > { %v1044_v16 = vpop.permute.xlu0 %1043  ;;  %v935_v59 = vpop.permute.xlu1 %934 }
 0x24b   : > { %v1051_v10 = vsel %vm6001_vm1, %v1042_v39, %v1044_v16  ;;  %v941_v25 = vsel %vm6002_vm13, %v933_v3, %v935_v59  ;;  %vm6005_vm1 = vcmask 56320   ;;  %v1504_v37 = vld [vmem:[#allocation3 + $0x108] sm:$0xff] }
 0x24c   : > { %1061 = vst [vmem:[#allocation3 + $0x130] sm:$0xf0] %v1051_v10  ;;  %951 = vst.msk [vmem:[#allocation3 + $0x110] sm:$0xf] %vm534_vm2, %v941_v25 }
 0x24d   : > { %vm6006_vm13 = vmmov %vm6005_vm1 }
 0x24e   : > { %v972_v27 = vpop.permute.xlu0 %971  ;;  %v1009_v29 = vpop.permute.xlu1 %1008 }
 0x24f   : > { %v978_v19 = vsel %vm6003_vm11, %v970_v5, %v972_v27  ;;  %v1015_v30 = vsel %vm5999_vm9, %v1007_v15, %v1009_v29  ;;  %v1508_v60 = vld [vmem:[#allocation3 + $0x128] sm:$0xff]  ;;  %vm6007_vm11 = vcmask 48128  }
 0x250   : > { %988 = vst.msk [vmem:[#allocation3 + $0x110] sm:$0xf0] %vm569_vm10, %v978_v19  ;;  %v3505_v13 = vpack.c.bf16 %v1508_v60, %v1503_v43  ;;  %vm6008_vm9 = vmmov %vm6007_vm11 }
 0x251   : > { %1025 = vst.msk [vmem:[#allocation3 + $0x138] sm:$0xf] %vm534_vm2, %v1015_v30 }
 0x252   : > { %v1046_v52 = vpop.permute.xlu0 %1045  ;;  %v1079_v31 = vpop.permute.xlu1 %1078 }
 0x253   : > { %v1052_v41 = vsel %vm6004_vm15, %v1044_v16, %v1046_v52  ;;  %v1087_v34 = vsel %vm6005_vm1, %v4507_v18, %v1079_v31  ;;  %v1509_v40 = vld [vmem:[#allocation3 + $0x130] sm:$0xff]  ;;  %vm6009_vm15 = vcmask 457728  }
 0x254   : > { %1062 = vst.msk [vmem:[#allocation3 + $0x138] sm:$0xf0] %vm569_vm10, %v1052_v41  ;;  %1097 = vst [vmem:[#allocation3 + $0x150] sm:$0xf] %v1087_v34  ;;  %v3503_v21 = vpack.c.bf16 %v1509_v40, %v1504_v37 }
 0x255   : > { %vm6010_vm1 = vmmov %vm6009_vm15 }
 0x256   : > { %v1081_v12 = vpop.permute.xlu0 %1080  ;;  %v1116_v23 = vpop.permute.xlu1 %1115  ;;  %3504 = vmatprep.subr.bf16.mxu1 %v3503_v21 }
 0x257   : > { %v1088_v44 = vsel %vm6006_vm13, %v1079_v31, %v1081_v12  ;;  %v1124_v51 = vsel %vm6007_vm11, %v4606_v0, %v1116_v23  ;;  %3506 = vmatpush1.bf16.msra.mxu1 %v3505_v13  ;;  %v1505_v24 = vld [vmem:[#allocation3 + $0x110] sm:$0xff]  ;;  %vm6011_vm13 = vcmask 449536  }
 0x258   : > { %1098 = vst [vmem:[#allocation3 + $0x158] sm:$0xf] %v1088_v44  ;;  %1134 = vst [vmem:[#allocation3 + $0x150] sm:$0xf0] %v1124_v51 }
 0x259   : > { %vm6012_vm11 = vmmov %vm6011_vm13 }
 0x25a   : > { %v1118_v18 = vpop.permute.xlu0 %1117  ;;  %v1153_v55 = vpop.permute.xlu1 %1152 }
 0x25b   : > { %v1125_v35 = vsel %vm6008_vm9, %v1116_v23, %v1118_v18  ;;  %v1161_v63 = vsel %vm6009_vm15, %v4520_v28, %v1153_v55  ;;  %v1510_v50 = vld [vmem:[#allocation3 + $0x138] sm:$0xff]  ;;  %vm6013_vm9 = vcmask 56320   ;;  %vm6014_vm15 = vcmask 48128  }
 0x25c   : > { %1135 = vst [vmem:[#allocation3 + $0x158] sm:$0xf0] %v1125_v35  ;;  %1171 = vst [vmem:[#allocation3 + $0x178] sm:$0xf] %v1161_v63  ;;  %v3531_v47 = vpack.c.bf16 %v1510_v50, %v1505_v24 }
 0x25e   : > { %v1155_v7 = vpop.permute.xlu0 %1154  ;;  %3532 = vmatpush3.bf16.msra.mxu0 %v3531_v47  ;;  %v1190_v45 = vpop.permute.xlu1 %1189 }
 0x25f   : > { %v1162_v0 = vsel %vm6010_vm1, %v1153_v55, %v1155_v7  ;;  %v1198_v11 = vsel %vm6011_vm13, %v4622_v58, %v1190_v45  ;;  %3533 = vmatprep.subr.bf16.mxu0 %v5939_v2  ;;  %vm6015_vm13 = vmmov %vm6012_vm11  ;;  %v1513_v56 = vld [vmem:[#allocation3 + $0x150] sm:$0xff] }
 0x260   : > { %1172 = vst [vmem:[#allocation3 + $0x180] sm:$0xf] %v1162_v0  ;;  %1208 = vst [vmem:[#allocation3 + $0x178] sm:$0xf0] %v1198_v11 }
 0x262   : > { %v1192_v33 = vpop.permute.xlu0 %1191  ;;  %v1083_v61 = vpop.permute.xlu1 %1082 }
 0x263   : > { %v1199_v28 = vsel %vm6012_vm11, %v1190_v45, %v1192_v33  ;;  %v1089_v1 = vsel %vm6013_vm9, %v1081_v12, %v1083_v61  ;;  %vm6016_vm11 = vcmask 441344   ;;  %v1514_v17 = vld [vmem:[#allocation3 + $0x158] sm:$0xff] }
 0x264   : > { %1209 = vst [vmem:[#allocation3 + $0x180] sm:$0xf0] %v1199_v28  ;;  %1099 = vst.msk [vmem:[#allocation3 + $0x160] sm:$0xf] %vm534_vm2, %v1089_v1 }
 0x265   : > { %vm6017_vm9 = vmmov %vm6016_vm11 }
 0x266   : > { %v1120_v53 = vpop.permute.xlu0 %1119  ;;  %v1157_v3 = vpop.permute.xlu1 %1156 }
 0x267   : > { %v1126_v57 = vsel %vm6014_vm15, %v1118_v18, %v1120_v53  ;;  %v1163_v4 = vsel %vm6010_vm1, %v1155_v7, %v1157_v3  ;;  %v1518_v5 = vld [vmem:[#allocation3 + $0x178] sm:$0xff]  ;;  %vm6018_vm15 = vcmask 375808  }
 0x268   : > { %1136 = vst.msk [vmem:[#allocation3 + $0x160] sm:$0xf0] %vm569_vm10, %v1126_v57  ;;  %v3509_v15 = vpack.c.bf16 %v1518_v5, %v1513_v56  ;;  %vm6019_vm1 = vmmov %vm6018_vm15 }
 0x269   : > { %1173 = vst.msk [vmem:[#allocation3 + $0x188] sm:$0xf] %vm534_vm2, %v1163_v4 }
 0x26a   : > { %v1194_v58 = vpop.permute.xlu0 %1193  ;;  %v1227_v26 = vpop.permute.xlu1 %1226 }
 0x26b   : > { %v1200_v62 = vsel %vm6015_vm13, %v1192_v33, %v1194_v58  ;;  %v1235_v6 = vsel %vm6016_vm11, %v4647_v36, %v1227_v26  ;;  %v1519_v49 = vld [vmem:[#allocation3 + $0x180] sm:$0xff]  ;;  %vm6020_vm13 = vcmask 367616  }
 0x26c   : > { %1210 = vst.msk [vmem:[#allocation3 + $0x188] sm:$0xf0] %vm569_vm10, %v1200_v62  ;;  %1245 = vst [vmem:[#allocation3 + $0x1a0] sm:$0xf] %v1235_v6  ;;  %v3507_v14 = vpack.c.bf16 %v1519_v49, %v1514_v17 }
 0x26d   : > { %vm6021_vm11 = vmmov %vm6020_vm13 }
 0x26e   : > { %v1229_v39 = vpop.permute.xlu0 %1228  ;;  %v1264_v32 = vpop.permute.xlu1 %1263  ;;  %3508 = vmatprep.subr.bf16.mxu1 %v3507_v14 }
 0x26f   : > { %v1236_v54 = vsel %vm6017_vm9, %v1227_v26, %v1229_v39  ;;  %v1272_v16 = vsel %vm6018_vm15, %v4660_v48, %v1264_v32  ;;  %3510 = vmatpush1.bf16.msra.mxu1 %v3509_v15  ;;  %v1515_v27 = vld [vmem:[#allocation3 + $0x160] sm:$0xff]  ;;  %vm6022_vm9 = vcmask 359424  }
 0x270   : > { %1246 = vst [vmem:[#allocation3 + $0x1a8] sm:$0xf] %v1236_v54  ;;  %1282 = vst [vmem:[#allocation3 + $0x1a0] sm:$0xf0] %v1272_v16  ;;  %v4925_v54 = vld [vmem:[#allocation4 + $0x30] sm:$0xff]  ;;  %v1779_v16 = vlaneseq }
 0x271   : > { %vm6023_vm15 = vmmov %vm6022_vm9  ;;  %2554 = vrot.lane.b32.xlu0 %v4925_v54, %s5977_s14 }
 0x272   : > { %v1266_v36 = vpop.permute.xlu0 %1265  ;;  %v1301_v59 = vpop.permute.xlu1 %1300 }
 0x273   : > { %v1273_v10 = vsel %vm6019_vm1, %v1264_v32, %v1266_v36  ;;  %v1309_v25 = vsel %vm6020_vm13, %v4670_v22, %v1301_v59  ;;  %v1520_v29 = vld [vmem:[#allocation3 + $0x188] sm:$0xff]  ;;  %vm6024_vm1 = vcmask 441344   ;;  %vm6025_vm13 = vcmask 375808  }
 0x274   : > { %1283 = vst [vmem:[#allocation3 + $0x1a8] sm:$0xf0] %v1273_v10  ;;  %1319 = vst [vmem:[#allocation3 + $0x1c8] sm:$0xf] %v1309_v25  ;;  %v3534_v19 = vpack.c.bf16 %v1520_v29, %v1515_v27 }
 0x275   : > { %2632 = vrot.lane.b32.xlu0 %v4925_v54, %s5979_s15 }
 0x276   : > { %v1303_v30 = vpop.permute.xlu0 %1302  ;;  %3535 = vmatpush3.bf16.msra.mxu0 %v3534_v19  ;;  %v1338_v52 = vpop.permute.xlu1 %1337 }
 0x277   : > { %v1310_v48 = vsel %vm6021_vm11, %v1301_v59, %v1303_v30  ;;  %v1346_v31 = vsel %vm6022_vm9, %v4682_v9, %v1338_v52  ;;  %3536 = vmatprep.subr.bf16.mxu0 %v5939_v2  ;;  %v1523_v35 = vld [vmem:[#allocation3 + $0x1a0] sm:$0xff] }
 0x278   : > { %1320 = vst [vmem:[#allocation3 + $0x1d0] sm:$0xf] %v1310_v48  ;;  %1356 = vst [vmem:[#allocation3 + $0x1c8] sm:$0xf0] %v1346_v31 }
 0x27a   : > { %v1340_v60 = vpop.permute.xlu0 %1339  ;;  %v1231_v41 = vpop.permute.xlu1 %1230 }
 0x27b   : > { %v1347_v22 = vsel %vm6023_vm15, %v1338_v52, %v1340_v60  ;;  %v1237_v34 = vsel %vm6024_vm1, %v1229_v39, %v1231_v41  ;;  %v1524_v51 = vld [vmem:[#allocation3 + $0x1a8] sm:$0xff]  ;;  %vm1897_vm15 = vcmask 580608   ;;  %vm6039_vm1 = vcmask 457728  }
 0x27c   : > { %1357 = vst [vmem:[#allocation3 + $0x1d0] sm:$0xf0] %v1347_v22  ;;  %1247 = vst.msk [vmem:[#allocation3 + $0x1b0] sm:$0xf] %vm534_vm2, %v1237_v34 }
 0x27e   : > { %v1268_v37 = vpop.permute.xlu0 %1267  ;;  %v1305_v40 = vpop.permute.xlu1 %1304 }
 0x27f   : > { %v1274_v21 = vsel %vm6025_vm13, %v1266_v36, %v1268_v37  ;;  %v1311_v43 = vsel %vm6021_vm11, %v1303_v30, %v1305_v40  ;;  %v1528_v12 = vld [vmem:[#allocation3 + $0x1c8] sm:$0xff]  ;;  %v1780_v36 = vshrl.u32 %v1779_v16, 7  ;;  %vm6040_vm13 = vcmask 449536  }
 0x280   : > { %1284 = vst.msk [vmem:[#allocation3 + $0x1b0] sm:$0xf0] %vm569_vm10, %v1274_v21  ;;  %v3513_v63 = vpack.c.bf16 %v1528_v12, %v1523_v35  ;;  %vm6041_vm11 = vcmask 949248  }
 0x281   : > { %1321 = vst.msk [vmem:[#allocation3 + $0x1d8] sm:$0xf] %vm534_vm2, %v1311_v43  ;;  %v1781_v59 = vsub.s32 0, %v1780_v36  ;;  %v1785_v10 = vsub.s32 1, %v1780_v36  ;;  %v1789_v30 = vsub.s32 2, %v1780_v36  ;;  %v1793_v52 = vsub.s32 3, %v1780_v36 }
 0x282   : > { %v1342_v9 = vpop.permute.xlu0 %1341  ;;  %v1375_v13 = vpop.permute.xlu1 %1374  ;;  %v1797_v48 = vsub.s32 4, %v1780_v36 }
 0x283   : > { %v1348_v23 = vsel %vm6022_vm9, %v1340_v60, %v1342_v9  ;;  %v1383_v44 = vsel %vm1380_vm0, %v4709_v38, %v1375_v13  ;;  %v1529_v18 = vld [vmem:[#allocation3 + $0x1d0] sm:$0xff]  ;;  %v4936_v19 = vrot.slane %v276_v8, %v1785_v10  ;;  %v4940_v41 = vrot.slane %v276_v8, %v1789_v30 }
 0x284   : > { %1358 = vst.msk [vmem:[#allocation3 + $0x1d8] sm:$0xf0] %vm569_vm10, %v1348_v23  ;;  %1393 = vst [vmem:[#allocation3 + $0x1f0] sm:$0xf] %v1383_v44  ;;  %v3511_v55 = vpack.c.bf16 %v1529_v18, %v1524_v51  ;;  %v4942_v34 = vrot.slane %v276_v8, %v1793_v52  ;;  %v4944_v43 = vrot.slane %v276_v8, %v1797_v48  ;;  %vm6042_vm9 = vcmask 441344  }
 0x286   : > { %v1377_v24 = vpop.permute.xlu0 %1376  ;;  %v1412_v50 = vpop.permute.xlu1 %1411  ;;  %3512 = vmatprep.subr.bf16.mxu1 %v3511_v55  ;;  %6027 = vst [vmem:[#allocation21_spill] sm:$0xff] %v4942_v34  ;;  %6028 = vst [vmem:[#allocation22_spill] sm:$0xff] %v4944_v43 }
 0x287   : > { %v1384_v47 = vsel %vm1380_vm0, %v1375_v13, %v1377_v24  ;;  %v1420_v7 = vsel %vm1417_vm5, %v4720_v42, %v1412_v50  ;;  %3514 = vmatpush1.bf16.msra.mxu1 %v3513_v63  ;;  %v1525_v33 = vld [vmem:[#allocation3 + $0x1b0] sm:$0xff] }
 0x288   : > { %1394 = vst [vmem:[#allocation3 + $0x1f8] sm:$0xf] %v1384_v47  ;;  %1430 = vst [vmem:[#allocation3 + $0x1f0] sm:$0xf0] %v1420_v7 }
 0x28a   : > { %v1414_v38 = vpop.permute.xlu0 %1413  ;;  %v1449_v45 = vpop.permute.xlu1 %1448 }
 0x28b   : > { %v1421_v0 = vsel %vm1417_vm5, %v1412_v50, %v1414_v38  ;;  %v1457_v11 = vsel %vm1454_vm6, %v4729_v46, %v1449_v45  ;;  %v1530_v61 = vld [vmem:[#allocation3 + $0x1d8] sm:$0xff] }
 0x28c   : > { %1431 = vst [vmem:[#allocation3 + $0x1f8] sm:$0xf0] %v1421_v0  ;;  %1467 = vst [vmem:[#allocation3 + $0x218] sm:$0xf] %v1457_v11  ;;  %v3537_v28 = vpack.c.bf16 %v1530_v61, %v1525_v33 }
 0x28e   : > { %v1451_v1 = vpop.permute.xlu0 %1450  ;;  %3538 = vmatpush3.bf16.msra.mxu0 %v3537_v28  ;;  %v1379_v53 = vpop.permute.xlu1 %1378 }
 0x28f   : > { %v1458_v42 = vsel %vm1454_vm6, %v1449_v45, %v1451_v1  ;;  %v1385_v3 = vsel %vm1380_vm0, %v1377_v24, %v1379_v53  ;;  %3539 = vmatprep.subr.bf16.mxu0 %v5939_v2  ;;  %v1533_v17 = vld [vmem:[#allocation3 + $0x1f0] sm:$0xff] }
 0x290   : > { %1468 = vst [vmem:[#allocation3 + $0x220] sm:$0xf] %v1458_v42  ;;  %1395 = vst.msk [vmem:[#allocation3 + $0x200] sm:$0xf] %vm534_vm2, %v1385_v3 }
 0x292   : > { %v1416_v57 = vpop.permute.xlu0 %1415  ;;  %v1453_v4 = vpop.permute.xlu1 %1452 }
 0x293   : > { %v1422_v46 = vsel %vm1417_vm5, %v1414_v38, %v1416_v57  ;;  %v1459_v58 = vsel %vm1454_vm6, %v1451_v1, %v1453_v4  ;;  %v1538_v26 = vld [vmem:[#allocation3 + $0x218] sm:$0xf] }
 0x294   : > { %1432 = vst.msk [vmem:[#allocation3 + $0x200] sm:$0xf0] %vm569_vm10, %v1422_v46  ;;  %v1534_v5 = vld [vmem:[#allocation3 + $0x1f8] sm:$0xff]  ;;  %v3518_v49 = vpack.c.bf16 %v1538_v26, %v1533_v17  ;;  %vm1812_vm10 = vcmask 719872  }
 0x295   : > { %1469 = vst.msk [vmem:[#allocation3 + $0x228] sm:$0xf] %vm534_vm2, %v1459_v58  ;;  %vm1880_vm2 = vcmask 908288  }
 0x297   : > { %v1539_v62 = vld [vmem:[#allocation3 + $0x220] sm:$0xf] }
 0x298   : > { %v3515_v6 = vpack.c.bf16 %v1539_v62, %v1534_v5 }
 0x29a   : > { %3517 = vmatprep.subr.msk.bf16.mxu1 %vm4751_vm4, %v3515_v6 }
 0x29b   : > { %3520 = vmatpush1.bf16.msk.msra.mxu1 %vm4751_vm4, %v3518_v49  ;;  %v1535_v14 = vld [vmem:[#allocation3 + $0x200] sm:$0xff] }
 0x29c   : > { %v1540_v56 = vld [vmem:[#allocation3 + $0x228] sm:$0xf] }
 0x29d   : > { %v3540_v15 = vpack.c.bf16 %v1540_v56, %v1535_v14 }
 0x29e   : > { %3405 = vmatmul.mubr.msk.f32.vlgmr.msra.gmra.mrb[0].mxu1 %vm723_vm8, %v4794_v20 }
 0x29f   : > { %3542 = vmatpush3.bf16.msk.msra.mxu0 %vm4751_vm4, %v3540_v15  ;;  %vm1891_vm4 = vcmask 1048440  }
 0x2a2   : > { %3459 = vmatmul.mubr.msk.f32.vlgmr.msra.gmra.mrb[2].mxu0 %vm723_vm8, %v4794_v20  ;;  %v4934_v20 = vrot.slane %v276_v8, %v1781_v59 }
 0x2a3   : > { %v1545_v25 = vpop.permute.xlu0 %1544 }
 0x2e3   : > { %v4960_v17 = vpop.permute.xlu0 %2554 }
 0x2e7   : > { %v4962_v49 = vpop.permute.xlu0 %2632 }
 0x2f4   : > { %v1632_v39 = vpop.f32.mrb[0].mxu0 }
 0x2f5   : > { %v1634_v32 = vpop.f32.mrb[1].mxu0  ;;  %v1633_v27 = vadd.f32 %v1632_v39, %v1545_v25 }
 0x2f6   : > { %v1635_v29 = vadd.f32 %v1634_v32, %v1545_v25 }
 0x2f7   : > { %v1804_v31 = vmul.f32 %v4934_v20, %v1633_v27 }
 0x2f8   : > { %v1805_v60 = vmul.f32 %v4936_v19, %v1635_v29 }
 0x2fa   : > { %v1809_v9 = vadd.f32 %v1805_v60, %v1804_v31 }
 0x371   : > { %v1703_v22 = vpop.f32.mrb[0].mxu1 }
 0x372   : > { %v1704_v37 = vadd.f32 %v1703_v22, %v1545_v25  ;;  %v1705_v40 = vpop.f32.mrb[1].mxu1 }
 0x373   : > { %v1706_v21 = vadd.f32 %v1705_v40, %v1545_v25 }
 0x374   : > { %v1806_v13 = vmul.f32 %v4940_v41, %v1704_v37 }
 0x375   : > { %v1774_v12 = vpop.f32.mrb[2].mxu0  ;;  %v1807_v23 = vmul.f32 %v4942_v34, %v1706_v21 }
 0x376   : > { %v1775_v44 = vadd.f32 %v1774_v12, %v1545_v25  ;;  %v3460_v51 = vpop.f32.mrb[3].mxu0  ;;  %v1810_v18 = vadd.f32 %v1809_v9, %v1806_v13 }
 0x378   : > { %v1808_v55 = vmul.f32 %v4944_v43, %v1775_v44  ;;  %v1811_v35 = vadd.f32 %v1810_v18, %v1807_v23 }
 0x37a   : > { %v1813_v63 = vsel %vm1812_vm10, %v1808_v55, 0.0 }
 0x37b   : > { %v1814_v24 = vadd.f32 %v1813_v63, %v1811_v35 }
 0x37d   : > { %1815 = vadd.xlane.f32.xlu1 %v1814_v24 }
 0x38e   : > { %2593 = vrot.lane.b32.xlu1 %v4925_v54, %s5978_s10 }
 0x392   : > { %2671 = vrot.lane.b32.xlu1 %v4925_v54, %s6029_s3 }
 0x40a   : > { %v1816_v50 = vpop.xlane.xlu1 %1815 }
 0x40b   : > { %v1817_v47 = vmul.f32 0.00390625, %v1816_v50 }
 0x40d   : > { %v1818_v7 = vsub.f32 %v1633_v27, %v1817_v47  ;;  %v1819_v38 = vsub.f32 %v1635_v29, %v1817_v47  ;;  %v1820_v45 = vsub.f32 %v1704_v37, %v1817_v47  ;;  %v1821_v0 = vsub.f32 %v1706_v21, %v1817_v47 }
 0x40e   : > { %v1822_v11 = vsub.f32 %v1775_v44, %v1817_v47  ;;  %v4974_v37 = vpop.permute.xlu1 %2593 }
 0x40f   : > { %v1823_v33 = vmul.f32 %v1818_v7, %v1818_v7  ;;  %v1824_v61 = vmul.f32 %v1819_v38, %v1819_v38  ;;  %v1825_v28 = vmul.f32 %v1820_v45, %v1820_v45  ;;  %v1826_v53 = vmul.f32 %v1821_v0, %v1821_v0 }
 0x410   : > { %v1827_v1 = vmul.f32 %v1822_v11, %v1822_v11 }
 0x411   : > { %v1828_v42 = vmul.f32 %v1823_v33, %v4934_v20  ;;  %v1829_v3 = vmul.f32 %v1824_v61, %v4936_v19  ;;  %v1830_v57 = vmul.f32 %v1825_v28, %v4940_v41  ;;  %v1831_v58 = vmul.f32 %v1826_v53, %v4942_v34 }
 0x412   : > { %v1832_v46 = vmul.f32 %v1827_v1, %v4944_v43  ;;  %v4976_v40 = vpop.permute.xlu1 %2671 }
 0x413   : > { %v1833_v4 = vadd.f32 %v1829_v3, %v1828_v42 }
 0x414   : > { %v1836_v62 = vsel %vm1812_vm10, %v1832_v46, 0.0 }
 0x415   : > { %v1834_v26 = vadd.f32 %v1833_v4, %v1830_v57 }
 0x417   : > { %v1835_v5 = vadd.f32 %v1834_v26, %v1831_v58 }
 0x419   : > { %v1837_v6 = vadd.f32 %v1836_v62, %v1835_v5 }
 0x41b   : > { %1838 = vadd.xlane.f32.xlu0 %v1837_v6 }
 0x4a8   : > { %v1839_v14 = vpop.xlane.xlu0 %1838 }
 0x4a9   : > { %v1840_v56 = vmul.f32 0.00390625, %v1839_v14 }
 0x4ab   : > { %v1841_v15 = vadd.f32 1e-05, %v1840_v56 }
 0x4ad   : > { %3824 = vrsqrt.f32 %v1841_v15 }
 0x4b7   : > { %v3825_v39 = vpop.eup %3824 }
 0x4b8   : > { %v1844_v32 = vmul.f32 %v3825_v39, %v1819_v38  ;;  %v1843_v16 = vmul.f32 %v3825_v39, %v1818_v7  ;;  %v1847_v36 = vmul.f32 %v3825_v39, %v1822_v11  ;;  %v1845_v59 = vmul.f32 %v3825_v39, %v1820_v45 }
 0x4b9   : > { %v1846_v25 = vmul.f32 %v3825_v39, %v1821_v0 }
 0x4ba   : > { %v1849_v8 = vmax.f32 %v1844_v32, 0.0  ;;  %v1848_v10 = vmax.f32 %v1843_v16, 0.0  ;;  %v1852_v30 = vmax.f32 %v1847_v36, 0.0  ;;  %v1850_v52 = vmax.f32 %v1845_v59, 0.0 }
 0x4bb   : > { %v1851_v60 = vmax.f32 %v1846_v25, 0.0 }
 0x4bc   : > { %v1854_v27 = vmul.f32 %v1849_v8, %v4936_v19  ;;  %v1853_v29 = vmul.f32 %v1848_v10, %v4934_v20  ;;  %v1857_v48 = vmul.f32 %v1852_v30, %v4944_v43  ;;  %v1855_v31 = vmul.f32 %v1850_v52, %v4940_v41 }
 0x4bd   : > { %v1856_v22 = vmul.f32 %v1851_v60, %v4942_v34 }
 0x4be   : > { %1872 = vrot.lane.b32.xlu0 %v1854_v27, %s6030_s30  ;;  %1870 = vrot.lane.b32.xlu1 %v1853_v29, %s6030_s30 }
 0x4c2   : > { %1878 = vrot.lane.b32.xlu0 %v1857_v48, %s6030_s30  ;;  %1874 = vrot.lane.b32.xlu1 %v1855_v31, %s6030_s30 }
 0x4c6   : > { %1876 = vrot.lane.b32.xlu1 %v1856_v22, %s6030_s30  ;;  %s6031_s30 = smov 126  }
 0x530   : > { %v1873_v21 = vpop.permute.xlu0 %1872  ;;  %v1871_v9 = vpop.permute.xlu1 %1870 }
 0x531   : > { %v4978_v13 = vsel %vm1880_vm2, %v1871_v9, %v1873_v21  ;;  %1892 = vst.msk [vmem:[#allocation4] sm:$0xff] %vm1891_vm4, %v1871_v9  ;;  %vm6044_vm4 = vcmask 875520  }
 0x534   : > { %v1879_v12 = vpop.permute.xlu0 %1878  ;;  %v1875_v23 = vpop.permute.xlu1 %1874 }
 0x535   : > { %1898 = vst.msk [vmem:[#allocation4 + $0x28] sm:$0xff] %vm1897_vm15, %v1879_v12  ;;  %v4980_v44 = vsel %vm1880_vm2, %v1873_v21, %v1875_v23  ;;  %vm6045_vm15 = vcmask 867328  }
 0x536   : > { %1906 = vst [vmem:[#allocation5 + $0x10] sm:$0xff] %v4980_v44 }
 0x538   : > { %v4983_v51 = vld [vmem:[#allocation4] sm:$0xff]  ;;  %v1877_v18 = vpop.permute.xlu1 %1876 }
 0x539   : > { %v4985_v55 = vsel %vm1880_vm2, %v1875_v23, %v1877_v18  ;;  %v4987_v35 = vsel %vm1880_vm2, %v1877_v18, %v1879_v12  ;;  %1953 = vrot.lane.b32.xlu0 %v4983_v51, %s6031_s30  ;;  %1919 = vrot.lane.b32.xlu1 %v4983_v51, %s5968_s29  ;;  %vm6043_vm2 = vcmask 375808  }
 0x53a   : > { %1896 = vst [vmem:[#allocation4 + $0x20] sm:$0xff] %v4987_v35  ;;  %1908 = vst.msk [vmem:[#allocation5 + $0x20] sm:$0xff] %vm1812_vm10, %v4987_v35 }
 0x53b   : > { %1907 = vst [vmem:[#allocation5 + $0x18] sm:$0xff] %v4985_v55 }
 0x53c   : > { %v5025_v63 = vld [vmem:[#allocation4 + $0x28] sm:$0xff] }
 0x53d   : > { %2021 = vrot.lane.b32.xlu0 %v4983_v51, %s6032_s2  ;;  %1987 = vrot.lane.b32.xlu1 %v4983_v51, %s5970_s9  ;;  %v2887_v2 = vld [vmem:[#allocation5 + $0x10] sm:$0xff] }
 0x541   : > { %2089 = vrot.lane.b32.xlu0 %v4983_v51, %s5971_s17  ;;  %2055 = vrot.lane.b32.xlu1 %v4983_v51, %s6033_s5 }
 0x545   : > { %2157 = vrot.lane.b32.xlu0 %v4983_v51, %s6034_s23  ;;  %2123 = vrot.lane.b32.xlu1 %v4983_v51, %s6035_s27 }
 0x549   : > { %2232 = vrot.lane.b32.xlu0 %v4983_v51, %s5972_s12  ;;  %2193 = vrot.lane.b32.xlu1 %v4983_v51, %s6036_s8 }
 0x54d   : > { %2310 = vrot.lane.b32.xlu0 %v4983_v51, %s5973_s19  ;;  %2271 = vrot.lane.b32.xlu1 %v4983_v51, %s6037_s21 }
 0x551   : > { %2388 = vrot.lane.b32.xlu0 %v4983_v51, %s5974_s20  ;;  %2349 = vrot.lane.b32.xlu1 %v4983_v51, %s6038_s24 }
 0x555   : > { %2466 = vrot.lane.b32.xlu0 %v4983_v51, %s5976_s26  ;;  %2427 = vrot.lane.b32.xlu1 %v4983_v51, %s5975_s11 }
 0x559   : > { %2242 = vrot.lane.b32.xlu0 %v5025_v63, %s5972_s12  ;;  %2505 = vrot.lane.b32.xlu1 %v4983_v51, %s5969_s16 }
 0x55d   : > { %2320 = vrot.lane.b32.xlu0 %v5025_v63, %s5973_s19  ;;  %2203 = vrot.lane.b32.xlu1 %v5025_v63, %s6036_s8 }
 0x561   : > { %2398 = vrot.lane.b32.xlu0 %v5025_v63, %s5974_s20  ;;  %2281 = vrot.lane.b32.xlu1 %v5025_v63, %s6037_s21 }
 0x565   : > { %2476 = vrot.lane.b32.xlu0 %v5025_v63, %s5976_s26  ;;  %2359 = vrot.lane.b32.xlu1 %v5025_v63, %s6038_s24 }
 0x569   : > { %2437 = vrot.lane.b32.xlu1 %v5025_v63, %s5975_s11  ;;  %1923 = vrot.lane.b32.xlu0 %v4980_v44, %s5968_s29 }
 0x56d   : > { %2515 = vrot.lane.b32.xlu1 %v5025_v63, %s5969_s16  ;;  %1955 = vrot.lane.b32.xlu0 %v4978_v13, %s6031_s30 }
 0x571   : > { %2552 = vrot.lane.b32.xlu1 %v5025_v63, %s5977_s14  ;;  %1989 = vrot.lane.b32.xlu0 %v4978_v13, %s5970_s9 }
 0x575   : > { %2591 = vrot.lane.b32.xlu1 %v5025_v63, %s5978_s10  ;;  %2023 = vrot.lane.b32.xlu0 %v4978_v13, %s6032_s2 }
 0x579   : > { %2630 = vrot.lane.b32.xlu1 %v5025_v63, %s5979_s15  ;;  %2057 = vrot.lane.b32.xlu0 %v4978_v13, %s6033_s5 }
 0x57d   : > { %2669 = vrot.lane.b32.xlu1 %v5025_v63, %s6029_s3  ;;  %2091 = vrot.lane.b32.xlu0 %v4978_v13, %s5971_s17 }
 0x581   : > { %2708 = vrot.lane.b32.xlu1 %v5025_v63, %s5980_s18  ;;  %2125 = vrot.lane.b32.xlu0 %v4978_v13, %s6035_s27 }
 0x585   : > { %1921 = vrot.lane.b32.xlu1 %v4978_v13, %s5968_s29  ;;  %2159 = vrot.lane.b32.xlu0 %v4978_v13, %s6034_s23 }
 0x589   : > { %1957 = vrot.lane.b32.xlu1 %v4980_v44, %s6031_s30  ;;  %2195 = vrot.lane.b32.xlu0 %v4978_v13, %s6036_s8 }
 0x58d   : > { %1991 = vrot.lane.b32.xlu1 %v4980_v44, %s5970_s9  ;;  %2234 = vrot.lane.b32.xlu0 %v4978_v13, %s5972_s12 }
 0x591   : > { %2025 = vrot.lane.b32.xlu1 %v4980_v44, %s6032_s2  ;;  %2273 = vrot.lane.b32.xlu0 %v4978_v13, %s6037_s21 }
 0x595   : > { %2059 = vrot.lane.b32.xlu1 %v4980_v44, %s6033_s5  ;;  %2312 = vrot.lane.b32.xlu0 %v4978_v13, %s5973_s19 }
 0x599   : > { %2093 = vrot.lane.b32.xlu1 %v4980_v44, %s5971_s17  ;;  %2351 = vrot.lane.b32.xlu0 %v4978_v13, %s6038_s24 }
 0x59d   : > { %2127 = vrot.lane.b32.xlu1 %v4980_v44, %s6035_s27  ;;  %2390 = vrot.lane.b32.xlu0 %v4978_v13, %s5974_s20 }
 0x5a1   : > { %2161 = vrot.lane.b32.xlu1 %v4980_v44, %s6034_s23  ;;  %2429 = vrot.lane.b32.xlu0 %v4978_v13, %s5975_s11 }
 0x5a5   : > { %2197 = vrot.lane.b32.xlu1 %v4980_v44, %s6036_s8  ;;  %2468 = vrot.lane.b32.xlu0 %v4978_v13, %s5976_s26 }
 0x5a9   : > { %2236 = vrot.lane.b32.xlu1 %v4980_v44, %s5972_s12  ;;  %2507 = vrot.lane.b32.xlu0 %v4978_v13, %s5969_s16 }
 0x5ab   : > { %v1954_v24 = vpop.permute.xlu0 %1953  ;;  %v5111_v50 = vpop.permute.xlu1 %1919 }
 0x5ad   : > { %2275 = vrot.lane.b32.xlu1 %v4980_v44, %s6037_s21  ;;  %2546 = vrot.lane.b32.xlu0 %v4980_v44, %s5977_s14 }
 0x5af   : > { %v5117_v47 = vpop.permute.xlu0 %2021  ;;  %v1988_v7 = vpop.permute.xlu1 %1987 }
 0x5b1   : > { %2314 = vrot.lane.b32.xlu1 %v4980_v44, %s5973_s19  ;;  %2585 = vrot.lane.b32.xlu0 %v4980_v44, %s5978_s10 }
 0x5b3   : > { %v5123_v38 = vpop.permute.xlu0 %2089  ;;  %v5125_v45 = vpop.permute.xlu1 %2055 }
 0x5b5   : > { %2353 = vrot.lane.b32.xlu1 %v4980_v44, %s6038_s24  ;;  %2544 = vrot.lane.b32.xlu0 %v4978_v13, %s5977_s14 }
 0x5b7   : > { %v5131_v0 = vpop.permute.xlu0 %2157  ;;  %v5133_v11 = vpop.permute.xlu1 %2123 }
 0x5b9   : > { %2392 = vrot.lane.b32.xlu1 %v4980_v44, %s5974_s20  ;;  %2624 = vrot.lane.b32.xlu0 %v4980_v44, %s5979_s15 }
 0x5bb   : > { %v5139_v33 = vpop.permute.xlu0 %2232  ;;  %v5141_v61 = vpop.permute.xlu1 %2193 }
 0x5bd   : > { %2431 = vrot.lane.b32.xlu1 %v4980_v44, %s5975_s11  ;;  %2663 = vrot.lane.b32.xlu0 %v4980_v44, %s6029_s3 }
 0x5bf   : > { %v5147_v28 = vpop.permute.xlu0 %2310  ;;  %v5149_v1 = vpop.permute.xlu1 %2271 }
 0x5c1   : > { %2470 = vrot.lane.b32.xlu1 %v4980_v44, %s5976_s26  ;;  %2622 = vrot.lane.b32.xlu0 %v4978_v13, %s5979_s15 }
 0x5c3   : > { %v5155_v53 = vpop.permute.xlu0 %2388  ;;  %v5157_v42 = vpop.permute.xlu1 %2349 }
 0x5c5   : > { %2509 = vrot.lane.b32.xlu1 %v4980_v44, %s5969_s16  ;;  %2702 = vrot.lane.b32.xlu0 %v4980_v44, %s5980_s18 }
 0x5c7   : > { %v5163_v3 = vpop.permute.xlu0 %2466  ;;  %v5165_v57 = vpop.permute.xlu1 %2427 }
 0x5c9   : > { %2741 = vrot.lane.b32.xlu0 %v4980_v44, %s5981_s28  ;;  %2548 = vrot.lane.b32.xlu1 %v4985_v55, %s5977_s14 }
 0x5cb   : > { %v5171_v4 = vpop.permute.xlu0 %2242  ;;  %v5173_v46 = vpop.permute.xlu1 %2505 }
 0x5cd   : > { %2700 = vrot.lane.b32.xlu0 %v4978_v13, %s5980_s18  ;;  %2587 = vrot.lane.b32.xlu1 %v4985_v55, %s5978_s10 }
 0x5cf   : > { %v5179_v58 = vpop.permute.xlu0 %2320  ;;  %v5181_v26 = vpop.permute.xlu1 %2203 }
 0x5d1   : > { %2780 = vrot.lane.b32.xlu0 %v4980_v44, %s5984_s13  ;;  %2583 = vrot.lane.b32.xlu1 %v4978_v13, %s5978_s10 }
 0x5d3   : > { %v5187_v5 = vpop.permute.xlu0 %2398  ;;  %v5189_v62 = vpop.permute.xlu1 %2281 }
 0x5d5   : > { %2819 = vrot.lane.b32.xlu0 %v4980_v44, %s5985_s0  ;;  %2626 = vrot.lane.b32.xlu1 %v4985_v55, %s5979_s15 }
 0x5d7   : > { %v5195_v6 = vpop.permute.xlu0 %2476  ;;  %v5197_v14 = vpop.permute.xlu1 %2359 }
 0x5d9   : > { %2778 = vrot.lane.b32.xlu0 %v4978_v13, %s5984_s13  ;;  %2665 = vrot.lane.b32.xlu1 %v4985_v55, %s6029_s3 }
 0x5db   : > { %v5203_v56 = vpop.permute.xlu0 %1923  ;;  %v5205_v15 = vpop.permute.xlu1 %2437 }
 0x5dd   : > { %2661 = vrot.lane.b32.xlu1 %v4978_v13, %s6029_s3  ;;  %1925 = vrot.lane.b32.xlu0 %v4985_v55, %s5968_s29 }
 0x5df   : > { %v1956_v39 = vpop.permute.xlu0 %1955  ;;  %v5211_v32 = vpop.permute.xlu1 %2515 }
 0x5e0   : > { %v5214_v16 = vsel %vm589_vm12, %v1954_v24, %v1956_v39 }
 0x5e1   : > { %2704 = vrot.lane.b32.xlu1 %v4985_v55, %s5980_s18  ;;  %2858 = vrot.lane.b32.xlu0 %v4980_v44, %s5986_s1 }
 0x5e3   : > { %v1990_v36 = vpop.permute.xlu0 %1989  ;;  %v5220_v59 = vpop.permute.xlu1 %2552 }
 0x5e4   : > { %v5223_v8 = vsel %vm623_vm14, %v1988_v7, %v1990_v36  ;;  %v2560_v10 = vsel %vm6039_vm1, %v5220_v59, %v4960_v17  ;;  %vm6046_vm1 = vcmask 1039360  }
 0x5e5   : > { %2570 = vst.msk [vmem:[#allocation5 + $0x2f0] sm:$0xff] %vm1812_vm10, %v2560_v10  ;;  %2743 = vrot.lane.b32.xlu1 %v4985_v55, %s5981_s28  ;;  %1959 = vrot.lane.b32.xlu0 %v4985_v55, %s6031_s30 }
 0x5e7   : > { %v2024_v25 = vpop.permute.xlu0 %2023  ;;  %v5233_v27 = vpop.permute.xlu1 %2591 }
 0x5e8   : > { %v5237_v29 = vsel %vm656_vm7, %v5117_v47, %v2024_v25  ;;  %v2599_v30 = vsel %vm6040_vm13, %v5233_v27, %v4974_v37  ;;  %vm6047_vm13 = vmmov %vm6046_vm1 }
 0x5e9   : > { %2609 = vst.msk [vmem:[#allocation5 + $0x318] sm:$0xff] %vm1812_vm10, %v2599_v30  ;;  %2739 = vrot.lane.b32.xlu1 %v4978_v13, %s5981_s28  ;;  %1993 = vrot.lane.b32.xlu0 %v4985_v55, %s5970_s9  ;;  %v3549_v30 = vpack.c.bf16 %v5223_v8, %v5214_v16 }
 0x5eb   : > { %v2058_v17 = vpop.permute.xlu0 %2057  ;;  %v5247_v52 = vpop.permute.xlu1 %2630 }
 0x5ec   : > { %v5251_v48 = vsel %vm6041_vm11, %v5125_v45, %v2058_v17  ;;  %v2638_v31 = vsel %vm6042_vm9, %v5247_v52, %v4962_v49  ;;  %vm6048_vm11 = vcmask 220160   ;;  %vm6049_vm9 = vcmask 211968  }
 0x5ed   : > { %2648 = vst.msk [vmem:[#allocation5 + $0x340] sm:$0xff] %vm1812_vm10, %v2638_v31  ;;  %2782 = vrot.lane.b32.xlu1 %v4985_v55, %s5984_s13  ;;  %2856 = vrot.lane.b32.xlu0 %v4978_v13, %s5986_s1 }
 0x5ef   : > { %v2092_v60 = vpop.permute.xlu0 %2091  ;;  %v5261_v22 = vpop.permute.xlu1 %2669 }
 0x5f0   : > { %v5265_v37 = vsel %vm723_vm8, %v5123_v38, %v2092_v60  ;;  %v2677_v21 = vsel %vm6043_vm2, %v5261_v22, %v4976_v40  ;;  %v5285_v40 = vld [vmem:[#allocation9 + $0x8] sm:$0xff]  ;;  %vm6050_vm2 = vcmask 146432  }
 0x5f1   : > { %2687 = vst.msk [vmem:[#allocation5 + $0x368] sm:$0xff] %vm1812_vm10, %v2677_v21  ;;  %2821 = vrot.lane.b32.xlu1 %v4985_v55, %s5985_s0  ;;  %2029 = vrot.lane.b32.xlu0 %v4987_v35, %s6032_s2 }
 0x5f2   : > { %3408 = vmatprep.mubr.msk.f32.mxu1 %vm1812_vm10, %v5285_v40  ;;  %3409 = vmatprep.mubr.msk.f32.mxu0 %vm1812_vm10, %v5285_v40 }
 0x5f3   : > { %v2126_v49 = vpop.permute.xlu0 %2125  ;;  %v5275_v9 = vpop.permute.xlu1 %2708 }
 0x5f4   : > { %v5279_v12 = vsel %vm6044_vm4, %v5133_v11, %v2126_v49  ;;  %vm6051_vm4 = vcmask 949248  }
 0x5f5   : > { %2817 = vrot.lane.b32.xlu1 %v4978_v13, %s5985_s0  ;;  %2063 = vrot.lane.b32.xlu0 %v4987_v35, %s6033_s5 }
 0x5f7   : > { %v2160_v23 = vpop.permute.xlu0 %2159  ;;  %v1922_v44 = vpop.permute.xlu1 %1921 }
 0x5f8   : > { %v5293_v18 = vsel %vm6045_vm15, %v5131_v0, %v2160_v23  ;;  %v1929_v24 = vsel %vm6046_vm1, %v5111_v50, %v1922_v44  ;;  %v1930_v47 = vsel %vm6047_vm13, %v1922_v44, %v5203_v56  ;;  %vm6052_vm15 = vcmask 138240  }
 0x5f9   : > { %1927 = vrot.lane.b32.xlu1 %v4987_v35, %s5968_s29  ;;  %2097 = vrot.lane.b32.xlu0 %v4987_v35, %s5971_s17  ;;  %v3543_v7 = vpack.c.bf16 %v1930_v47, %v4978_v13  ;;  %v3545_v38 = vpack.c.bf16 %v1929_v24, %v4983_v51  ;;  %v3553_v24 = vpack.c.bf16 %v5251_v48, %v5237_v29  ;;  %vm6053_vm1 = vcmask 130048  }
 0x5fa   : > { %vm6054_vm13 = vcmask 875520  }
 0x5fb   : > { %v2196_v45 = vpop.permute.xlu0 %2195  ;;  %v5305_v11 = vpop.permute.xlu1 %1957  ;;  %3544 = vmatprep.subr.bf16.mxu1 %v3543_v7 }
 0x5fc   : > { %v5309_v50 = vsel %vm826_vm3, %v5141_v61, %v2196_v45  ;;  %v1964_v0 = vsel %vm589_vm12, %v1956_v39, %v5305_v11  ;;  %3546 = vmatpush1.bf16.msra.mxu1 %v3545_v38 }
 0x5fd   : > { %2131 = vrot.lane.b32.xlu0 %v4987_v35, %s6035_s27  ;;  %2860 = vrot.lane.b32.xlu1 %v4985_v55, %s5986_s1 }
 0x5ff   : > { %v2235_v13 = vpop.permute.xlu0 %2234  ;;  %v5317_v51 = vpop.permute.xlu1 %1991 }
 0x600   : > { %v5321_v10 = vsel %vm6048_vm11, %v5139_v33, %v2235_v13  ;;  %v1998_v61 = vsel %vm623_vm14, %v1990_v36, %v5317_v51  ;;  %vm6055_vm11 = vcmask 64512  }
 0x601   : > { %2165 = vrot.lane.b32.xlu0 %v4987_v35, %s6034_s23  ;;  %1961 = vrot.lane.b32.xlu1 %v4987_v35, %s6031_s30  ;;  %v3547_v39 = vpack.c.bf16 %v1998_v61, %v1964_v0  ;;  %v3557_v0 = vpack.c.bf16 %v5279_v12, %v5265_v37 }
 0x603   : > { %v2274_v31 = vpop.permute.xlu0 %2273  ;;  %v5331_v21 = vpop.permute.xlu1 %2025  ;;  %3548 = vmatprep.subr.bf16.mxu1 %v3547_v39 }
 0x604   : > { %v5335_v33 = vsel %vm6049_vm9, %v5149_v1, %v2274_v31  ;;  %v2032_v36 = vsel %vm656_vm7, %v2024_v25, %v5331_v21  ;;  %3550 = vmatpush1.bf16.msra.mxu1 %v3549_v30  ;;  %vm6056_vm9 = vcmask 867328  }
 0x605   : > { %2201 = vrot.lane.b32.xlu0 %v4987_v35, %s6036_s8  ;;  %1995 = vrot.lane.b32.xlu1 %v4987_v35, %s5970_s9  ;;  %s4020_s9 = smov [#allocation11]  }
 0x607   : > { %v2313_v44 = vpop.permute.xlu0 %2312  ;;  %v5343_v16 = vpop.permute.xlu1 %2059 }
 0x608   : > { %v5347_v8 = vsel %vm6050_vm2, %v5147_v28, %v2313_v44  ;;  %v2066_v1 = vsel %vm6051_vm4, %v2058_v17, %v5343_v16  ;;  %vm6057_vm2 = vcmask 56320   ;;  %vm6058_vm4 = vcmask 48128  }
 0x609   : > { %2238 = vrot.lane.b32.xlu0 %v4985_v55, %s5972_s12  ;;  %2027 = vrot.lane.b32.xlu1 %v4985_v55, %s6032_s2  ;;  %v3551_v25 = vpack.c.bf16 %v2066_v1, %v2032_v36  ;;  %v3561_v36 = vpack.c.bf16 %v5309_v50, %v5293_v18  ;;  %v3565_v50 = vpack.c.bf16 %v5335_v33, %v5321_v10 }
 0x60b   : > { %v2352_v47 = vpop.permute.xlu0 %2351  ;;  %v5357_v7 = vpop.permute.xlu1 %2093  ;;  %3552 = vmatprep.subr.bf16.mxu1 %v3551_v25 }
 0x60c   : > { %v5361_v28 = vsel %vm6052_vm15, %v5157_v42, %v2352_v47  ;;  %v2100_v17 = vsel %vm723_vm8, %v2092_v60, %v5357_v7  ;;  %3554 = vmatpush1.bf16.msra.mxu1 %v3553_v24  ;;  %vm6059_vm15 = vcmask 220160  }
 0x60d   : > { %2277 = vrot.lane.b32.xlu0 %v4985_v55, %s6037_s21  ;;  %2061 = vrot.lane.b32.xlu1 %v4985_v55, %s6033_s5 }
 0x60f   : > { %v2391_v38 = vpop.permute.xlu0 %2390  ;;  %v5369_v29 = vpop.permute.xlu1 %2127 }
 0x610   : > { %v5373_v48 = vsel %vm6053_vm1, %v5155_v53, %v2391_v38  ;;  %v2134_v42 = vsel %vm6054_vm13, %v2126_v49, %v5369_v29  ;;  %vm6060_vm1 = vcmask 211968   ;;  %vm6061_vm13 = vcmask 146432  }
 0x611   : > { %2316 = vrot.lane.b32.xlu0 %v4985_v55, %s5973_s19  ;;  %2095 = vrot.lane.b32.xlu1 %v4985_v55, %s5971_s17  ;;  %v3555_v60 = vpack.c.bf16 %v2134_v42, %v2100_v17 }
 0x613   : > { %v2430_v61 = vpop.permute.xlu0 %2429  ;;  %v5383_v39 = vpop.permute.xlu1 %2161  ;;  %3556 = vmatprep.subr.bf16.mxu1 %v3555_v60 }
 0x614   : > { %v5387_v53 = vsel %vm6055_vm11, %v5165_v57, %v2430_v61  ;;  %v2168_v49 = vsel %vm6056_vm9, %v2160_v23, %v5383_v39  ;;  %3558 = vmatpush1.bf16.msra.mxu1 %v3557_v0  ;;  %vm6062_vm11 = vcmask 457728   ;;  %vm6063_vm9 = vcmask 138240  }
 0x615   : > { %2355 = vrot.lane.b32.xlu0 %v4985_v55, %s6038_s24  ;;  %2129 = vrot.lane.b32.xlu1 %v4985_v55, %s6035_s27 }
 0x617   : > { %v2469_v30 = vpop.permute.xlu0 %2468  ;;  %v5395_v37 = vpop.permute.xlu1 %2197 }
 0x618   : > { %v5399_v12 = vsel %vm6057_vm2, %v5163_v3, %v2469_v30  ;;  %v2206_v57 = vsel %vm826_vm3, %v2196_v45, %v5395_v37  ;;  %vm6064_vm2 = vcmask 130048  }
 0x619   : > { %2394 = vrot.lane.b32.xlu0 %v4985_v55, %s5974_s20  ;;  %2163 = vrot.lane.b32.xlu1 %v4985_v55, %s6034_s23  ;;  %v3559_v23 = vpack.c.bf16 %v2206_v57, %v2168_v49 }
 0x61b   : > { %v2508_v1 = vpop.permute.xlu0 %2507  ;;  %v5409_v25 = vpop.permute.xlu1 %2236  ;;  %3560 = vmatprep.subr.bf16.mxu1 %v3559_v23 }
 0x61c   : > { %v2517_v3 = vsel %vm6058_vm4, %v5173_v46, %v2508_v1  ;;  %v2245_v45 = vsel %vm6059_vm15, %v2235_v13, %v5409_v25  ;;  %3562 = vmatpush1.bf16.msra.mxu1 %v3561_v36  ;;  %vm6065_vm4 = vcmask 64512   ;;  %vm6066_vm15 = vcmask 441344  }
 0x61d   : > { %2433 = vrot.lane.b32.xlu0 %v4985_v55, %s5975_s11  ;;  %2199 = vrot.lane.b32.xlu1 %v4985_v55, %s6036_s8 }
 0x61f   : > { %v2547_v24 = vpop.permute.xlu0 %2546  ;;  %v5419_v17 = vpop.permute.xlu1 %2275 }
 0x620   : > { %v2284_v18 = vsel %vm6060_vm1, %v2274_v31, %v5419_v17  ;;  %vm6067_vm1 = vcmask 56320  }
 0x621   : > { %2472 = vrot.lane.b32.xlu0 %v4985_v55, %s5976_s26  ;;  %2240 = vrot.lane.b32.xlu1 %v4987_v35, %s5972_s12  ;;  %v3563_v46 = vpack.c.bf16 %v2284_v18, %v2245_v45 }
 0x623   : > { %v5429_v13 = vpop.permute.xlu0 %2585  ;;  %v5431_v42 = vpop.permute.xlu1 %2314  ;;  %3564 = vmatprep.subr.bf16.mxu1 %v3563_v46 }
 0x624   : > { %v2323_v60 = vsel %vm6061_vm13, %v2313_v44, %v5431_v42  ;;  %3566 = vmatpush1.bf16.msra.mxu1 %v3565_v50  ;;  %vm6068_vm13 = vcmask 48128  }
 0x625   : > { %2511 = vrot.lane.b32.xlu0 %v4985_v55, %s5969_s16  ;;  %2279 = vrot.lane.b32.xlu1 %v4987_v35, %s6037_s21  ;;  %v3569_v55 = vpack.c.bf16 %v5361_v28, %v5347_v8  ;;  %s3687_s21 = smul.u32 640, %s4077_s25 }
 0x627   : > { %v2545_v31 = vpop.permute.xlu0 %2544  ;;  %v5439_v0 = vpop.permute.xlu1 %2353 }
 0x628   : > { %v2556_v10 = vsel %vm6062_vm11, %v2545_v31, %v2547_v24  ;;  %v2362_v33 = vsel %vm6063_vm9, %v2352_v47, %v5439_v0  ;;  %vm6069_vm9 = vcmask 367616  }
 0x629   : > { %2710 = vrot.lane.b32.xlu0 %v4925_v54, %s5980_s18  ;;  %2318 = vrot.lane.b32.xlu1 %v4987_v35, %s5973_s19  ;;  %v3567_v44 = vpack.c.bf16 %v2362_v33, %v2323_v60 }
 0x62b   : > { %v2625_v49 = vpop.permute.xlu0 %2624  ;;  %v5450_v57 = vpop.permute.xlu1 %2392  ;;  %3568 = vmatprep.subr.bf16.mxu1 %v3567_v44 }
 0x62c   : > { %v2401_v23 = vsel %vm6064_vm2, %v2391_v38, %v5450_v57  ;;  %3570 = vmatpush1.bf16.msra.mxu1 %v3569_v55  ;;  %v3573_v38 = vpack.c.bf16 %v5387_v53, %v5373_v48  ;;  %vm6070_vm2 = vcmask 449536   ;;  %v2732_v55 = vld [vmem:[#allocation4 + $0x30] sm:$0xff] }
 0x62d   : > { %2550 = vrot.lane.b32.xlu0 %v4987_v35, %s5977_s14  ;;  %2357 = vrot.lane.b32.xlu1 %v4987_v35, %s6038_s24 }
 0x62f   : > { %v5458_v54 = vpop.permute.xlu0 %2663  ;;  %v5460_v47 = vpop.permute.xlu1 %2431 }
 0x630   : > { %v2440_v8 = vsel %vm6065_vm4, %v2430_v61, %v5460_v47  ;;  %vm6071_vm4 = vmmov %vm6070_vm2 }
 0x631   : > { %2589 = vrot.lane.b32.xlu0 %v4987_v35, %s5978_s10  ;;  %2396 = vrot.lane.b32.xlu1 %v4987_v35, %s5974_s20  ;;  %v3571_v28 = vpack.c.bf16 %v2440_v8, %v2401_v23 }
 0x633   : > { %v2623_v36 = vpop.permute.xlu0 %2622  ;;  %v5470_v45 = vpop.permute.xlu1 %2470  ;;  %3572 = vmatprep.subr.bf16.mxu1 %v3571_v28 }
 0x634   : > { %v2634_v18 = vsel %vm6066_vm15, %v2623_v36, %v2625_v49  ;;  %v2479_v46 = vsel %vm6067_vm1, %v2469_v30, %v5470_v45  ;;  %3574 = vmatpush1.bf16.msra.mxu1 %v3573_v38  ;;  %v3577_v30 = vpack.c.bf16 %v2517_v3, %v5399_v12  ;;  %vm6072_vm1 = vcmask 375808  }
 0x635   : > { %2628 = vrot.lane.b32.xlu0 %v4987_v35, %s5979_s15  ;;  %2435 = vrot.lane.b32.xlu1 %v4987_v35, %s5975_s11 }
 0x637   : > { %v2703_v61 = vpop.permute.xlu0 %2702  ;;  %v5479_v50 = vpop.permute.xlu1 %2509 }
 0x638   : > { %v2518_v48 = vsel %vm6068_vm13, %v2508_v1, %v5479_v50  ;;  %vm6073_vm13 = vcmask 1039360  }
 0x639   : > { %2667 = vrot.lane.b32.xlu0 %v4987_v35, %s6029_s3  ;;  %2474 = vrot.lane.b32.xlu1 %v4987_v35, %s5976_s26  ;;  %v3575_v53 = vpack.c.bf16 %v2518_v48, %v2479_v46 }
 0x63b   : > { %v5488_v60 = vpop.permute.xlu0 %2741  ;;  %v5490_v31 = vpop.permute.xlu1 %2548  ;;  %3576 = vmatprep.subr.bf16.mxu1 %v3575_v53  ;;  %v2808_v53 = vld [vmem:[#allocation4 + $0x20] sm:$0xff] }
 0x63c   : > { %v2557_v33 = vsel %vm6062_vm11, %v2547_v24, %v5490_v31  ;;  %3578 = vmatpush1.bf16.msra.mxu1 %v3577_v30  ;;  %vm6074_vm11 = vmmov %vm6072_vm1 }
 0x63d   : > { %2706 = vrot.lane.b32.xlu0 %v4987_v35, %s5980_s18  ;;  %2513 = vrot.lane.b32.xlu1 %v4987_v35, %s5969_s16  ;;  %s5808_s16 = scalar_lea.hbm %s5857_s6, %s3687_s21  ;;  %s3890_s18 = sshll.u32 %s4020_s9, 4  ;;  %s3891_s18 = int_to_ptr.vmem [resolvable:$false] %s3890_s18 }
 0x63e   : > { %s3892_s10 = scalar_lea.vmem %s3891_s18, 1280 }
 0x63f   : > { %v2701_v1 = vpop.permute.xlu0 %2700  ;;  %v5498_v44 = vpop.permute.xlu1 %2587 }
 0x640   : > { %v2712_v12 = vsel %vm6069_vm9, %v2701_v1, %v2703_v61  ;;  %v2596_v3 = vsel %vm6070_vm2, %v5429_v13, %v5498_v44  ;;  %vm6075_vm2 = vcmask 359424  }
 0x641   : > { %2745 = vrot.lane.b32.xlu0 %v4987_v35, %s5981_s28  ;;  %2747 = vrot.lane.b32.xlu1 %v5025_v63, %s5981_s28  ;;  %v3579_v24 = vpack.c.bf16 %v2596_v3, %v2557_v33 }
 0x643   : > { %v2781_v23 = vpop.permute.xlu0 %2780  ;;  %v2584_v8 = vpop.permute.xlu1 %2583  ;;  %3580 = vmatprep.subr.bf16.mxu1 %v3579_v24 }
 0x644   : > { %v2595_v28 = vsel %vm6071_vm4, %v2584_v8, %v5429_v13  ;;  %vm6076_vm4 = vmmov %vm6075_vm2 }
 0x645   : > { %2784 = vrot.lane.b32.xlu0 %v4987_v35, %s5984_s13  ;;  %2749 = vrot.lane.b32.xlu1 %v2732_v55, %s5981_s28  ;;  %v3581_v38 = vpack.c.bf16 %v2595_v28, %v2556_v10 }
 0x647   : > { %v2820_v36 = vpop.permute.xlu0 %2819  ;;  %v5513_v46 = vpop.permute.xlu1 %2626  ;;  %3582 = vmatpush1.bf16.msra.mxu1 %v3581_v38 }
 0x648   : > { %v2635_v48 = vsel %vm6066_vm15, %v2625_v49, %v5513_v46  ;;  %vm6077_vm15 = vmmov %vm6073_vm13 }
 0x649   : > { %2823 = vrot.lane.b32.xlu0 %v2808_v53, %s5985_s0  ;;  %2786 = vrot.lane.b32.xlu1 %v5025_v63, %s5984_s13 }
 0x64b   : > { %v2779_v13 = vpop.permute.xlu0 %2778  ;;  %v5520_v30 = vpop.permute.xlu1 %2665 }
 0x64c   : > { %v2790_v35 = vsel %vm1380_vm0, %v2779_v13, %v2781_v23  ;;  %v2674_v10 = vsel %vm6072_vm1, %v5458_v54, %v5520_v30  ;;  %vm6081_vm1 = vcmask 949248  }
 0x64d   : > { %2788 = vrot.lane.b32.xlu0 %v2732_v55, %s5984_s13  ;;  %2825 = vrot.lane.b32.xlu1 %v5025_v63, %s5985_s0  ;;  %v3583_v49 = vpack.c.bf16 %v2674_v10, %v2635_v48  ;;  %v2848_v48 = vld [vmem:[#allocation4 + $0x28] sm:$0xff] }
 0x64f   : > { %v1926_v33 = vpop.permute.xlu0 %1925  ;;  %v2662_v1 = vpop.permute.xlu1 %2661  ;;  %3584 = vmatprep.subr.bf16.mxu1 %v3583_v49 }
 0x650   : > { %v1931_v3 = vsel %vm6073_vm13, %v5203_v56, %v1926_v33  ;;  %v2673_v24 = vsel %vm6074_vm11, %v2662_v1, %v5458_v54  ;;  %v3020_v56 = vld [vmem:[%s5855_s4] sm:$0xff]  ;;  %vm6082_vm13 = vmmov %vm6081_vm1  ;;  %vm6084_vm11 = vcmask 138240  }
 0x651   : > { %2862 = vrot.lane.b32.xlu0 %v2808_v53, %s5986_s1  ;;  %2827 = vrot.lane.b32.xlu1 %v2732_v55, %s5985_s0  ;;  %v3585_v8 = vpack.c.bf16 %v2673_v24, %v2634_v18  ;;  %s268_s0 = sand.u32 1, %s3948_s22  }
 0x652   : > { %s3295_s25 = scalar_lea.sflag [#allocation8], %s268_s0 }
 0x653   : > { %v2859_v28 = vpop.permute.xlu0 %2858  ;;  %v5535_v38 = vpop.permute.xlu1 %2704  ;;  %3586 = vmatpush1.bf16.msra.mxu1 %v3585_v8 }
 0x654   : > { %v2713_v63 = vsel %vm6069_vm9, %v2703_v61, %v5535_v38  ;;  %vm6085_vm9 = vcmask 875520  }
 0x655   : > { %2866 = vrot.lane.b32.xlu0 %v2732_v55, %s5986_s1  ;;  %2864 = vrot.lane.b32.xlu1 %v2848_v48, %s5986_s1  ;;  %s3686_s1 = smul.u32 40, %s268_s0 }
 0x657   : > { %v1960_v54 = vpop.permute.xlu0 %1959  ;;  %v5544_v53 = vpop.permute.xlu1 %2743  ;;  %s270_s23 = scalar_lea.vmem [#allocation11], %s3686_s1 }
 0x658   : > { %v5548_v18 = vsel %vm589_vm12, %v5305_v11, %v1960_v54  ;;  %v2752_v61 = vsel %vm6075_vm2, %v5488_v60, %v5544_v53  ;;  %vm6086_vm2 = vmmov %vm6085_vm9  ;;  %s3309_s24 = sshll.u32 %s270_s23, 4  ;;  %s5810_s24 = int_to_ptr.vmem [resolvable:$true] %s3309_s24 }
 0x659   : > { %v3587_v13 = vpack.c.bf16 %v2752_v61, %v2713_v63  ;;  %3023 = vperm.xlu1 %3809, %v3020_v56   ;;  %s3886_s17 = scalar_lea.vmem %s5810_s24, 640  ;;  %p3893_p4 = scmp.lt.s32.totalorder %s5810_s24, %s3891_s18 }
 0x65a   : > { %p3887_p12 = scmp.ne.s32.totalorder %s5810_s24, %s3886_s17  ;;  %p3894_p7 = scmp.lt.s32.totalorder %s3892_s10, %s3886_s17 }
 0x65b   : > { %v1994_v55 = vpop.permute.xlu0 %1993  ;;  %v2740_v10 = vpop.permute.xlu1 %2739  ;;  %3588 = vmatprep.subr.bf16.mxu1 %v3587_v13 }
 0x65c   : > { %v5555_v49 = vsel %vm623_vm14, %v5317_v51, %v1994_v55  ;;  %v2751_v1 = vsel %vm6076_vm4, %v2740_v10, %v5488_v60  ;;  %vm6088_vm4 = vcmask 867328   ;;  %p3888_p2 = pnand %p3887_p12, %p6125_p1  ;;  %p3895_p8 = por %p3894_p7, %p3893_p4 }
 0x65d   : > { %v3589_v24 = vpack.c.bf16 %v2751_v1, %v2712_v12 }
 0x65e   : > { %p3889_p3 = pneg %p3888_p2 }
 0x65f   : > { %v2857_v8 = vpop.permute.xlu0 %2856  ;;  %v5559_v11 = vpop.permute.xlu1 %2782  ;;  %3590 = vmatpush1.bf16.msra.mxu1 %v3589_v24 }
 0x660   : > { %v2868_v48 = vsel %vm1454_vm6, %v2857_v8, %v2859_v28  ;;  %v2791_v63 = vsel %vm1380_vm0, %v2781_v23, %v5559_v11  ;;  %p3896_p11 = pnand %p3895_p8, %p3889_p3 }
 0x663   : > { %v2030_v56 = vpop.permute.xlu0 %2029  ;;  %v5564_v61 = vpop.permute.xlu1 %2821 }
 0x664   : > { %2044 = vst.msk [vmem:[#allocation5 + $0xc0] sm:$0xff] %vm1812_vm10, %v2030_v56  ;;  %v2830_v51 = vsel %vm1417_vm5, %v2820_v36, %v5564_v61 }
 0x665   : > { %v3591_v13 = vpack.c.bf16 %v2830_v51, %v2791_v63  ;;  %v2888_v63 = vld [vmem:[#allocation5 + $0x18] sm:$0xff] }
 0x667   : > { %v2064_v60 = vpop.permute.xlu0 %2063  ;;  %v2818_v12 = vpop.permute.xlu1 %2817  ;;  %3592 = vmatprep.subr.bf16.mxu1 %v3591_v13  ;;  %v3597_v13 = vpack.c.bf16 %v1931_v3, %v2887_v2  ;;  %v6078_v2 = vmov 0.0|0.0   ;;  %v2889_v3 = vld [vmem:[#allocation5 + $0x20] sm:$0xff] }
 0x668   : > { %2078 = vst.msk [vmem:[#allocation5 + $0xe8] sm:$0xff] %vm1812_vm10, %v2064_v60  ;;  %v2829_v10 = vsel %vm1417_vm5, %v2818_v12, %v2820_v36 }
 0x669   : > { %v3593_v1 = vpack.c.bf16 %v2829_v10, %v2790_v35  ;;  %v5585_v35 = vld [vmem:[#allocation9] sm:$0xff] }
 0x66b   : > { %v5571_v24 = vpop.permute.xlu0 %2097  ;;  %v1928_v23 = vpop.permute.xlu1 %1927  ;;  %3594 = vmatpush1.bf16.msra.mxu1 %v3593_v1 }
 0x66c   : > { %2112 = vst.msk [vmem:[#allocation5 + $0x110] sm:$0xff] %vm1812_vm10, %v5571_v24  ;;  %v1932_v8 = vsel %vm6077_vm15, %v1926_v33, %v1928_v23  ;;  %1942 = vst.msk [vmem:[#allocation5 + $0x48] sm:$0xff] %vm1812_vm10, %v1928_v23 }
 0x66d   : > { %v3595_v51 = vpack.c.bf16 %v1932_v8, %v2888_v63  ;;  %vm6089_vm15 = vmmov %vm6088_vm4 }
 0x66f   : > { %v5577_v43 = vpop.permute.xlu0 %2131  ;;  %v5579_v34 = vpop.permute.xlu1 %2860  ;;  %3596 = vmatprep.subr.bf16.mxu0 %v3595_v51 }
 0x670   : > { %2146 = vst.msk [vmem:[#allocation5 + $0x138] sm:$0xff] %vm1812_vm10, %v5577_v43  ;;  %v2869_v36 = vsel %vm1454_vm6, %v2859_v28, %v5579_v34  ;;  %3598 = vmatpush1.bf16.msra.mxu0 %v3597_v13 }
 0x671   : > { %3081 = vmatprep.subr.mxu1 %v2869_v36 }
 0x672   : > { %3082 = vmatpush1.msra.mxu1 %v2868_v48 }
 0x673   : > { %v5587_v33 = vpop.permute.xlu0 %2165  ;;  %v1962_v12 = vpop.permute.xlu1 %1961  ;;  %3647 = vmatprep.subr.bf16.mxu1 %v6078_v2  ;;  %3094 = vmatmul.mubr.f32.vlgmr.msra.gmra.mrb[2].mxu1 %v5585_v35  ;;  %v2894_v10 = vld [vmem:[#allocation5 + $0x48] sm:$0xff] }
 0x674   : > { %2180 = vst.msk [vmem:[#allocation5 + $0x160] sm:$0xff] %vm1812_vm10, %v5587_v33  ;;  %v1966_v1 = vsel %vm589_vm12, %v1960_v54, %v1962_v12  ;;  %1976 = vst.msk [vmem:[#allocation5 + $0x70] sm:$0xff] %vm1812_vm10, %v1962_v12  ;;  %v3648_v28 = vpack.c.bf16 %v2894_v10, %v2889_v3  ;;  %3410 = vmatprep.mubr.msk.f32.mxu1 %vm1812_vm10, %v5285_v40  ;;  %v3601_v40 = vpack.c.bf16 %v5555_v49, %v5548_v18  ;;  %vm6079_vm12 = vcmask 220160  }
 0x676   : > { %3649 = vmatpush1.bf16.msra.mxu1 %v3648_v28 }
 0x677   : > { %v5597_v48 = vpop.permute.xlu0 %2201  ;;  %v1996_v23 = vpop.permute.xlu1 %1995  ;;  %3650 = vmatprep.subr.bf16.mxu1 %v6078_v2 }
 0x678   : > { %v2209_v8 = vsel %vm826_vm3, %v5597_v48, %v5181_v26  ;;  %v2000_v63 = vsel %vm623_vm14, %v1994_v55, %v1996_v23  ;;  %2010 = vst.msk [vmem:[#allocation5 + $0x98] sm:$0xff] %vm1812_vm10, %v1996_v23  ;;  %vm6080_vm14 = vcmask 211968  }
 0x679   : > { %2219 = vst.msk [vmem:[#allocation5 + $0x188] sm:$0xff] %vm1812_vm10, %v2209_v8  ;;  %v3599_v54 = vpack.c.bf16 %v2000_v63, %v1966_v1 }
 0x67b   : > { %v5608_v51 = vpop.permute.xlu0 %2238  ;;  %v2028_v13 = vpop.permute.xlu1 %2027  ;;  %3600 = vmatprep.subr.bf16.mxu0 %v3599_v54  ;;  %v2899_v10 = vld [vmem:[#allocation5 + $0x70] sm:$0xff]  ;;  %v2909_v54 = vld [vmem:[#allocation5 + $0xc0] sm:$0xff] }
 0x67c   : > { %v5613_v36 = vsel %vm6079_vm12, %v5409_v25, %v5608_v51  ;;  %v2033_v26 = vsel %vm656_vm7, %v5331_v21, %v2028_v13  ;;  %v2034_v55 = vsel %vm656_vm7, %v2028_v13, %v2030_v56  ;;  %3602 = vmatpush1.bf16.msra.mxu0 %v3601_v40  ;;  %v2914_v21 = vld [vmem:[#allocation5 + $0xe8] sm:$0xff]  ;;  %vm6083_vm7 = vcmask 146432   ;;  %v2924_v13 = vld [vmem:[#allocation5 + $0x138] sm:$0xff] }
 0x67d   : > { %v3654_v40 = vpack.c.bf16 %v2914_v21, %v2909_v54  ;;  %vm6090_vm12 = vcmask 64512  }
 0x67f   : > { %v5618_v12 = vpop.permute.xlu0 %2277  ;;  %v2062_v3 = vpop.permute.xlu1 %2061  ;;  %v2904_v18 = vld [vmem:[#allocation5 + $0x98] sm:$0xff] }
 0x680   : > { %v5623_v49 = vsel %vm6080_vm14, %v5419_v17, %v5618_v12  ;;  %v2067_v25 = vsel %vm6081_vm1, %v5343_v16, %v2062_v3  ;;  %v2068_v1 = vsel %vm6082_vm13, %v2062_v3, %v2064_v60  ;;  %v3651_v28 = vpack.c.bf16 %v2904_v18, %v2899_v10  ;;  %v2919_v3 = vld [vmem:[#allocation5 + $0x110] sm:$0xff]  ;;  %v2934_v18 = vld [vmem:[#allocation5 + $0x188] sm:$0xff] }
 0x681   : > { %v3603_v23 = vpack.c.bf16 %v2068_v1, %v2034_v55  ;;  %v3605_v56 = vpack.c.bf16 %v2067_v25, %v2033_v26  ;;  %vm6091_vm14 = vcmask 56320   ;;  %vm6092_vm1 = vcmask 220160  }
 0x682   : > { %3652 = vmatpush1.bf16.msra.mxu1 %v3651_v28  ;;  %vm6093_vm13 = vmmov %vm6092_vm1 }
 0x683   : > { %v5628_v8 = vpop.permute.xlu0 %2316  ;;  %v2096_v63 = vpop.permute.xlu1 %2095  ;;  %3653 = vmatprep.subr.bf16.mxu1 %v6078_v2  ;;  %3604 = vmatprep.subr.bf16.mxu0 %v3603_v23  ;;  %v2929_v23 = vld [vmem:[#allocation5 + $0x160] sm:$0xff] }
 0x684   : > { %v5634_v17 = vsel %vm6083_vm7, %v5431_v42, %v5628_v8  ;;  %v2101_v16 = vsel %vm723_vm8, %v5357_v7, %v2096_v63  ;;  %v2102_v60 = vsel %vm723_vm8, %v2096_v63, %v5571_v24  ;;  %3606 = vmatpush1.bf16.msra.mxu0 %v3605_v56  ;;  %v3657_v24 = vpack.c.bf16 %v2924_v13, %v2919_v3 }
 0x685   : > { %vm6087_vm8 = vcmask 130048   ;;  %v3660_v56 = vpack.c.bf16 %v2934_v18, %v2929_v23  ;;  %vm6095_vm7 = vcmask 211968  }
 0x686   : > { %3655 = vmatpush1.bf16.msra.mxu1 %v3654_v40 }
 0x687   : > { %v2356_v26 = vpop.permute.xlu0 %2355  ;;  %v2130_v55 = vpop.permute.xlu1 %2129  ;;  %3656 = vmatprep.subr.bf16.mxu1 %v6078_v2 }
 0x688   : > { %v5643_v10 = vsel %vm6084_vm11, %v5439_v0, %v2356_v26  ;;  %v2135_v42 = vsel %vm6085_vm9, %v5369_v29, %v2130_v55  ;;  %v2136_v7 = vsel %vm6086_vm2, %v2130_v55, %v5577_v43  ;;  %vm6096_vm11 = vmmov %vm6095_vm7  ;;  %vm6097_vm9 = vcmask 367616  }
 0x689   : > { %v3607_v25 = vpack.c.bf16 %v2136_v7, %v2102_v60  ;;  %v3609_v1 = vpack.c.bf16 %v2135_v42, %v2101_v16  ;;  %v3617_v7 = vpack.c.bf16 %v5623_v49, %v5613_v36  ;;  %vm6098_vm2 = vcmask 146432  }
 0x68a   : > { %3658 = vmatpush1.bf16.msra.mxu1 %v3657_v24 }
 0x68b   : > { %v5649_v28 = vpop.permute.xlu0 %2394  ;;  %v2164_v21 = vpop.permute.xlu1 %2163  ;;  %3659 = vmatprep.subr.bf16.mxu1 %v6078_v2  ;;  %3608 = vmatprep.subr.bf16.mxu0 %v3607_v25 }
 0x68c   : > { %v5655_v0 = vsel %vm6087_vm8, %v5450_v57, %v5649_v28  ;;  %v2169_v43 = vsel %vm6088_vm4, %v5383_v39, %v2164_v21  ;;  %v2170_v29 = vsel %vm6089_vm15, %v2164_v21, %v5587_v33  ;;  %3610 = vmatpush1.bf16.msra.mxu0 %v3609_v1  ;;  %vm6099_vm8 = vmmov %vm6098_vm2  ;;  %vm6100_vm4 = vcmask 457728  }
 0x68d   : > { %vm6101_vm15 = vmmov %vm6100_vm4 }
 0x68e   : > { %3661 = vmatpush1.bf16.msra.mxu1 %v3660_v56 }
 0x68f   : > { %v2434_v63 = vpop.permute.xlu0 %2433  ;;  %v2200_v54 = vpop.permute.xlu1 %2199  ;;  %3662 = vmatprep.subr.bf16.mxu1 %v6078_v2 }
 0x690   : > { %v5664_v16 = vsel %vm6090_vm12, %v5460_v47, %v2434_v63  ;;  %v2207_v57 = vsel %vm826_vm3, %v5395_v37, %v2200_v54  ;;  %v2208_v39 = vsel %vm826_vm3, %v2200_v54, %v5597_v48  ;;  %vm6094_vm3 = vcmask 48128  }
 0x691   : > { %v3611_v60 = vpack.c.bf16 %v2208_v39, %v2170_v29  ;;  %v3613_v40 = vpack.c.bf16 %v2207_v57, %v2169_v43  ;;  %vm6102_vm12 = vcmask 138240  }
 0x693   : > { %v5670_v33 = vpop.permute.xlu0 %2472  ;;  %v2241_v13 = vpop.permute.xlu1 %2240  ;;  %3612 = vmatprep.subr.bf16.mxu0 %v3611_v60 }
 0x694   : > { %v5675_v55 = vsel %vm6091_vm14, %v5470_v45, %v5670_v33  ;;  %v2247_v47 = vsel %vm6092_vm1, %v5608_v51, %v2241_v13  ;;  %v2248_v37 = vsel %vm6093_vm13, %v2241_v13, %v5171_v4  ;;  %3614 = vmatpush1.bf16.msra.mxu0 %v3613_v40  ;;  %vm6103_vm14 = vmmov %vm6102_vm12  ;;  %vm6104_vm1 = vcmask 449536  }
 0x695   : > { %2258 = vst.msk [vmem:[#allocation5 + $0x1b0] sm:$0xff] %vm1812_vm10, %v2248_v37  ;;  %vm6105_vm13 = vmmov %vm6104_vm1 }
 0x697   : > { %v5682_v48 = vpop.permute.xlu0 %2511  ;;  %v2280_v3 = vpop.permute.xlu1 %2279 }
 0x698   : > { %v5687_v42 = vsel %vm6094_vm3, %v5479_v50, %v5682_v48  ;;  %v2286_v45 = vsel %vm6095_vm7, %v5618_v12, %v2280_v3  ;;  %v2287_v51 = vsel %vm6096_vm11, %v2280_v3, %v5189_v62  ;;  %vm6106_vm3 = vcmask 130048  }
 0x699   : > { %2297 = vst.msk [vmem:[#allocation5 + $0x1d8] sm:$0xff] %vm1812_vm10, %v2287_v51  ;;  %v3615_v4 = vpack.c.bf16 %v2286_v45, %v2247_v47  ;;  %vm6107_vm7 = vmmov %vm6106_vm3  ;;  %vm6108_vm11 = vcmask 441344  }
 0x69b   : > { %v2711_v24 = vpop.permute.xlu0 %2710  ;;  %v2319_v18 = vpop.permute.xlu1 %2318  ;;  %3616 = vmatprep.subr.bf16.mxu0 %v3615_v4 }
 0x69c   : > { %v2716_v25 = vsel %vm6097_vm9, %v5275_v9, %v2711_v24  ;;  %v2325_v50 = vsel %vm6098_vm2, %v5628_v8, %v2319_v18  ;;  %v2326_v12 = vsel %vm6099_vm8, %v2319_v18, %v5179_v58  ;;  %3618 = vmatpush1.bf16.msra.mxu0 %v3617_v7  ;;  %v2939_v21 = vld [vmem:[#allocation5 + $0x1b0] sm:$0xff]  ;;  %vm6109_vm9 = vmmov %vm6108_vm11  ;;  %vm6110_vm2 = vcmask 64512  }
 0x69d   : > { %2726 = vst.msk [vmem:[#allocation5 + $0x390] sm:$0xff] %vm1812_vm10, %v2716_v25  ;;  %2336 = vst.msk [vmem:[#allocation5 + $0x200] sm:$0xff] %vm1812_vm10, %v2326_v12  ;;  %v3629_v24 = vpack.c.bf16 %v5687_v42, %v5675_v55 }
 0x69e   : > { %vm6111_vm8 = vmmov %vm6110_vm2 }
 0x69f   : > { %v2551_v62 = vpop.permute.xlu0 %2550  ;;  %v2358_v1 = vpop.permute.xlu1 %2357 }
 0x6a0   : > { %v5706_v36 = vsel %vm6100_vm4, %v5490_v31, %v2551_v62  ;;  %v5710_v49 = vsel %vm6101_vm15, %v2551_v62, %v5220_v59  ;;  %v2364_v8 = vsel %vm6102_vm12, %v2356_v26, %v2358_v1  ;;  %v2365_v58 = vsel %vm6103_vm14, %v2358_v1, %v5197_v14  ;;  %v2944_v23 = vld [vmem:[#allocation5 + $0x1d8] sm:$0xff] }
 0x6a1   : > { %2375 = vst.msk [vmem:[#allocation5 + $0x228] sm:$0xff] %vm1812_vm10, %v2365_v58  ;;  %v3663_v43 = vpack.c.bf16 %v2944_v23, %v2939_v21  ;;  %v3619_v29 = vpack.c.bf16 %v2364_v8, %v2325_v50  ;;  %v3621_v31 = vpack.c.bf16 %v5643_v10, %v5634_v17  ;;  %vm6112_vm4 = vcmask 375808   ;;  %v2984_v8 = vld [vmem:[#allocation5 + $0x318] sm:$0xff] }
 0x6a2   : > { %vm6113_vm15 = vmmov %vm6112_vm4  ;;  %vm6114_vm12 = vcmask 56320  }
 0x6a3   : > { %v2590_v56 = vpop.permute.xlu0 %2589  ;;  %3664 = vmatpush1.bf16.msra.mxu1 %v3663_v43  ;;  %v2397_v54 = vpop.permute.xlu1 %2396  ;;  %3620 = vmatprep.subr.bf16.mxu0 %v3619_v29  ;;  %vm6115_vm14 = vmmov %vm6114_vm12  ;;  %v2979_v29 = vld [vmem:[#allocation5 + $0x2f0] sm:$0xff] }
 0x6a4   : > { %v2597_v59 = vsel %vm6104_vm1, %v5498_v44, %v2590_v56  ;;  %v2598_v26 = vsel %vm6105_vm13, %v2590_v56, %v5233_v27  ;;  %v2403_v14 = vsel %vm6106_vm3, %v5649_v28, %v2397_v54  ;;  %v2404_v57 = vsel %vm6107_vm7, %v2397_v54, %v5187_v5  ;;  %3665 = vmatprep.subr.bf16.mxu1 %v6078_v2  ;;  %v2949_v5 = vld [vmem:[#allocation5 + $0x200] sm:$0xff]  ;;  %v2994_v54 = vld [vmem:[#allocation5 + $0x368] sm:$0xff] }
 0x6a5   : > { %2414 = vst.msk [vmem:[#allocation5 + $0x250] sm:$0xff] %vm1812_vm10, %v2404_v57  ;;  %3622 = vmatpush1.bf16.msra.mxu0 %v3621_v31  ;;  %vm6116_vm1 = vcmask 367616   ;;  %vm6118_vm3 = vcmask 48128   ;;  %v3633_v25 = vpack.c.bf16 %v2597_v59, %v5706_v36  ;;  %v3675_v56 = vpack.c.bf16 %v2984_v8, %v2979_v29 }
 0x6a6   : > { %vm6117_vm13 = vmmov %vm6116_vm1 }
 0x6a7   : > { %v2629_v39 = vpop.permute.xlu0 %2628  ;;  %v2436_v60 = vpop.permute.xlu1 %2435  ;;  %vm6119_vm7 = vmmov %vm6118_vm3 }
 0x6a8   : > { %v5730_v17 = vsel %vm6108_vm11, %v5513_v46, %v2629_v39  ;;  %v2637_v27 = vsel %vm6109_vm9, %v2629_v39, %v5247_v52  ;;  %v2442_v44 = vsel %vm6110_vm2, %v2434_v63, %v2436_v60  ;;  %v2443_v10 = vsel %vm6111_vm8, %v2436_v60, %v5205_v15  ;;  %v2954_v28 = vld [vmem:[#allocation5 + $0x228] sm:$0xff] }
 0x6a9   : > { %2453 = vst.msk [vmem:[#allocation5 + $0x278] sm:$0xff] %vm1812_vm10, %v2443_v10  ;;  %v3666_v40 = vpack.c.bf16 %v2954_v28, %v2949_v5  ;;  %v3623_v13 = vpack.c.bf16 %v2442_v44, %v2403_v14  ;;  %v3625_v46 = vpack.c.bf16 %v5664_v16, %v5655_v0  ;;  %vm6120_vm11 = vcmask 359424  }
 0x6aa   : > { %vm6121_vm9 = vmmov %vm6120_vm11 }
 0x6ab   : > { %v2668_v47 = vpop.permute.xlu0 %2667  ;;  %3667 = vmatpush1.bf16.msra.mxu1 %v3666_v40  ;;  %v2475_v37 = vpop.permute.xlu1 %2474  ;;  %3624 = vmatprep.subr.bf16.mxu0 %v3623_v13  ;;  %vm6122_vm2 = vmmov %vm6121_vm9  ;;  %v2999_v40 = vld [vmem:[#allocation5 + $0x390] sm:$0xff] }
 0x6ac   : > { %v2675_v52 = vsel %vm6112_vm4, %v5520_v30, %v2668_v47  ;;  %v2676_v63 = vsel %vm6113_vm15, %v2668_v47, %v5261_v22  ;;  %v2481_v15 = vsel %vm6114_vm12, %v5670_v33, %v2475_v37  ;;  %v2482_v3 = vsel %vm6115_vm14, %v2475_v37, %v5195_v6  ;;  %3668 = vmatprep.subr.bf16.mxu1 %v6078_v2  ;;  %v2959_v6 = vld [vmem:[#allocation5 + $0x250] sm:$0xff] }
 0x6ad   : > { %2492 = vst.msk [vmem:[#allocation5 + $0x2a0] sm:$0xff] %vm1812_vm10, %v2482_v3  ;;  %3626 = vmatpush1.bf16.msra.mxu0 %v3625_v46  ;;  %v3635_v55 = vpack.c.bf16 %v2676_v63, %v2637_v27  ;;  %v3637_v58 = vpack.c.bf16 %v2675_v52, %v5730_v17  ;;  %v3829_v3 = vld [vmem:[#allocation2 + $0x10] sm:$0xff] }
 0x6af   : > { %v2707_v45 = vpop.permute.xlu0 %2706  ;;  %v2514_v51 = vpop.permute.xlu1 %2513 }
 0x6b0   : > { %v2714_v0 = vsel %vm6116_vm1, %v5535_v38, %v2707_v45  ;;  %v2715_v30 = vsel %vm6117_vm13, %v2707_v45, %v5275_v9  ;;  %v2520_v22 = vsel %vm6118_vm3, %v5682_v48, %v2514_v51  ;;  %v2521_v16 = vsel %vm6119_vm7, %v2514_v51, %v5211_v32  ;;  %v2964_v33 = vld [vmem:[#allocation5 + $0x278] sm:$0xff] }
 0x6b1   : > { %2531 = vst.msk [vmem:[#allocation5 + $0x2c8] sm:$0xff] %vm1812_vm10, %v2521_v16  ;;  %v3669_v4 = vpack.c.bf16 %v2964_v33, %v2959_v6  ;;  %v3627_v7 = vpack.c.bf16 %v2520_v22, %v2481_v15  ;;  %v3631_v9 = vpack.c.bf16 %v2598_v26, %v5710_v49 }
 0x6b3   : > { %v2746_v18 = vpop.permute.xlu0 %2745  ;;  %3670 = vmatpush1.bf16.msra.mxu1 %v3669_v4  ;;  %v2748_v38 = vpop.permute.xlu1 %2747  ;;  %3628 = vmatprep.subr.bf16.mxu0 %v3627_v7 }
 0x6b4   : > { %v2753_v48 = vsel %vm6120_vm11, %v5544_v53, %v2746_v18  ;;  %v2754_v32 = vsel %vm6121_vm9, %v2746_v18, %v2748_v38  ;;  %3671 = vmatprep.subr.bf16.mxu1 %v6078_v2  ;;  %3630 = vmatpush1.bf16.msra.mxu0 %v3629_v24  ;;  %v2969_v1 = vld [vmem:[#allocation5 + $0x2a0] sm:$0xff] }
 0x6b5   : > { %3632 = vmatprep.subr.bf16.mxu0 %v3631_v9  ;;  %v3639_v23 = vpack.c.bf16 %v2754_v32, %v2715_v30  ;;  %v3641_v31 = vpack.c.bf16 %v2753_v48, %v2714_v0  ;;  %v6123_v48 = vld [vmem:[#allocation21_spill] sm:$0xff] }
 0x6b7   : > { %v2785_v50 = vpop.permute.xlu0 %2784  ;;  %v2750_v12 = vpop.permute.xlu1 %2749 }
 0x6b8   : > { %v2792_v42 = vsel %vm1380_vm0, %v5559_v11, %v2785_v50  ;;  %v2755_v62 = vsel %vm6122_vm2, %v2748_v38, %v2750_v12  ;;  %v2974_v49 = vld [vmem:[#allocation5 + $0x2c8] sm:$0xff]  ;;  %3634 = vmatpush1.bf16.msra.mxu0 %v3633_v25 }
 0x6b9   : > { %2765 = vst.msk [vmem:[#allocation5 + $0x3b8] sm:$0xff] %vm1812_vm10, %v2755_v62  ;;  %v3672_v53 = vpack.c.bf16 %v2974_v49, %v2969_v1  ;;  %3636 = vmatprep.subr.bf16.mxu0 %v3635_v55  ;;  %v6124_v12 = vld [vmem:[#allocation22_spill] sm:$0xff] }
 0x6bb   : > { %v2824_v21 = vpop.permute.xlu0 %2823  ;;  %3673 = vmatpush1.bf16.msra.mxu1 %v3672_v53  ;;  %v2787_v36 = vpop.permute.xlu1 %2786 }
 0x6bc   : > { %v2831_v43 = vsel %vm1417_vm5, %v5564_v61, %v2824_v21  ;;  %v2793_v11 = vsel %vm1380_vm0, %v2785_v50, %v2787_v36  ;;  %3674 = vmatprep.subr.bf16.mxu1 %v6078_v2  ;;  %3638 = vmatpush1.bf16.msra.mxu0 %v3637_v58  ;;  %v2989_v61 = vld [vmem:[#allocation5 + $0x340] sm:$0xff] }
 0x6bd   : > { %3640 = vmatprep.subr.bf16.mxu0 %v3639_v23  ;;  %v3678_v39 = vpack.c.bf16 %v2994_v54, %v2989_v61  ;;  %v3645_v27 = vpack.c.bf16 %v2831_v43, %v2792_v42 }
 0x6bf   : > { %v2789_v59 = vpop.permute.xlu0 %2788  ;;  %3676 = vmatpush1.bf16.msra.mxu1 %v3675_v56  ;;  %v2826_v26 = vpop.permute.xlu1 %2825 }
 0x6c0   : > { %v2794_v14 = vsel %vm1380_vm0, %v2787_v36, %v2789_v59  ;;  %v2832_v57 = vsel %vm1417_vm5, %v2824_v21, %v2826_v26  ;;  %3677 = vmatprep.subr.bf16.mxu1 %v6078_v2  ;;  %3642 = vmatpush1.bf16.msra.mxu0 %v3641_v31  ;;  %v3004_v17 = vld [vmem:[#allocation5 + $0x3b8] sm:$0xff] }
 0x6c1   : > { %2804 = vst.msk [vmem:[#allocation5 + $0x3e0] sm:$0xff] %vm1812_vm10, %v2794_v14  ;;  %v3643_v60 = vpack.c.bf16 %v2832_v57, %v2793_v11  ;;  %v3681_v13 = vpack.c.bf16 %v3004_v17, %v2999_v40 }
 0x6c3   : > { %v2863_v44 = vpop.permute.xlu0 %2862  ;;  %3679 = vmatpush1.bf16.msra.mxu1 %v3678_v39  ;;  %v2828_v10 = vpop.permute.xlu1 %2827  ;;  %3644 = vmatprep.subr.bf16.mxu0 %v3643_v60 }
 0x6c4   : > { %v2870_v5 = vsel %vm1454_vm6, %v5579_v34, %v2863_v44  ;;  %v2833_v28 = vsel %vm1417_vm5, %v2826_v26, %v2828_v10  ;;  %3680 = vmatprep.subr.bf16.mxu1 %v6078_v2  ;;  %3646 = vmatpush1.bf16.msra.mxu0 %v3645_v27 }
 0x6c5   : > { %2843 = vst.msk [vmem:[#allocation5 + $0x408] sm:$0xff] %vm1812_vm10, %v2833_v28 }
 0x6c7   : > { %v2867_v47 = vpop.permute.xlu0 %2866  ;;  %3682 = vmatpush1.bf16.msra.mxu1 %v3681_v13  ;;  %v2865_v37 = vpop.permute.xlu1 %2864 }
 0x6c8   : > { %v2871_v46 = vsel %vm1454_vm6, %v2863_v44, %v2865_v37  ;;  %v2872_v52 = vsel %vm1454_vm6, %v2865_v37, %v2867_v47  ;;  %3683 = vmatprep.subr.bf16.mxu1 %v6078_v2  ;;  %v3009_v34 = vld [vmem:[#allocation5 + $0x3e0] sm:$0xff] }
 0x6c9   : > { %2882 = vst.msk [vmem:[#allocation5 + $0x430] sm:$0xff] %vm1812_vm10, %v2872_v52  ;;  %3152 = vmatprep.subr.mxu0 %v2871_v46 }
 0x6ca   : > { %3153 = vmatpush1.msra.mxu0 %v2870_v5 }
 0x6cb   : > { %3165 = vmatmul.mubr.f32.vlgmr.msra.gmra.mrb[4].mxu0 %v5585_v35 }
 0x6cc   : > { %v3014_v63 = vld [vmem:[#allocation5 + $0x408] sm:$0xff] }
 0x6cd   : > { %v3684_v15 = vpack.c.bf16 %v3014_v63, %v3009_v34 }
 0x6cf   : > { %3685 = vmatpush1.bf16.msra.mxu1 %v3684_v15 }
 0x6d0   : > { %3223 = vmatprep.subr.mxu1 %v3829_v3  ;;  %v3019_v45 = vld [vmem:[#allocation5 + $0x430] sm:$0xff] }
 0x6d3   : > { %3224 = vmatpush1.msra.mxu1 %v3019_v45 }
 0x6d4   : > { %3236 = vmatmul.mubr.f32.vlgmr.msra.gmra.mrb[4].mxu1 %v5585_v35 }
 0x6d8   : > { %v3024_v30 = vpop.permute.xlu1 %3023 }
 0x746   : > { %v3095_v51 = vpop.f32.mrb[2].mxu1 }
 0x747   : > { %v3097_v0 = vpop.f32.mrb[3].mxu1  ;;  %v3096_v2 = vadd.f32 %v3095_v51, %v3024_v30 }
 0x748   : > { %v3098_v22 = vadd.f32 %v3097_v0, %v3024_v30 }
 0x749   : > { %v3241_v4 = vmul.f32 %v3096_v2, %v4934_v20 }
 0x74a   : > { %v3242_v7 = vmul.f32 %v3098_v22, %v4936_v19 }
 0x74c   : > { %v3246_v38 = vadd.f32 %v3242_v7, %v3241_v4 }
 0x79e   : > { %v3166_v16 = vpop.f32.mrb[4].mxu0 }
 0x79f   : > { %v3167_v6 = vadd.f32 %v3166_v16, %v3024_v30  ;;  %v3168_v33 = vpop.f32.mrb[5].mxu0 }
 0x7a0   : > { %v3169_v18 = vadd.f32 %v3168_v33, %v3024_v30 }
 0x7a1   : > { %v3243_v24 = vmul.f32 %v3167_v6, %v4940_v41 }
 0x7a2   : > { %v3244_v32 = vmul.f32 %v3169_v18, %v6123_v48 }
 0x7a3   : > { %v3247_v9 = vadd.f32 %v3246_v38, %v3243_v24 }
 0x7a5   : > { %v3248_v42 = vadd.f32 %v3247_v9, %v3244_v32 }
 0x7a7   : > { %v3237_v35 = vpop.f32.mrb[4].mxu1 }
 0x7a8   : > { %v3238_v25 = vadd.f32 %v3237_v35, %v3024_v30  ;;  %v3239_v50 = vpop.f32.mrb[5].mxu1 }
 0x7aa   : > { %v3245_v55 = vmul.f32 %v3238_v25, %v6124_v12 }
 0x7ac   : > { %v3249_v62 = vsel %vm1812_vm10, %v3245_v55, 0.0 }
 0x7ad   : > { %v3250_v1 = vadd.f32 %v3249_v62, %v3248_v42 }
 0x7af   : > { %3251 = vadd.xlane.f32.xlu0 %v3250_v1 }
 0x83c   : > { %v3252_v49 = vpop.xlane.xlu0 %3251 }
 0x83d   : > { %v3253_v53 = vmul.f32 0.00390625, %v3252_v49 }
 0x83f   : > { %v3254_v8 = vsub.f32 %v3096_v2, %v3253_v53  ;;  %v3255_v58 = vsub.f32 %v3098_v22, %v3253_v53  ;;  %v3256_v21 = vsub.f32 %v3167_v6, %v3253_v53  ;;  %v3257_v36 = vsub.f32 %v3169_v18, %v3253_v53 }
 0x840   : > { %v3258_v23 = vsub.f32 %v3238_v25, %v3253_v53 }
 0x841   : > { %v3259_v43 = vmul.f32 %v3254_v8, %v3254_v8  ;;  %v3260_v11 = vmul.f32 %v3255_v58, %v3255_v58  ;;  %v3261_v29 = vmul.f32 %v3256_v21, %v3256_v21  ;;  %v3262_v54 = vmul.f32 %v3257_v36, %v3257_v36 }
 0x842   : > { %v3263_v56 = vmul.f32 %v3258_v23, %v3258_v23 }
 0x843   : > { %v3264_v31 = vmul.f32 %v3259_v43, %v4934_v20  ;;  %v3265_v59 = vmul.f32 %v3260_v11, %v4936_v19  ;;  %v3266_v26 = vmul.f32 %v3261_v29, %v4940_v41  ;;  %v3267_v61 = vmul.f32 %v3262_v54, %v6123_v48 }
 0x844   : > { %v3268_v57 = vmul.f32 %v3263_v56, %v6124_v12 }
 0x845   : > { %v3269_v14 = vadd.f32 %v3265_v59, %v3264_v31 }
 0x846   : > { %v3272_v17 = vsel %vm1812_vm10, %v3268_v57, 0.0 }
 0x847   : > { %v3270_v39 = vadd.f32 %v3269_v14, %v3266_v26 }
 0x849   : > { %v3271_v60 = vadd.f32 %v3270_v39, %v3267_v61 }
 0x84b   : > { %v3273_v27 = vadd.f32 %v3272_v17, %v3271_v60 }
 0x84d   : > { %3274 = vadd.xlane.f32.xlu1 %v3273_v27 }
 0x8da   : > { %v3275_v44 = vpop.xlane.xlu1 %3274 }
 0x8db   : > { %v3276_v10 = vmul.f32 0.00390625, %v3275_v44 }
 0x8dd   : > { %v3277_v5 = vadd.f32 1e-05, %v3276_v10 }
 0x8df   : > { %3826 = vrsqrt.f32 %v3277_v5 }
 0x8e9   : > { %v3827_v20 = vpop.eup %3826 }
 0x8ea   : > { %v3279_v19 = vmul.f32 %v3827_v20, %v3254_v8  ;;  %v3280_v41 = vmul.f32 %v3827_v20, %v3255_v58  ;;  %v3281_v28 = vmul.f32 %v3827_v20, %v3256_v21  ;;  %v3282_v40 = vmul.f32 %v3827_v20, %v3257_v36 }
 0x8eb   : > { %v3283_v13 = vmul.f32 %v3827_v20, %v3258_v23 }
 0x8ec   : > { %v3284_v47 = vmax.f32 %v3279_v19, 0.0  ;;  %v3285_v37 = vmax.f32 %v3280_v41, 0.0  ;;  %v3286_v46 = vmax.f32 %v3281_v28, 0.0  ;;  %v3287_v52 = vmax.f32 %v3282_v40, 0.0 }
 0x8ed   : > { %v3288_v34 = vmax.f32 %v3283_v13, 0.0 }
 0x8ee   : > { %3289 = vst [vmem:[%s270_s23] sm:$0xff] %v3284_v47  ;;  %3290 = vst [vmem:[%s270_s23 + $0x8] sm:$0xff] %v3285_v37 }
 0x8ef   : > { %3291 = vst [vmem:[%s270_s23 + $0x10] sm:$0xff] %v3286_v46  ;;  %3292 = vst [vmem:[%s270_s23 + $0x18] sm:$0xff] %v3287_v52 }
 0x8f0   : > { %3293 = vst.msk [vmem:[%s270_s23 + $0x20] sm:$0xff] %vm1812_vm10, %v3288_v34 }
 0x8f1   : > { %3899 = shalt.err (!%p3896_p11)
}
 0x8f2   : > { %s3900_s13 = scalar_lea.hbm %s5808_s16, 640  ;;  %s3904_s12 = scalar_lea.hbm %s5857_s6, 1280 }
 0x8f3   : > { %p3901_p13 = scmp.ne.s32.totalorder %s5808_s16, %s3900_s13  ;;  %p3905_p5 = scmp.lt.u32.totalorder %s5808_s16, %s5857_s6 }
 0x8f4   : > { %p3906_p9 = scmp.lt.u32.totalorder %s3904_s12, %s3900_s13  ;;  %p3908_p12 = scmp.lt.u32.totalorder %s3900_s13, %s5808_s16 }
 0x8f5   : > { %p3902_p6 = pnand %p3901_p13, %p6125_p1 }
 0x8f6   : > { %p3907_p10 = por %p3906_p9, %p3905_p5 }
 0x8f7   : > { %p3903_p0 = pneg %p3902_p6 }
 0x8f8   : > { %p3909_p2 = por %p3908_p12, %p3907_p10 }
 0x8fa   : > { %p3910_p3 = pnand %p3909_p2, %p3903_p0 }
 0x8fc   : > { %3913 = shalt.err (!%p3910_p3)
}
 0x8fd   : > { %3696 = dma.vmem_to_hbm [thread:$0]  (%p6125_p1), %s5810_s24, 640, %s5808_s16, %s3295_s25  }
 0x8fe PF: > { %s6126_s20 = sld [smem:[#allocation17_spill]]  ;;  %s6127_s11 = sld [smem:[#allocation15_spill]] }
 0x8ff   : > { %s6128_s26 = sld [smem:[#allocation20_spill]] }
 0x904   : > { %p3713_p4 = scmp.ge.s32.totalorder %s6126_s20, 2  ;;  %s3321_s28 = sand.u32 1, %s6127_s11  }
 0x905   : > { %p6129_p7 = scmp.ne.s32.totalorder %s6128_s26, 0  ;;  %s3322_s3 = scalar_lea.sflag [#allocation8], %s3321_s28 }
 0x907   : > { %p3706_p8 = pnand %p3713_p4, %p6129_p7 }
 0x909   : > { %3939 = dma.done.wait (!%p3706_p8), %s3322_s3, 640  }
 0x90a   : > { %3941 = vsyncadd (!%p3706_p8), %s3322_s3, 4294966656  ;;  %s6130_s24 = sld [smem:[#allocation18_spill]]  ;;  %s6131_s30 = sld [smem:[#allocation16_spill]] }
 0x90b   : > { %s6132_s23 = sld [smem:[#allocation19_spill]]  ;;  %s6133_s21 = smov %s3948_s22 }
 0x910   : > { %p18_p11 = scmp.ge.s32.totalorder %s6130_s24, 4   ;;  %s6134_s22 = smov %s6131_s30 }
 0x912   :  { %20 = sbr.rel (!%p18_p11) target bundleno = 11 (0xb), region = 88 }
 0x919   :  { %3327 = vsyncpa [#allocation7], 1 }
 0x91a   :  { %3329 = vsyncpa [#allocation7 + $0x1], 1 }
 0x91b   :  { %3330 = vsyncpa [#allocation10], 1 }
 0x91c   :  { %3331 = vsyncpa [#allocation8], 1 }
 0x91d   :  { %3333 = vsyncpa [#allocation8 + $0x1], 1 }

</bundles_post_ra>
